<compile_context>
chip_gen: v5e
topology: v5e:2x2
jax: 0.10.0
libtpu: 0.0.40
codegen_flags: <defaults>
</compile_context>

<pallas_src>
import numpy as np
import jax
import jax.numpy as jnp
from jax.experimental import pallas as pl
from jax.experimental.pallas import tpu as pltpu

LEAKY_SLOPE = 0.2
BN_EPS = 1e-5
PAD = 1  # every conv in PatchDiscriminator uses padding=1


# --------------------------- host-side preprocessing ---------------------------

def spectral_normalize(w, n_iters=10):
    """Approximate SpectralNorm: divide the conv weight by its top singular value."""
    wm = w.reshape(w.shape[0], -1).astype(np.float64)
    u = np.ones((wm.shape[0],), np.float64) / np.sqrt(wm.shape[0])
    v = None
    for _ in range(n_iters):
        v = wm.T @ u
        v = v / (np.linalg.norm(v) + 1e-12)
        u = wm @ v
        u = u / (np.linalg.norm(u) + 1e-12)
    sigma = float(u @ (wm @ v))
    return (w / sigma).astype(np.float32)


def _toeplitz_bands(w, w_in, stride, ow):
    """(KH, W_in*Cin, OW*Cout) banded weight: W-direction conv + W padding folded in."""
    cout, cin, kh_sz, kw_sz = w.shape
    t = np.zeros((kh_sz, w_in * cin, ow * cout), np.float32)
    for kh in range(kh_sz):
        for o in range(ow):
            for kw in range(kw_sz):
                x = stride * o + kw - PAD            # unpadded input column
                if 0 <= x < w_in:
                    t[kh, x * cin:(x + 1) * cin, o * cout:(o + 1) * cout] = \
                        w[:, :, kh, kw].T
    return t


def _row_select(n, hp, oh, stride, hfull):
    """(N*OH, Hfull) 0/1 matrix: picks valid conv-output rows (handles H stride)."""
    s = np.zeros((n * oh, hfull), np.float32)
    for b in range(n):
        for o in range(oh):
            s[b * oh + o, b * hp + stride * o] = 1.0
    return s


def _bn_pool(ow, cout, m_count):
    """(L, L) matrix mapping per-lane row-sums to per-channel means broadcast on lanes."""
    eye = np.eye(cout, dtype=np.float32)
    p = np.zeros((ow * cout, ow * cout), np.float32)
    for o1 in range(ow):
        for o2 in range(ow):
            p[o1 * cout:(o1 + 1) * cout, o2 * cout:(o2 + 1) * cout] = eye
    return p / float(m_count)


def build_params(key, c_dim, conv_dim=8, n_layers=3):
    """Synthetic parameters matching PatchDiscriminator.__init__ shapes (numpy)."""
    keys = iter(jax.random.split(key, 2 * (n_layers + 2)))

    def normal(shape):
        return np.asarray(0.05 * jax.random.normal(next(keys), shape, jnp.float32))

    layers = [dict(w=normal((conv_dim, c_dim, 4, 4)), b=normal((conv_dim,)),
                   k=4, stride=2, spectral=False, bn=False, leaky=True)]
    nf = 1
    for n in range(1, n_layers):
        nf_prev, nf = nf, min(2 ** n, 8)
        layers.append(dict(w=normal((conv_dim * nf, conv_dim * nf_prev, 4, 4)), b=None,
                           k=4, stride=2, spectral=True, bn=True, leaky=True))
    nf_prev, nf = nf, min(2 ** n_layers, 8)
    layers.append(dict(w=normal((conv_dim * nf, conv_dim * nf_prev, 4, 4)), b=None,
                       k=4, stride=1, spectral=True, bn=True, leaky=True))
    layers.append(dict(w=normal((1, conv_dim * nf, 3, 3)), b=normal((1,)),
                       k=3, stride=1, spectral=False, bn=False, leaky=False))
    for lyr in layers:
        lyr["w_sn"] = spectral_normalize(lyr["w"]) if lyr["spectral"] else lyr["w"]
        if lyr["bn"]:
            cout = lyr["w"].shape[0]
            lyr["gamma"] = np.ones((cout,), np.float32)
            lyr["beta"] = np.zeros((cout,), np.float32)
    return layers


# ------------------------- fused Pallas forward builder -------------------------

def build_forward(layers, n, h, w_in, c_dim):
    n_lyr = len(layers)
    bn_flags = [lyr["bn"] for lyr in layers]
    bias_flags = [lyr["b"] is not None for lyr in layers]
    leaky_flags = [lyr["leaky"] for lyr in layers]

    # static geometry per layer
    geoms = []
    hc, wc, cc = h, w_in, c_dim
    for lyr in layers:
        k, s = lyr["k"], lyr["stride"]
        cout = lyr["w"].shape[0]
        hp = hc + 2 * PAD
        oh = (hp - k) // s + 1
        ow = (wc + 2 * PAD - k) // s + 1
        geoms.append(dict(cin=cc, cout=cout, k=k, s=s, h=hc, w=wc, hp=hp, oh=oh,
                          ow=ow, rows=n * hp, lanes=wc * cc,
                          hfull=n * hp - (k - 1), out_lanes=ow * cout))
        hc, wc, cc = oh, ow, cout

    # host-precomputed constants (built once, NOT in the per-forward path)
    def lane(v, ow):
        return jnp.asarray(np.tile(v.astype(np.float32), ow)[None, :])

    tops = [jnp.asarray(_toeplitz_bands(l["w_sn"], g["w"], g["s"], g["ow"]))
            for l, g in zip(layers, geoms)]
    sels = [jnp.asarray(_row_select(n, g["hp"], g["oh"], g["s"], g["hfull"]))
            for g in geoms]
    pools = [jnp.asarray(_bn_pool(g["ow"], g["cout"], n * g["oh"] * g["ow"]))
             for l, g in zip(layers, geoms) if l["bn"]]
    vecs = []
    for lyr, g in zip(layers, geoms):
        if lyr["b"] is not None:
            vecs.append(lane(lyr["b"], g["ow"]))
        elif lyr["bn"]:
            vecs.append(lane(lyr["gamma"], g["ow"]))
            vecs.append(lane(lyr["beta"], g["ow"]))
    const_inputs = tops + sels + pools + vecs

    # ------------------------------- the kernel --------------------------------
    def kernel(*refs):
        it = iter(refs)
        act_ref = next(it)
        t_refs = [next(it) for _ in range(n_lyr)]
        s_refs = [next(it) for _ in range(n_lyr)]
        p_refs = [next(it) if f else None for f in bn_flags]
        v_refs = []
        for i in range(n_lyr):
            if bias_flags[i]:
                v_refs.append((next(it),))
            elif bn_flags[i]:
                v_refs.append((next(it), next(it)))
            else:
                v_refs.append(())
        out_ref = next(it)
        scratch = [next(it) for _ in range(n_lyr - 1)]

        cur = act_ref
        for li, g in enumerate(geoms):
            hfull = g["hfull"]
            # banded conv: KH contiguous-slice matmuls, f32 accumulation
            acc = jnp.dot(cur[0:hfull, :], t_refs[li][0],
                          preferred_element_type=jnp.float32)
            for kh in range(1, g["k"]):
                acc = acc + jnp.dot(cur[kh:kh + hfull, :], t_refs[li][kh],
                                    preferred_element_type=jnp.float32)
            # H-stride subsampling + per-image valid-row extraction (one matmul)
            y = jnp.dot(s_refs[li][...], acc, preferred_element_type=jnp.float32)

            if bias_flags[li]:
                y = y + v_refs[li][0][...]
            if bn_flags[li]:
                pool = p_refs[li][...]
                mean = jnp.dot(jnp.sum(y, axis=0, keepdims=True), pool,
                               preferred_element_type=jnp.float32)
                cen = y - mean
                var = jnp.dot(jnp.sum(cen * cen, axis=0, keepdims=True), pool,
                              preferred_element_type=jnp.float32)
                y = cen * jax.lax.rsqrt(var + BN_EPS) * v_refs[li][0][...] \
                    + v_refs[li][1][...]
            if leaky_flags[li]:
                y = jnp.maximum(y, LEAKY_SLOPE * y)

            if li == n_lyr - 1:
                out_ref[...] = y
            else:
                nxt = scratch[li]
                gn = geoms[li + 1]
                nxt[...] = jnp.zeros_like(nxt)      # H-padding rows stay zero
                for b in range(n):
                    nxt[b * gn["hp"] + PAD:b * gn["hp"] + PAD + g["oh"], :] = \
                        y[b * g["oh"]:(b + 1) * g["oh"], :]
                cur = nxt

    # ------------------------------ pallas_call ---------------------------------
    def full_spec(shape):
        nd = len(shape)
        return pl.BlockSpec(tuple(shape), lambda *_, _nd=nd: (0,) * _nd)

    a0_shape = (geoms[0]["rows"], geoms[0]["lanes"])
    out_shape = jax.ShapeDtypeStruct((n * geoms[-1]["oh"], geoms[-1]["out_lanes"]),
                                     jnp.float32)
    in_specs = [full_spec(a0_shape)] + [full_spec(c.shape) for c in const_inputs]
    scratch_shapes = [pltpu.VMEM((geoms[li + 1]["rows"], geoms[li + 1]["lanes"]),
                                 jnp.float32) for li in range(n_lyr - 1)]

    call = pl.pallas_call(
        kernel,
        out_shape=out_shape,
        grid=(1,),
        in_specs=in_specs,
        out_specs=full_spec(out_shape.shape),
        scratch_shapes=scratch_shapes,
        compiler_params=pltpu.CompilerParams(dimension_semantics=("arbitrary",)),
    )

    oh_last, ow_last = geoms[-1]["oh"], geoms[-1]["ow"]

    def forward(x):  # x: (N, C, H, W) float32, NCHW like the PyTorch reference
        xh = jnp.transpose(x, (0, 2, 3, 1)).astype(jnp.float32)   # NHWC
        xh = jnp.pad(xh, ((0, 0), (PAD, PAD), (0, 0), (0, 0)))    # H padding only
        a0 = xh.reshape(n * (h + 2 * PAD), w_in * c_dim)          # (N*Hp, W*C)
        flat = call(a0, *const_inputs)
        return flat.reshape(n, oh_last, ow_last)[:, None, :, :]   # (N, 1, OH, OW)

    return jax.jit(forward)


# ----------------------------- pure-JAX reference ------------------------------

def reference_forward(x, layers):
    y = x.astype(jnp.float32)
    for lyr in layers:
        y = jax.lax.conv_general_dilated(
            y, jnp.asarray(lyr["w_sn"]), window_strides=(lyr["stride"],) * 2,
            padding=((PAD, PAD), (PAD, PAD)),
            dimension_numbers=("NCHW", "OIHW", "NCHW"),
            precision=jax.lax.Precision.HIGHEST)
        if lyr["b"] is not None:
            y = y + jnp.asarray(lyr["b"]).reshape(1, -1, 1, 1)
        if lyr["bn"]:
            mean = jnp.mean(y, axis=(0, 2, 3), keepdims=True)
            var = jnp.mean(jnp.square(y - mean), axis=(0, 2, 3), keepdims=True)
            y = (y - mean) * jax.lax.rsqrt(var + BN_EPS)
            y = y * jnp.asarray(lyr["gamma"]).reshape(1, -1, 1, 1) \
                + jnp.asarray(lyr["beta"]).reshape(1, -1, 1, 1)
        if lyr["leaky"]:
            y = jnp.where(y > 0, y, LEAKY_SLOPE * y)
    return y


# ----------------------------------- main --------------------------------------

if __name__ == "__main__":
    key = jax.random.PRNGKey(0)
    k_x, k_p = jax.random.split(key)

    N, C_DIM, H, W = 2, 4, 32, 32
    CONV_DIM, N_LAYERS = 8, 3

    x = jax.random.normal(k_x, (N, C_DIM, H, W), jnp.float32)
    layers = build_params(k_p, C_DIM, conv_dim=CONV_DIM, n_layers=N_LAYERS)

    fwd = build_forward(layers, N, H, W, C_DIM)
    out = jax.block_until_ready(fwd(x))

    # 32 -> 16 -> 8 -> 4 -> 3 -> 3 spatial, 1 output channel.
    assert out.shape == (N, 1, 3, 3), out.shape
    assert out.dtype == jnp.float32, out.dtype
    assert bool(jnp.all(jnp.isfinite(out)))

    ref = jax.block_until_ready(jax.jit(lambda v: reference_forward(v, layers))(x))
    assert jnp.allclose(out, ref, rtol=5e-3, atol=5e-3), \
        float(jnp.max(jnp.abs(out - ref)))

    print("KERNEL_OK")
</pallas_src>

<mosaic_0001>
module attributes {stable_mosaic.version = 11 : i64} {
  func.func @kernel(%arg0: i32, %arg1: memref<68x128xf32, #tpu.memory_space<vmem>>, %arg2: memref<4x128x128xf32, #tpu.memory_space<vmem>>, %arg3: memref<4x128x128xf32, #tpu.memory_space<vmem>>, %arg4: memref<4x128x128xf32, #tpu.memory_space<vmem>>, %arg5: memref<4x128x192xf32, #tpu.memory_space<vmem>>, %arg6: memref<3x192x3xf32, #tpu.memory_space<vmem>>, %arg7: memref<32x65xf32, #tpu.memory_space<vmem>>, %arg8: memref<16x33xf32, #tpu.memory_space<vmem>>, %arg9: memref<8x17xf32, #tpu.memory_space<vmem>>, %arg10: memref<6x9xf32, #tpu.memory_space<vmem>>, %arg11: memref<6x8xf32, #tpu.memory_space<vmem>>, %arg12: memref<128x128xf32, #tpu.memory_space<vmem>>, %arg13: memref<128x128xf32, #tpu.memory_space<vmem>>, %arg14: memref<192x192xf32, #tpu.memory_space<vmem>>, %arg15: memref<1x128xf32, #tpu.memory_space<vmem>>, %arg16: memref<1x128xf32, #tpu.memory_space<vmem>>, %arg17: memref<1x128xf32, #tpu.memory_space<vmem>>, %arg18: memref<1x128xf32, #tpu.memory_space<vmem>>, %arg19: memref<1x128xf32, #tpu.memory_space<vmem>>, %arg20: memref<1x192xf32, #tpu.memory_space<vmem>>, %arg21: memref<1x192xf32, #tpu.memory_space<vmem>>, %arg22: memref<1x3xf32, #tpu.memory_space<vmem>>, %arg23: memref<6x3xf32, #tpu.memory_space<vmem>>, %arg24: memref<36x128xf32, #tpu.memory_space<vmem>>, %arg25: memref<20x128xf32, #tpu.memory_space<vmem>>, %arg26: memref<12x128xf32, #tpu.memory_space<vmem>>, %arg27: memref<10x192xf32, #tpu.memory_space<vmem>>) attributes {dimension_semantics = [#tpu.dimension_semantics<arbitrary>], iteration_bounds = array<i64: 1>, scalar_prefetch = 0 : i64, scratch_operands = 4 : i64, tpu.core_type = #tpu.core_type<tc>, window_params = [{pipeline_mode = #tpu.pipeline_mode<synchronous>, transform_indices = @transform_0, window_bounds = array<i64: 68, 128>}, {pipeline_mode = #tpu.pipeline_mode<synchronous>, transform_indices = @transform_1, window_bounds = array<i64: 4, 128, 128>}, {pipeline_mode = #tpu.pipeline_mode<synchronous>, transform_indices = @transform_2, window_bounds = array<i64: 4, 128, 128>}, {pipeline_mode = #tpu.pipeline_mode<synchronous>, transform_indices = @transform_3, window_bounds = array<i64: 4, 128, 128>}, {pipeline_mode = #tpu.pipeline_mode<synchronous>, transform_indices = @transform_4, window_bounds = array<i64: 4, 128, 192>}, {pipeline_mode = #tpu.pipeline_mode<synchronous>, transform_indices = @transform_5, window_bounds = array<i64: 3, 192, 3>}, {pipeline_mode = #tpu.pipeline_mode<synchronous>, transform_indices = @transform_6, window_bounds = array<i64: 32, 65>}, {pipeline_mode = #tpu.pipeline_mode<synchronous>, transform_indices = @transform_7, window_bounds = array<i64: 16, 33>}, {pipeline_mode = #tpu.pipeline_mode<synchronous>, transform_indices = @transform_8, window_bounds = array<i64: 8, 17>}, {pipeline_mode = #tpu.pipeline_mode<synchronous>, transform_indices = @transform_9, window_bounds = array<i64: 6, 9>}, {pipeline_mode = #tpu.pipeline_mode<synchronous>, transform_indices = @transform_10, window_bounds = array<i64: 6, 8>}, {pipeline_mode = #tpu.pipeline_mode<synchronous>, transform_indices = @transform_11, window_bounds = array<i64: 128, 128>}, {pipeline_mode = #tpu.pipeline_mode<synchronous>, transform_indices = @transform_12, window_bounds = array<i64: 128, 128>}, {pipeline_mode = #tpu.pipeline_mode<synchronous>, transform_indices = @transform_13, window_bounds = array<i64: 192, 192>}, {pipeline_mode = #tpu.pipeline_mode<synchronous>, transform_indices = @transform_14, window_bounds = array<i64: 1, 128>}, {pipeline_mode = #tpu.pipeline_mode<synchronous>, transform_indices = @transform_15, window_bounds = array<i64: 1, 128>}, {pipeline_mode = #tpu.pipeline_mode<synchronous>, transform_indices = @transform_16, window_bounds = array<i64: 1, 128>}, {pipeline_mode = #tpu.pipeline_mode<synchronous>, transform_indices = @transform_17, window_bounds = array<i64: 1, 128>}, {pipeline_mode = #tpu.pipeline_mode<synchronous>, transform_indices = @transform_18, window_bounds = array<i64: 1, 128>}, {pipeline_mode = #tpu.pipeline_mode<synchronous>, transform_indices = @transform_19, window_bounds = array<i64: 1, 192>}, {pipeline_mode = #tpu.pipeline_mode<synchronous>, transform_indices = @transform_20, window_bounds = array<i64: 1, 192>}, {pipeline_mode = #tpu.pipeline_mode<synchronous>, transform_indices = @transform_21, window_bounds = array<i64: 1, 3>}, {pipeline_mode = #tpu.pipeline_mode<synchronous>, transform_indices = @transform_22, window_bounds = array<i64: 6, 3>}]} {
    %c0 = arith.constant 0 : index
    %c0_0 = arith.constant 0 : index
    %0 = vector.load %arg1[%c0, %c0_0] : memref<68x128xf32, #tpu.memory_space<vmem>>, vector<65x128xf32>
    %c0_1 = arith.constant 0 : index
    %c0_2 = arith.constant 0 : index
    %c0_3 = arith.constant 0 : index
    %1 = vector.load %arg2[%c0_1, %c0_2, %c0_3] : memref<4x128x128xf32, #tpu.memory_space<vmem>>, vector<1x128x128xf32>
    %2 = vector.shape_cast %1 : vector<1x128x128xf32> to vector<128x128xf32>
    %cst = arith.constant dense<0.000000e+00> : vector<65x128xf32>
    %3 = tpu.matmul %0, %2, %cst {dimension_numbers = #tpu.dot_dimension_numbers<[1], [0], [0], [1], [0, 0, 1, 1], [], []>} : vector<65x128xf32>, vector<128x128xf32>, vector<65x128xf32> -> vector<65x128xf32>
    %c1 = arith.constant 1 : index
    %c0_4 = arith.constant 0 : index
    %4 = vector.load %arg1[%c1, %c0_4] : memref<68x128xf32, #tpu.memory_space<vmem>>, vector<65x128xf32>
    %c1_5 = arith.constant 1 : index
    %c0_6 = arith.constant 0 : index
    %c0_7 = arith.constant 0 : index
    %5 = vector.load %arg2[%c1_5, %c0_6, %c0_7] : memref<4x128x128xf32, #tpu.memory_space<vmem>>, vector<1x128x128xf32>
    %6 = vector.shape_cast %5 : vector<1x128x128xf32> to vector<128x128xf32>
    %cst_8 = arith.constant dense<0.000000e+00> : vector<65x128xf32>
    %7 = tpu.matmul %4, %6, %cst_8 {dimension_numbers = #tpu.dot_dimension_numbers<[1], [0], [0], [1], [0, 0, 1, 1], [], []>} : vector<65x128xf32>, vector<128x128xf32>, vector<65x128xf32> -> vector<65x128xf32>
    %8 = arith.addf %3, %7 : vector<65x128xf32>
    %c2 = arith.constant 2 : index
    %c0_9 = arith.constant 0 : index
    %9 = vector.load %arg1[%c2, %c0_9] : memref<68x128xf32, #tpu.memory_space<vmem>>, vector<65x128xf32>
    %c2_10 = arith.constant 2 : index
    %c0_11 = arith.constant 0 : index
    %c0_12 = arith.constant 0 : index
    %10 = vector.load %arg2[%c2_10, %c0_11, %c0_12] : memref<4x128x128xf32, #tpu.memory_space<vmem>>, vector<1x128x128xf32>
    %11 = vector.shape_cast %10 : vector<1x128x128xf32> to vector<128x128xf32>
    %cst_13 = arith.constant dense<0.000000e+00> : vector<65x128xf32>
    %12 = tpu.matmul %9, %11, %cst_13 {dimension_numbers = #tpu.dot_dimension_numbers<[1], [0], [0], [1], [0, 0, 1, 1], [], []>} : vector<65x128xf32>, vector<128x128xf32>, vector<65x128xf32> -> vector<65x128xf32>
    %13 = arith.addf %8, %12 : vector<65x128xf32>
    %c3 = arith.constant 3 : index
    %c0_14 = arith.constant 0 : index
    %14 = vector.load %arg1[%c3, %c0_14] : memref<68x128xf32, #tpu.memory_space<vmem>>, vector<65x128xf32>
    %c3_15 = arith.constant 3 : index
    %c0_16 = arith.constant 0 : index
    %c0_17 = arith.constant 0 : index
    %15 = vector.load %arg2[%c3_15, %c0_16, %c0_17] : memref<4x128x128xf32, #tpu.memory_space<vmem>>, vector<1x128x128xf32>
    %16 = vector.shape_cast %15 : vector<1x128x128xf32> to vector<128x128xf32>
    %cst_18 = arith.constant dense<0.000000e+00> : vector<65x128xf32>
    %17 = tpu.matmul %14, %16, %cst_18 {dimension_numbers = #tpu.dot_dimension_numbers<[1], [0], [0], [1], [0, 0, 1, 1], [], []>} : vector<65x128xf32>, vector<128x128xf32>, vector<65x128xf32> -> vector<65x128xf32>
    %18 = arith.addf %13, %17 : vector<65x128xf32>
    %c0_19 = arith.constant 0 : index
    %c0_20 = arith.constant 0 : index
    %19 = vector.load %arg7[%c0_19, %c0_20] : memref<32x65xf32, #tpu.memory_space<vmem>>, vector<32x65xf32>
    %cst_21 = arith.constant dense<0.000000e+00> : vector<32x128xf32>
    %20 = tpu.matmul %19, %18, %cst_21 {dimension_numbers = #tpu.dot_dimension_numbers<[1], [0], [0], [1], [0, 0, 1, 1], [], []>} : vector<32x65xf32>, vector<65x128xf32>, vector<32x128xf32> -> vector<32x128xf32>
    %c0_22 = arith.constant 0 : index
    %c0_23 = arith.constant 0 : index
    %21 = vector.load %arg15[%c0_22, %c0_23] : memref<1x128xf32, #tpu.memory_space<vmem>>, vector<1x128xf32>
    %22 = vector.broadcast %21 : vector<1x128xf32> to vector<32x128xf32>
    %23 = arith.addf %20, %22 : vector<32x128xf32>
    %cst_24 = arith.constant 2.000000e-01 : f32
    %24 = vector.broadcast %cst_24 : f32 to vector<32x128xf32>
    %25 = arith.mulf %24, %23 : vector<32x128xf32>
    %26 = arith.maximumf %23, %25 : vector<32x128xf32>
    %cst_25 = arith.constant 0.000000e+00 : f32
    %27 = vector.broadcast %cst_25 : f32 to vector<36x128xf32>
    %c0_26 = arith.constant 0 : index
    %c0_27 = arith.constant 0 : index
    %28 = vector.load %arg24[%c0_26, %c0_27] : memref<36x128xf32, #tpu.memory_space<vmem>>, vector<36x128xf32>
    tpu.vector_store %arg24[%c0_26, %c0_27], %27 {strides = array<i32>} : memref<36x128xf32, #tpu.memory_space<vmem>>, vector<36x128xf32>,
    %29 = vector.extract_strided_slice %26 {offsets = [0, 0], sizes = [16, 128], strides = [1, 1]} : vector<32x128xf32> to vector<16x128xf32>
    %c1_28 = arith.constant 1 : index
    %c0_29 = arith.constant 0 : index
    %30 = vector.load %arg24[%c1_28, %c0_29] : memref<36x128xf32, #tpu.memory_space<vmem>>, vector<16x128xf32>
    tpu.vector_store %arg24[%c1_28, %c0_29], %29 {strides = array<i32>} : memref<36x128xf32, #tpu.memory_space<vmem>>, vector<16x128xf32>,
    %31 = vector.extract_strided_slice %26 {offsets = [16, 0], sizes = [16, 128], strides = [1, 1]} : vector<32x128xf32> to vector<16x128xf32>
    %c19 = arith.constant 19 : index
    %c0_30 = arith.constant 0 : index
    %32 = vector.load %arg24[%c19, %c0_30] : memref<36x128xf32, #tpu.memory_space<vmem>>, vector<16x128xf32>
    tpu.vector_store %arg24[%c19, %c0_30], %31 {strides = array<i32>} : memref<36x128xf32, #tpu.memory_space<vmem>>, vector<16x128xf32>,
    %c0_31 = arith.constant 0 : index
    %c0_32 = arith.constant 0 : index
    %33 = vector.load %arg24[%c0_31, %c0_32] : memref<36x128xf32, #tpu.memory_space<vmem>>, vector<33x128xf32>
    %c0_33 = arith.constant 0 : index
    %c0_34 = arith.constant 0 : index
    %c0_35 = arith.constant 0 : index
    %34 = vector.load %arg3[%c0_33, %c0_34, %c0_35] : memref<4x128x128xf32, #tpu.memory_space<vmem>>, vector<1x128x128xf32>
    %35 = vector.shape_cast %34 : vector<1x128x128xf32> to vector<128x128xf32>
    %cst_36 = arith.constant dense<0.000000e+00> : vector<33x128xf32>
    %36 = tpu.matmul %33, %35, %cst_36 {dimension_numbers = #tpu.dot_dimension_numbers<[1], [0], [0], [1], [0, 0, 1, 1], [], []>} : vector<33x128xf32>, vector<128x128xf32>, vector<33x128xf32> -> vector<33x128xf32>
    %c1_37 = arith.constant 1 : index
    %c0_38 = arith.constant 0 : index
    %37 = vector.load %arg24[%c1_37, %c0_38] : memref<36x128xf32, #tpu.memory_space<vmem>>, vector<33x128xf32>
    %c1_39 = arith.constant 1 : index
    %c0_40 = arith.constant 0 : index
    %c0_41 = arith.constant 0 : index
    %38 = vector.load %arg3[%c1_39, %c0_40, %c0_41] : memref<4x128x128xf32, #tpu.memory_space<vmem>>, vector<1x128x128xf32>
    %39 = vector.shape_cast %38 : vector<1x128x128xf32> to vector<128x128xf32>
    %cst_42 = arith.constant dense<0.000000e+00> : vector<33x128xf32>
    %40 = tpu.matmul %37, %39, %cst_42 {dimension_numbers = #tpu.dot_dimension_numbers<[1], [0], [0], [1], [0, 0, 1, 1], [], []>} : vector<33x128xf32>, vector<128x128xf32>, vector<33x128xf32> -> vector<33x128xf32>
    %41 = arith.addf %36, %40 : vector<33x128xf32>
    %c2_43 = arith.constant 2 : index
    %c0_44 = arith.constant 0 : index
    %42 = vector.load %arg24[%c2_43, %c0_44] : memref<36x128xf32, #tpu.memory_space<vmem>>, vector<33x128xf32>
    %c2_45 = arith.constant 2 : index
    %c0_46 = arith.constant 0 : index
    %c0_47 = arith.constant 0 : index
    %43 = vector.load %arg3[%c2_45, %c0_46, %c0_47] : memref<4x128x128xf32, #tpu.memory_space<vmem>>, vector<1x128x128xf32>
    %44 = vector.shape_cast %43 : vector<1x128x128xf32> to vector<128x128xf32>
    %cst_48 = arith.constant dense<0.000000e+00> : vector<33x128xf32>
    %45 = tpu.matmul %42, %44, %cst_48 {dimension_numbers = #tpu.dot_dimension_numbers<[1], [0], [0], [1], [0, 0, 1, 1], [], []>} : vector<33x128xf32>, vector<128x128xf32>, vector<33x128xf32> -> vector<33x128xf32>
    %46 = arith.addf %41, %45 : vector<33x128xf32>
    %c3_49 = arith.constant 3 : index
    %c0_50 = arith.constant 0 : index
    %47 = vector.load %arg24[%c3_49, %c0_50] : memref<36x128xf32, #tpu.memory_space<vmem>>, vector<33x128xf32>
    %c3_51 = arith.constant 3 : index
    %c0_52 = arith.constant 0 : index
    %c0_53 = arith.constant 0 : index
    %48 = vector.load %arg3[%c3_51, %c0_52, %c0_53] : memref<4x128x128xf32, #tpu.memory_space<vmem>>, vector<1x128x128xf32>
    %49 = vector.shape_cast %48 : vector<1x128x128xf32> to vector<128x128xf32>
    %cst_54 = arith.constant dense<0.000000e+00> : vector<33x128xf32>
    %50 = tpu.matmul %47, %49, %cst_54 {dimension_numbers = #tpu.dot_dimension_numbers<[1], [0], [0], [1], [0, 0, 1, 1], [], []>} : vector<33x128xf32>, vector<128x128xf32>, vector<33x128xf32> -> vector<33x128xf32>
    %51 = arith.addf %46, %50 : vector<33x128xf32>
    %c0_55 = arith.constant 0 : index
    %c0_56 = arith.constant 0 : index
    %52 = vector.load %arg8[%c0_55, %c0_56] : memref<16x33xf32, #tpu.memory_space<vmem>>, vector<16x33xf32>
    %cst_57 = arith.constant dense<0.000000e+00> : vector<16x128xf32>
    %53 = tpu.matmul %52, %51, %cst_57 {dimension_numbers = #tpu.dot_dimension_numbers<[1], [0], [0], [1], [0, 0, 1, 1], [], []>} : vector<16x33xf32>, vector<33x128xf32>, vector<16x128xf32> -> vector<16x128xf32>
    %c0_58 = arith.constant 0 : index
    %c0_59 = arith.constant 0 : index
    %54 = vector.load %arg12[%c0_58, %c0_59] : memref<128x128xf32, #tpu.memory_space<vmem>>, vector<128x128xf32>
    %cst_60 = arith.constant dense<0.000000e+00> : vector<128xf32>
    %55 = vector.multi_reduction <add>, %53, %cst_60 [0] : vector<16x128xf32> to vector<128xf32>
    %56 = vector.shape_cast %55 : vector<128xf32> to vector<1x128xf32>
    %cst_61 = arith.constant dense<0.000000e+00> : vector<1x128xf32>
    %57 = tpu.matmul %56, %54, %cst_61 {dimension_numbers = #tpu.dot_dimension_numbers<[1], [0], [0], [1], [0, 0, 1, 1], [], []>} : vector<1x128xf32>, vector<128x128xf32>, vector<1x128xf32> -> vector<1x128xf32>
    %58 = vector.broadcast %57 : vector<1x128xf32> to vector<16x128xf32>
    %59 = arith.subf %53, %58 : vector<16x128xf32>
    %60 = arith.mulf %59, %59 : vector<16x128xf32>
    %cst_62 = arith.constant dense<0.000000e+00> : vector<128xf32>
    %61 = vector.multi_reduction <add>, %60, %cst_62 [0] : vector<16x128xf32> to vector<128xf32>
    %62 = vector.shape_cast %61 : vector<128xf32> to vector<1x128xf32>
    %cst_63 = arith.constant dense<0.000000e+00> : vector<1x128xf32>
    %63 = tpu.matmul %62, %54, %cst_63 {dimension_numbers = #tpu.dot_dimension_numbers<[1], [0], [0], [1], [0, 0, 1, 1], [], []>} : vector<1x128xf32>, vector<128x128xf32>, vector<1x128xf32> -> vector<1x128xf32>
    %cst_64 = arith.constant 9.99999974E-6 : f32
    %64 = vector.broadcast %cst_64 : f32 to vector<1x128xf32>
    %65 = arith.addf %63, %64 : vector<1x128xf32>
    %66 = math.rsqrt %65 : vector<1x128xf32>
    %67 = vector.broadcast %66 : vector<1x128xf32> to vector<16x128xf32>
    %68 = arith.mulf %59, %67 : vector<16x128xf32>
    %c0_65 = arith.constant 0 : index
    %c0_66 = arith.constant 0 : index
    %69 = vector.load %arg16[%c0_65, %c0_66] : memref<1x128xf32, #tpu.memory_space<vmem>>, vector<1x128xf32>
    %70 = vector.broadcast %69 : vector<1x128xf32> to vector<16x128xf32>
    %71 = arith.mulf %68, %70 : vector<16x128xf32>
    %c0_67 = arith.constant 0 : index
    %c0_68 = arith.constant 0 : index
    %72 = vector.load %arg17[%c0_67, %c0_68] : memref<1x128xf32, #tpu.memory_space<vmem>>, vector<1x128xf32>
    %73 = vector.broadcast %72 : vector<1x128xf32> to vector<16x128xf32>
    %74 = arith.addf %71, %73 : vector<16x128xf32>
    %cst_69 = arith.constant 2.000000e-01 : f32
    %75 = vector.broadcast %cst_69 : f32 to vector<16x128xf32>
    %76 = arith.mulf %75, %74 : vector<16x128xf32>
    %77 = arith.maximumf %74, %76 : vector<16x128xf32>
    %cst_70 = arith.constant 0.000000e+00 : f32
    %78 = vector.broadcast %cst_70 : f32 to vector<20x128xf32>
    %c0_71 = arith.constant 0 : index
    %c0_72 = arith.constant 0 : index
    %79 = vector.load %arg25[%c0_71, %c0_72] : memref<20x128xf32, #tpu.memory_space<vmem>>, vector<20x128xf32>
    tpu.vector_store %arg25[%c0_71, %c0_72], %78 {strides = array<i32>} : memref<20x128xf32, #tpu.memory_space<vmem>>, vector<20x128xf32>,
    %80 = vector.extract_strided_slice %77 {offsets = [0, 0], sizes = [8, 128], strides = [1, 1]} : vector<16x128xf32> to vector<8x128xf32>
    %c1_73 = arith.constant 1 : index
    %c0_74 = arith.constant 0 : index
    %81 = vector.load %arg25[%c1_73, %c0_74] : memref<20x128xf32, #tpu.memory_space<vmem>>, vector<8x128xf32>
    tpu.vector_store %arg25[%c1_73, %c0_74], %80 {strides = array<i32>} : memref<20x128xf32, #tpu.memory_space<vmem>>, vector<8x128xf32>,
    %82 = vector.extract_strided_slice %77 {offsets = [8, 0], sizes = [8, 128], strides = [1, 1]} : vector<16x128xf32> to vector<8x128xf32>
    %c11 = arith.constant 11 : index
    %c0_75 = arith.constant 0 : index
    %83 = vector.load %arg25[%c11, %c0_75] : memref<20x128xf32, #tpu.memory_space<vmem>>, vector<8x128xf32>
    tpu.vector_store %arg25[%c11, %c0_75], %82 {strides = array<i32>} : memref<20x128xf32, #tpu.memory_space<vmem>>, vector<8x128xf32>,
    %c0_76 = arith.constant 0 : index
    %c0_77 = arith.constant 0 : index
    %84 = vector.load %arg25[%c0_76, %c0_77] : memref<20x128xf32, #tpu.memory_space<vmem>>, vector<17x128xf32>
    %c0_78 = arith.constant 0 : index
    %c0_79 = arith.constant 0 : index
    %c0_80 = arith.constant 0 : index
    %85 = vector.load %arg4[%c0_78, %c0_79, %c0_80] : memref<4x128x128xf32, #tpu.memory_space<vmem>>, vector<1x128x128xf32>
    %86 = vector.shape_cast %85 : vector<1x128x128xf32> to vector<128x128xf32>
    %cst_81 = arith.constant dense<0.000000e+00> : vector<17x128xf32>
    %87 = tpu.matmul %84, %86, %cst_81 {dimension_numbers = #tpu.dot_dimension_numbers<[1], [0], [0], [1], [0, 0, 1, 1], [], []>} : vector<17x128xf32>, vector<128x128xf32>, vector<17x128xf32> -> vector<17x128xf32>
    %c1_82 = arith.constant 1 : index
    %c0_83 = arith.constant 0 : index
    %88 = vector.load %arg25[%c1_82, %c0_83] : memref<20x128xf32, #tpu.memory_space<vmem>>, vector<17x128xf32>
    %c1_84 = arith.constant 1 : index
    %c0_85 = arith.constant 0 : index
    %c0_86 = arith.constant 0 : index
    %89 = vector.load %arg4[%c1_84, %c0_85, %c0_86] : memref<4x128x128xf32, #tpu.memory_space<vmem>>, vector<1x128x128xf32>
    %90 = vector.shape_cast %89 : vector<1x128x128xf32> to vector<128x128xf32>
    %cst_87 = arith.constant dense<0.000000e+00> : vector<17x128xf32>
    %91 = tpu.matmul %88, %90, %cst_87 {dimension_numbers = #tpu.dot_dimension_numbers<[1], [0], [0], [1], [0, 0, 1, 1], [], []>} : vector<17x128xf32>, vector<128x128xf32>, vector<17x128xf32> -> vector<17x128xf32>
    %92 = arith.addf %87, %91 : vector<17x128xf32>
    %c2_88 = arith.constant 2 : index
    %c0_89 = arith.constant 0 : index
    %93 = vector.load %arg25[%c2_88, %c0_89] : memref<20x128xf32, #tpu.memory_space<vmem>>, vector<17x128xf32>
    %c2_90 = arith.constant 2 : index
    %c0_91 = arith.constant 0 : index
    %c0_92 = arith.constant 0 : index
    %94 = vector.load %arg4[%c2_90, %c0_91, %c0_92] : memref<4x128x128xf32, #tpu.memory_space<vmem>>, vector<1x128x128xf32>
    %95 = vector.shape_cast %94 : vector<1x128x128xf32> to vector<128x128xf32>
    %cst_93 = arith.constant dense<0.000000e+00> : vector<17x128xf32>
    %96 = tpu.matmul %93, %95, %cst_93 {dimension_numbers = #tpu.dot_dimension_numbers<[1], [0], [0], [1], [0, 0, 1, 1], [], []>} : vector<17x128xf32>, vector<128x128xf32>, vector<17x128xf32> -> vector<17x128xf32>
    %97 = arith.addf %92, %96 : vector<17x128xf32>
    %c3_94 = arith.constant 3 : index
    %c0_95 = arith.constant 0 : index
    %98 = vector.load %arg25[%c3_94, %c0_95] : memref<20x128xf32, #tpu.memory_space<vmem>>, vector<17x128xf32>
    %c3_96 = arith.constant 3 : index
    %c0_97 = arith.constant 0 : index
    %c0_98 = arith.constant 0 : index
    %99 = vector.load %arg4[%c3_96, %c0_97, %c0_98] : memref<4x128x128xf32, #tpu.memory_space<vmem>>, vector<1x128x128xf32>
    %100 = vector.shape_cast %99 : vector<1x128x128xf32> to vector<128x128xf32>
    %cst_99 = arith.constant dense<0.000000e+00> : vector<17x128xf32>
    %101 = tpu.matmul %98, %100, %cst_99 {dimension_numbers = #tpu.dot_dimension_numbers<[1], [0], [0], [1], [0, 0, 1, 1], [], []>} : vector<17x128xf32>, vector<128x128xf32>, vector<17x128xf32> -> vector<17x128xf32>
    %102 = arith.addf %97, %101 : vector<17x128xf32>
    %c0_100 = arith.constant 0 : index
    %c0_101 = arith.constant 0 : index
    %103 = vector.load %arg9[%c0_100, %c0_101] : memref<8x17xf32, #tpu.memory_space<vmem>>, vector<8x17xf32>
    %cst_102 = arith.constant dense<0.000000e+00> : vector<8x128xf32>
    %104 = tpu.matmul %103, %102, %cst_102 {dimension_numbers = #tpu.dot_dimension_numbers<[1], [0], [0], [1], [0, 0, 1, 1], [], []>} : vector<8x17xf32>, vector<17x128xf32>, vector<8x128xf32> -> vector<8x128xf32>
    %c0_103 = arith.constant 0 : index
    %c0_104 = arith.constant 0 : index
    %105 = vector.load %arg13[%c0_103, %c0_104] : memref<128x128xf32, #tpu.memory_space<vmem>>, vector<128x128xf32>
    %cst_105 = arith.constant dense<0.000000e+00> : vector<128xf32>
    %106 = vector.multi_reduction <add>, %104, %cst_105 [0] : vector<8x128xf32> to vector<128xf32>
    %107 = vector.shape_cast %106 : vector<128xf32> to vector<1x128xf32>
    %cst_106 = arith.constant dense<0.000000e+00> : vector<1x128xf32>
    %108 = tpu.matmul %107, %105, %cst_106 {dimension_numbers = #tpu.dot_dimension_numbers<[1], [0], [0], [1], [0, 0, 1, 1], [], []>} : vector<1x128xf32>, vector<128x128xf32>, vector<1x128xf32> -> vector<1x128xf32>
    %109 = vector.broadcast %108 : vector<1x128xf32> to vector<8x128xf32>
    %110 = arith.subf %104, %109 : vector<8x128xf32>
    %111 = arith.mulf %110, %110 : vector<8x128xf32>
    %cst_107 = arith.constant dense<0.000000e+00> : vector<128xf32>
    %112 = vector.multi_reduction <add>, %111, %cst_107 [0] : vector<8x128xf32> to vector<128xf32>
    %113 = vector.shape_cast %112 : vector<128xf32> to vector<1x128xf32>
    %cst_108 = arith.constant dense<0.000000e+00> : vector<1x128xf32>
    %114 = tpu.matmul %113, %105, %cst_108 {dimension_numbers = #tpu.dot_dimension_numbers<[1], [0], [0], [1], [0, 0, 1, 1], [], []>} : vector<1x128xf32>, vector<128x128xf32>, vector<1x128xf32> -> vector<1x128xf32>
    %cst_109 = arith.constant 9.99999974E-6 : f32
    %115 = vector.broadcast %cst_109 : f32 to vector<1x128xf32>
    %116 = arith.addf %114, %115 : vector<1x128xf32>
    %117 = math.rsqrt %116 : vector<1x128xf32>
    %118 = vector.broadcast %117 : vector<1x128xf32> to vector<8x128xf32>
    %119 = arith.mulf %110, %118 : vector<8x128xf32>
    %c0_110 = arith.constant 0 : index
    %c0_111 = arith.constant 0 : index
    %120 = vector.load %arg18[%c0_110, %c0_111] : memref<1x128xf32, #tpu.memory_space<vmem>>, vector<1x128xf32>
    %121 = vector.broadcast %120 : vector<1x128xf32> to vector<8x128xf32>
    %122 = arith.mulf %119, %121 : vector<8x128xf32>
    %c0_112 = arith.constant 0 : index
    %c0_113 = arith.constant 0 : index
    %123 = vector.load %arg19[%c0_112, %c0_113] : memref<1x128xf32, #tpu.memory_space<vmem>>, vector<1x128xf32>
    %124 = vector.broadcast %123 : vector<1x128xf32> to vector<8x128xf32>
    %125 = arith.addf %122, %124 : vector<8x128xf32>
    %cst_114 = arith.constant 2.000000e-01 : f32
    %126 = vector.broadcast %cst_114 : f32 to vector<8x128xf32>
    %127 = arith.mulf %126, %125 : vector<8x128xf32>
    %128 = arith.maximumf %125, %127 : vector<8x128xf32>
    %cst_115 = arith.constant 0.000000e+00 : f32
    %129 = vector.broadcast %cst_115 : f32 to vector<12x128xf32>
    %c0_116 = arith.constant 0 : index
    %c0_117 = arith.constant 0 : index
    %130 = vector.load %arg26[%c0_116, %c0_117] : memref<12x128xf32, #tpu.memory_space<vmem>>, vector<12x128xf32>
    tpu.vector_store %arg26[%c0_116, %c0_117], %129 {strides = array<i32>} : memref<12x128xf32, #tpu.memory_space<vmem>>, vector<12x128xf32>,
    %131 = vector.extract_strided_slice %128 {offsets = [0, 0], sizes = [4, 128], strides = [1, 1]} : vector<8x128xf32> to vector<4x128xf32>
    %c1_118 = arith.constant 1 : index
    %c0_119 = arith.constant 0 : index
    %132 = vector.load %arg26[%c1_118, %c0_119] : memref<12x128xf32, #tpu.memory_space<vmem>>, vector<4x128xf32>
    tpu.vector_store %arg26[%c1_118, %c0_119], %131 {strides = array<i32>} : memref<12x128xf32, #tpu.memory_space<vmem>>, vector<4x128xf32>,
    %133 = vector.extract_strided_slice %128 {offsets = [4, 0], sizes = [4, 128], strides = [1, 1]} : vector<8x128xf32> to vector<4x128xf32>
    %c7 = arith.constant 7 : index
    %c0_120 = arith.constant 0 : index
    %134 = vector.load %arg26[%c7, %c0_120] : memref<12x128xf32, #tpu.memory_space<vmem>>, vector<4x128xf32>
    tpu.vector_store %arg26[%c7, %c0_120], %133 {strides = array<i32>} : memref<12x128xf32, #tpu.memory_space<vmem>>, vector<4x128xf32>,
    %c0_121 = arith.constant 0 : index
    %c0_122 = arith.constant 0 : index
    %135 = vector.load %arg26[%c0_121, %c0_122] : memref<12x128xf32, #tpu.memory_space<vmem>>, vector<9x128xf32>
    %c0_123 = arith.constant 0 : index
    %c0_124 = arith.constant 0 : index
    %c0_125 = arith.constant 0 : index
    %136 = vector.load %arg5[%c0_123, %c0_124, %c0_125] : memref<4x128x192xf32, #tpu.memory_space<vmem>>, vector<1x128x192xf32>
    %137 = vector.shape_cast %136 : vector<1x128x192xf32> to vector<128x192xf32>
    %cst_126 = arith.constant dense<0.000000e+00> : vector<9x192xf32>
    %138 = tpu.matmul %135, %137, %cst_126 {dimension_numbers = #tpu.dot_dimension_numbers<[1], [0], [0], [1], [0, 0, 1, 1], [], []>} : vector<9x128xf32>, vector<128x192xf32>, vector<9x192xf32> -> vector<9x192xf32>
    %c1_127 = arith.constant 1 : index
    %c0_128 = arith.constant 0 : index
    %139 = vector.load %arg26[%c1_127, %c0_128] : memref<12x128xf32, #tpu.memory_space<vmem>>, vector<9x128xf32>
    %c1_129 = arith.constant 1 : index
    %c0_130 = arith.constant 0 : index
    %c0_131 = arith.constant 0 : index
    %140 = vector.load %arg5[%c1_129, %c0_130, %c0_131] : memref<4x128x192xf32, #tpu.memory_space<vmem>>, vector<1x128x192xf32>
    %141 = vector.shape_cast %140 : vector<1x128x192xf32> to vector<128x192xf32>
    %cst_132 = arith.constant dense<0.000000e+00> : vector<9x192xf32>
    %142 = tpu.matmul %139, %141, %cst_132 {dimension_numbers = #tpu.dot_dimension_numbers<[1], [0], [0], [1], [0, 0, 1, 1], [], []>} : vector<9x128xf32>, vector<128x192xf32>, vector<9x192xf32> -> vector<9x192xf32>
    %143 = arith.addf %138, %142 : vector<9x192xf32>
    %c2_133 = arith.constant 2 : index
    %c0_134 = arith.constant 0 : index
    %144 = vector.load %arg26[%c2_133, %c0_134] : memref<12x128xf32, #tpu.memory_space<vmem>>, vector<9x128xf32>
    %c2_135 = arith.constant 2 : index
    %c0_136 = arith.constant 0 : index
    %c0_137 = arith.constant 0 : index
    %145 = vector.load %arg5[%c2_135, %c0_136, %c0_137] : memref<4x128x192xf32, #tpu.memory_space<vmem>>, vector<1x128x192xf32>
    %146 = vector.shape_cast %145 : vector<1x128x192xf32> to vector<128x192xf32>
    %cst_138 = arith.constant dense<0.000000e+00> : vector<9x192xf32>
    %147 = tpu.matmul %144, %146, %cst_138 {dimension_numbers = #tpu.dot_dimension_numbers<[1], [0], [0], [1], [0, 0, 1, 1], [], []>} : vector<9x128xf32>, vector<128x192xf32>, vector<9x192xf32> -> vector<9x192xf32>
    %148 = arith.addf %143, %147 : vector<9x192xf32>
    %c3_139 = arith.constant 3 : index
    %c0_140 = arith.constant 0 : index
    %149 = vector.load %arg26[%c3_139, %c0_140] : memref<12x128xf32, #tpu.memory_space<vmem>>, vector<9x128xf32>
    %c3_141 = arith.constant 3 : index
    %c0_142 = arith.constant 0 : index
    %c0_143 = arith.constant 0 : index
    %150 = vector.load %arg5[%c3_141, %c0_142, %c0_143] : memref<4x128x192xf32, #tpu.memory_space<vmem>>, vector<1x128x192xf32>
    %151 = vector.shape_cast %150 : vector<1x128x192xf32> to vector<128x192xf32>
    %cst_144 = arith.constant dense<0.000000e+00> : vector<9x192xf32>
    %152 = tpu.matmul %149, %151, %cst_144 {dimension_numbers = #tpu.dot_dimension_numbers<[1], [0], [0], [1], [0, 0, 1, 1], [], []>} : vector<9x128xf32>, vector<128x192xf32>, vector<9x192xf32> -> vector<9x192xf32>
    %153 = arith.addf %148, %152 : vector<9x192xf32>
    %c0_145 = arith.constant 0 : index
    %c0_146 = arith.constant 0 : index
    %154 = vector.load %arg10[%c0_145, %c0_146] : memref<6x9xf32, #tpu.memory_space<vmem>>, vector<6x9xf32>
    %cst_147 = arith.constant dense<0.000000e+00> : vector<6x192xf32>
    %155 = tpu.matmul %154, %153, %cst_147 {dimension_numbers = #tpu.dot_dimension_numbers<[1], [0], [0], [1], [0, 0, 1, 1], [], []>} : vector<6x9xf32>, vector<9x192xf32>, vector<6x192xf32> -> vector<6x192xf32>
    %c0_148 = arith.constant 0 : index
    %c0_149 = arith.constant 0 : index
    %156 = vector.load %arg14[%c0_148, %c0_149] : memref<192x192xf32, #tpu.memory_space<vmem>>, vector<192x192xf32>
    %cst_150 = arith.constant dense<0.000000e+00> : vector<192xf32>
    %157 = vector.multi_reduction <add>, %155, %cst_150 [0] : vector<6x192xf32> to vector<192xf32>
    %158 = vector.shape_cast %157 : vector<192xf32> to vector<1x192xf32>
    %cst_151 = arith.constant dense<0.000000e+00> : vector<1x192xf32>
    %159 = tpu.matmul %158, %156, %cst_151 {dimension_numbers = #tpu.dot_dimension_numbers<[1], [0], [0], [1], [0, 0, 1, 1], [], []>} : vector<1x192xf32>, vector<192x192xf32>, vector<1x192xf32> -> vector<1x192xf32>
    %160 = vector.broadcast %159 : vector<1x192xf32> to vector<6x192xf32>
    %161 = arith.subf %155, %160 : vector<6x192xf32>
    %162 = arith.mulf %161, %161 : vector<6x192xf32>
    %cst_152 = arith.constant dense<0.000000e+00> : vector<192xf32>
    %163 = vector.multi_reduction <add>, %162, %cst_152 [0] : vector<6x192xf32> to vector<192xf32>
    %164 = vector.shape_cast %163 : vector<192xf32> to vector<1x192xf32>
    %cst_153 = arith.constant dense<0.000000e+00> : vector<1x192xf32>
    %165 = tpu.matmul %164, %156, %cst_153 {dimension_numbers = #tpu.dot_dimension_numbers<[1], [0], [0], [1], [0, 0, 1, 1], [], []>} : vector<1x192xf32>, vector<192x192xf32>, vector<1x192xf32> -> vector<1x192xf32>
    %cst_154 = arith.constant 9.99999974E-6 : f32
    %166 = vector.broadcast %cst_154 : f32 to vector<1x192xf32>
    %167 = arith.addf %165, %166 : vector<1x192xf32>
    %168 = math.rsqrt %167 : vector<1x192xf32>
    %169 = vector.broadcast %168 : vector<1x192xf32> to vector<6x192xf32>
    %170 = arith.mulf %161, %169 : vector<6x192xf32>
    %c0_155 = arith.constant 0 : index
    %c0_156 = arith.constant 0 : index
    %171 = vector.load %arg20[%c0_155, %c0_156] : memref<1x192xf32, #tpu.memory_space<vmem>>, vector<1x192xf32>
    %172 = vector.broadcast %171 : vector<1x192xf32> to vector<6x192xf32>
    %173 = arith.mulf %170, %172 : vector<6x192xf32>
    %c0_157 = arith.constant 0 : index
    %c0_158 = arith.constant 0 : index
    %174 = vector.load %arg21[%c0_157, %c0_158] : memref<1x192xf32, #tpu.memory_space<vmem>>, vector<1x192xf32>
    %175 = vector.broadcast %174 : vector<1x192xf32> to vector<6x192xf32>
    %176 = arith.addf %173, %175 : vector<6x192xf32>
    %cst_159 = arith.constant 2.000000e-01 : f32
    %177 = vector.broadcast %cst_159 : f32 to vector<6x192xf32>
    %178 = arith.mulf %177, %176 : vector<6x192xf32>
    %179 = arith.maximumf %176, %178 : vector<6x192xf32>
    %cst_160 = arith.constant 0.000000e+00 : f32
    %180 = vector.broadcast %cst_160 : f32 to vector<10x192xf32>
    %c0_161 = arith.constant 0 : index
    %c0_162 = arith.constant 0 : index
    %181 = vector.load %arg27[%c0_161, %c0_162] : memref<10x192xf32, #tpu.memory_space<vmem>>, vector<10x192xf32>
    tpu.vector_store %arg27[%c0_161, %c0_162], %180 {strides = array<i32>} : memref<10x192xf32, #tpu.memory_space<vmem>>, vector<10x192xf32>,
    %182 = vector.extract_strided_slice %179 {offsets = [0, 0], sizes = [3, 192], strides = [1, 1]} : vector<6x192xf32> to vector<3x192xf32>
    %c1_163 = arith.constant 1 : index
    %c0_164 = arith.constant 0 : index
    %183 = vector.load %arg27[%c1_163, %c0_164] : memref<10x192xf32, #tpu.memory_space<vmem>>, vector<3x192xf32>
    tpu.vector_store %arg27[%c1_163, %c0_164], %182 {strides = array<i32>} : memref<10x192xf32, #tpu.memory_space<vmem>>, vector<3x192xf32>,
    %184 = vector.extract_strided_slice %179 {offsets = [3, 0], sizes = [3, 192], strides = [1, 1]} : vector<6x192xf32> to vector<3x192xf32>
    %c6 = arith.constant 6 : index
    %c0_165 = arith.constant 0 : index
    %185 = vector.load %arg27[%c6, %c0_165] : memref<10x192xf32, #tpu.memory_space<vmem>>, vector<3x192xf32>
    tpu.vector_store %arg27[%c6, %c0_165], %184 {strides = array<i32>} : memref<10x192xf32, #tpu.memory_space<vmem>>, vector<3x192xf32>,
    %c0_166 = arith.constant 0 : index
    %c0_167 = arith.constant 0 : index
    %186 = vector.load %arg27[%c0_166, %c0_167] : memref<10x192xf32, #tpu.memory_space<vmem>>, vector<8x192xf32>
    %c0_168 = arith.constant 0 : index
    %c0_169 = arith.constant 0 : index
    %c0_170 = arith.constant 0 : index
    %187 = vector.load %arg6[%c0_168, %c0_169, %c0_170] : memref<3x192x3xf32, #tpu.memory_space<vmem>>, vector<1x192x3xf32>
    %188 = vector.shape_cast %187 : vector<1x192x3xf32> to vector<192x3xf32>
    %cst_171 = arith.constant dense<0.000000e+00> : vector<8x3xf32>
    %189 = tpu.matmul %186, %188, %cst_171 {dimension_numbers = #tpu.dot_dimension_numbers<[1], [0], [0], [1], [0, 0, 1, 1], [], []>} : vector<8x192xf32>, vector<192x3xf32>, vector<8x3xf32> -> vector<8x3xf32>
    %c1_172 = arith.constant 1 : index
    %c0_173 = arith.constant 0 : index
    %190 = vector.load %arg27[%c1_172, %c0_173] : memref<10x192xf32, #tpu.memory_space<vmem>>, vector<8x192xf32>
    %c1_174 = arith.constant 1 : index
    %c0_175 = arith.constant 0 : index
    %c0_176 = arith.constant 0 : index
    %191 = vector.load %arg6[%c1_174, %c0_175, %c0_176] : memref<3x192x3xf32, #tpu.memory_space<vmem>>, vector<1x192x3xf32>
    %192 = vector.shape_cast %191 : vector<1x192x3xf32> to vector<192x3xf32>
    %cst_177 = arith.constant dense<0.000000e+00> : vector<8x3xf32>
    %193 = tpu.matmul %190, %192, %cst_177 {dimension_numbers = #tpu.dot_dimension_numbers<[1], [0], [0], [1], [0, 0, 1, 1], [], []>} : vector<8x192xf32>, vector<192x3xf32>, vector<8x3xf32> -> vector<8x3xf32>
    %194 = arith.addf %189, %193 : vector<8x3xf32>
    %c2_178 = arith.constant 2 : index
    %c0_179 = arith.constant 0 : index
    %195 = vector.load %arg27[%c2_178, %c0_179] : memref<10x192xf32, #tpu.memory_space<vmem>>, vector<8x192xf32>
    %c2_180 = arith.constant 2 : index
    %c0_181 = arith.constant 0 : index
    %c0_182 = arith.constant 0 : index
    %196 = vector.load %arg6[%c2_180, %c0_181, %c0_182] : memref<3x192x3xf32, #tpu.memory_space<vmem>>, vector<1x192x3xf32>
    %197 = vector.shape_cast %196 : vector<1x192x3xf32> to vector<192x3xf32>
    %cst_183 = arith.constant dense<0.000000e+00> : vector<8x3xf32>
    %198 = tpu.matmul %195, %197, %cst_183 {dimension_numbers = #tpu.dot_dimension_numbers<[1], [0], [0], [1], [0, 0, 1, 1], [], []>} : vector<8x192xf32>, vector<192x3xf32>, vector<8x3xf32> -> vector<8x3xf32>
    %199 = arith.addf %194, %198 : vector<8x3xf32>
    %c0_184 = arith.constant 0 : index
    %c0_185 = arith.constant 0 : index
    %200 = vector.load %arg11[%c0_184, %c0_185] : memref<6x8xf32, #tpu.memory_space<vmem>>, vector<6x8xf32>
    %cst_186 = arith.constant dense<0.000000e+00> : vector<6x3xf32>
    %201 = tpu.matmul %200, %199, %cst_186 {dimension_numbers = #tpu.dot_dimension_numbers<[1], [0], [0], [1], [0, 0, 1, 1], [], []>} : vector<6x8xf32>, vector<8x3xf32>, vector<6x3xf32> -> vector<6x3xf32>
    %c0_187 = arith.constant 0 : index
    %c0_188 = arith.constant 0 : index
    %202 = vector.load %arg22[%c0_187, %c0_188] : memref<1x3xf32, #tpu.memory_space<vmem>>, vector<1x3xf32>
    %203 = vector.broadcast %202 : vector<1x3xf32> to vector<6x3xf32>
    %204 = arith.addf %201, %203 : vector<6x3xf32>
    %c0_189 = arith.constant 0 : index
    %c0_190 = arith.constant 0 : index
    %205 = vector.load %arg23[%c0_189, %c0_190] : memref<6x3xf32, #tpu.memory_space<vmem>>, vector<6x3xf32>
    tpu.vector_store %arg23[%c0_189, %c0_190], %204 {strides = array<i32>} : memref<6x3xf32, #tpu.memory_space<vmem>>, vector<6x3xf32>,
    return
  }
  func.func @transform_0(%arg0: i32) -> (i32, i32) {
    %c0_i32 = arith.constant 0 : i32
    %c0_i32_0 = arith.constant 0 : i32
    %c0_i32_1 = arith.constant 0 : i32
    return %c0_i32, %c0_i32_0 : i32, i32
  }
  func.func @transform_1(%arg0: i32) -> (i32, i32, i32) {
    %c0_i32 = arith.constant 0 : i32
    %c0_i32_0 = arith.constant 0 : i32
    %c0_i32_1 = arith.constant 0 : i32
    %c0_i32_2 = arith.constant 0 : i32
    return %c0_i32, %c0_i32_0, %c0_i32_1 : i32, i32, i32
  }
  func.func @transform_2(%arg0: i32) -> (i32, i32, i32) {
    %c0_i32 = arith.constant 0 : i32
    %c0_i32_0 = arith.constant 0 : i32
    %c0_i32_1 = arith.constant 0 : i32
    %c0_i32_2 = arith.constant 0 : i32
    return %c0_i32, %c0_i32_0, %c0_i32_1 : i32, i32, i32
  }
  func.func @transform_3(%arg0: i32) -> (i32, i32, i32) {
    %c0_i32 = arith.constant 0 : i32
    %c0_i32_0 = arith.constant 0 : i32
    %c0_i32_1 = arith.constant 0 : i32
    %c0_i32_2 = arith.constant 0 : i32
    return %c0_i32, %c0_i32_0, %c0_i32_1 : i32, i32, i32
  }
  func.func @transform_4(%arg0: i32) -> (i32, i32, i32) {
    %c0_i32 = arith.constant 0 : i32
    %c0_i32_0 = arith.constant 0 : i32
    %c0_i32_1 = arith.constant 0 : i32
    %c0_i32_2 = arith.constant 0 : i32
    return %c0_i32, %c0_i32_0, %c0_i32_1 : i32, i32, i32
  }
  func.func @transform_5(%arg0: i32) -> (i32, i32, i32) {
    %c0_i32 = arith.constant 0 : i32
    %c0_i32_0 = arith.constant 0 : i32
    %c0_i32_1 = arith.constant 0 : i32
    %c0_i32_2 = arith.constant 0 : i32
    return %c0_i32, %c0_i32_0, %c0_i32_1 : i32, i32, i32
  }
  func.func @transform_6(%arg0: i32) -> (i32, i32) {
    %c0_i32 = arith.constant 0 : i32
    %c0_i32_0 = arith.constant 0 : i32
    %c0_i32_1 = arith.constant 0 : i32
    return %c0_i32, %c0_i32_0 : i32, i32
  }
  func.func @transform_7(%arg0: i32) -> (i32, i32) {
    %c0_i32 = arith.constant 0 : i32
    %c0_i32_0 = arith.constant 0 : i32
    %c0_i32_1 = arith.constant 0 : i32
    return %c0_i32, %c0_i32_0 : i32, i32
  }
  func.func @transform_8(%arg0: i32) -> (i32, i32) {
    %c0_i32 = arith.constant 0 : i32
    %c0_i32_0 = arith.constant 0 : i32
    %c0_i32_1 = arith.constant 0 : i32
    return %c0_i32, %c0_i32_0 : i32, i32
  }
  func.func @transform_9(%arg0: i32) -> (i32, i32) {
    %c0_i32 = arith.constant 0 : i32
    %c0_i32_0 = arith.constant 0 : i32
    %c0_i32_1 = arith.constant 0 : i32
    return %c0_i32, %c0_i32_0 : i32, i32
  }
  func.func @transform_10(%arg0: i32) -> (i32, i32) {
    %c0_i32 = arith.constant 0 : i32
    %c0_i32_0 = arith.constant 0 : i32
    %c0_i32_1 = arith.constant 0 : i32
    return %c0_i32, %c0_i32_0 : i32, i32
  }
  func.func @transform_11(%arg0: i32) -> (i32, i32) {
    %c0_i32 = arith.constant 0 : i32
    %c0_i32_0 = arith.constant 0 : i32
    %c0_i32_1 = arith.constant 0 : i32
    return %c0_i32, %c0_i32_0 : i32, i32
  }
  func.func @transform_12(%arg0: i32) -> (i32, i32) {
    %c0_i32 = arith.constant 0 : i32
    %c0_i32_0 = arith.constant 0 : i32
    %c0_i32_1 = arith.constant 0 : i32
    return %c0_i32, %c0_i32_0 : i32, i32
  }
  func.func @transform_13(%arg0: i32) -> (i32, i32) {
    %c0_i32 = arith.constant 0 : i32
    %c0_i32_0 = arith.constant 0 : i32
    %c0_i32_1 = arith.constant 0 : i32
    return %c0_i32, %c0_i32_0 : i32, i32
  }
  func.func @transform_14(%arg0: i32) -> (i32, i32) {
    %c0_i32 = arith.constant 0 : i32
    %c0_i32_0 = arith.constant 0 : i32
    %c0_i32_1 = arith.constant 0 : i32
    return %c0_i32, %c0_i32_0 : i32, i32
  }
  func.func @transform_15(%arg0: i32) -> (i32, i32) {
    %c0_i32 = arith.constant 0 : i32
    %c0_i32_0 = arith.constant 0 : i32
    %c0_i32_1 = arith.constant 0 : i32
    return %c0_i32, %c0_i32_0 : i32, i32
  }
  func.func @transform_16(%arg0: i32) -> (i32, i32) {
    %c0_i32 = arith.constant 0 : i32
    %c0_i32_0 = arith.constant 0 : i32
    %c0_i32_1 = arith.constant 0 : i32
    return %c0_i32, %c0_i32_0 : i32, i32
  }
  func.func @transform_17(%arg0: i32) -> (i32, i32) {
    %c0_i32 = arith.constant 0 : i32
    %c0_i32_0 = arith.constant 0 : i32
    %c0_i32_1 = arith.constant 0 : i32
    return %c0_i32, %c0_i32_0 : i32, i32
  }
  func.func @transform_18(%arg0: i32) -> (i32, i32) {
    %c0_i32 = arith.constant 0 : i32
    %c0_i32_0 = arith.constant 0 : i32
    %c0_i32_1 = arith.constant 0 : i32
    return %c0_i32, %c0_i32_0 : i32, i32
  }
  func.func @transform_19(%arg0: i32) -> (i32, i32) {
    %c0_i32 = arith.constant 0 : i32
    %c0_i32_0 = arith.constant 0 : i32
    %c0_i32_1 = arith.constant 0 : i32
    return %c0_i32, %c0_i32_0 : i32, i32
  }
  func.func @transform_20(%arg0: i32) -> (i32, i32) {
    %c0_i32 = arith.constant 0 : i32
    %c0_i32_0 = arith.constant 0 : i32
    %c0_i32_1 = arith.constant 0 : i32
    return %c0_i32, %c0_i32_0 : i32, i32
  }
  func.func @transform_21(%arg0: i32) -> (i32, i32) {
    %c0_i32 = arith.constant 0 : i32
    %c0_i32_0 = arith.constant 0 : i32
    %c0_i32_1 = arith.constant 0 : i32
    return %c0_i32, %c0_i32_0 : i32, i32
  }
  func.func @transform_22(%arg0: i32) -> (i32, i32) {
    %c0_i32 = arith.constant 0 : i32
    %c0_i32_0 = arith.constant 0 : i32
    %c0_i32_1 = arith.constant 0 : i32
    return %c0_i32, %c0_i32_0 : i32, i32
  }
}

</mosaic_0001>

<bundles_post_ra>
// kernel: forward.1
= control target key start
LH: loop header
LB: loop body
LE: loop exit
PB: predicated region body
PF: predicated region fallthrough
CT: control target
= control target key end

     0   :  { %s3865_s0 = inlined_call_operand.vmem [shape: f32[68,128], index: 0, kind: input, shape index: {}]   ;;  %s3866_s1 = inlined_call_operand.hbm [shape: f32[4,128,128], index: 1, kind: input, shape index: {}]   ;;  %s3867_s2 = inlined_call_operand.hbm [shape: f32[4,128,128], index: 2, kind: input, shape index: {}]   ;;  %s3868_s3 = inlined_call_operand.hbm [shape: f32[4,128,128], index: 3, kind: input, shape index: {}]   ;;  %s3869_s4 = inlined_call_operand.vmem [shape: f32[4,128,192], index: 4, kind: input, shape index: {}]   ;;  %s3870_s5 = inlined_call_operand.vmem [shape: f32[3,192,3], index: 5, kind: input, shape index: {}]   ;;  %s3871_s6 = inlined_call_operand.vmem [shape: f32[32,65], index: 6, kind: input, shape index: {}]   ;;  %s3872_s7 = inlined_call_operand.hbm [shape: f32[16,33], index: 7, kind: input, shape index: {}]   ;;  %s3873_s8 = inlined_call_operand.hbm [shape: f32[8,17], index: 8, kind: input, shape index: {}]   ;;  %s3874_s9 = inlined_call_operand.hbm [shape: f32[6,9], index: 9, kind: input, shape index: {}]   ;;  %s3875_s10 = inlined_call_operand.hbm [shape: f32[6,8], index: 10, kind: input, shape index: {}]   ;;  %s3876_s11 = inlined_call_operand.hbm [shape: f32[128,128], index: 11, kind: input, shape index: {}]   ;;  %s3877_s12 = inlined_call_operand.hbm [shape: f32[128,128], index: 12, kind: input, shape index: {}]   ;;  %s3878_s13 = inlined_call_operand.hbm [shape: f32[192,192], index: 13, kind: input, shape index: {}]   ;;  %s3879_s14 = inlined_call_operand.hbm [shape: f32[1,128], index: 14, kind: input, shape index: {}]   ;;  %s3880_s15 = inlined_call_operand.vmem [shape: f32[1,128], index: 15, kind: input, shape index: {}, may-alias: {15,17}]   ;;  %s3881_s16 = inlined_call_operand.vmem [shape: f32[1,128], index: 16, kind: input, shape index: {}, may-alias: {16,18}]   ;;  %s3882_s17 = inlined_call_operand.vmem [shape: f32[1,128], index: 17, kind: input, shape index: {}, may-alias: {15,17}]   ;;  %s3883_s18 = inlined_call_operand.vmem [shape: f32[1,128], index: 18, kind: input, shape index: {}, may-alias: {16,18}]   ;;  %s3884_s19 = inlined_call_operand.vmem [shape: f32[1,192], index: 19, kind: input, shape index: {}]   ;;  %s3885_s20 = inlined_call_operand.vmem [shape: f32[1,192], index: 20, kind: input, shape index: {}]   ;;  %s3886_s21 = inlined_call_operand.vmem [shape: f32[1,3], index: 21, kind: input, shape index: {}]   ;;  %s3887_s22 = inlined_call_operand.vmem [shape: f32[6,3], index: 22, kind: output, shape index: {}]  }
   0x1   :  { %3892 = sst [smem:[#allocation29_spill]] %s3865_s0 }
   0x2   :  { %3893 = sst [smem:[#allocation30_spill]] %s3866_s1 }
   0x3   :  { %3894 = sst [smem:[#allocation31_spill]] %s3867_s2 }
   0x4   :  { %3895 = sst [smem:[#allocation32_spill]] %s3868_s3 }
   0x5   :  { %3896 = sst [smem:[#allocation33_spill]] %s3869_s4 }
   0x6   :  { %3897 = sst [smem:[#allocation34_spill]] %s3870_s5 }
   0x7   :  { %3898 = sst [smem:[#allocation35_spill]] %s3871_s6 }
   0x8   :  { %27 = vsyncpa [#allocation7], 0 }
   0x9   :  { %28 = vsyncpa [#allocation9], 0 }
   0xa   :  { %29 = vsyncpa [#allocation12], 0 }
   0xb   :  { %30 = vsyncpa [#allocation15], 0 }
   0xc   :  { %31 = vsyncpa [#allocation18], 0 }
   0xd   :  { %32 = vsyncpa [#allocation21], 0  ;;  %s3899_s29 = sld [smem:[#allocation31_spill]]  ;;  %s2737_s4 = smov [#allocation8]  }
   0xe   :  { %s54_s0 = sshll.u32 %s2737_s4, 4  ;;  %s84_s5 = sshll.u32 %s3872_s7, 4  ;;  %s55_s0 = int_to_ptr.vmem [resolvable:$true] %s54_s0  ;;  %s85_s5 = int_to_ptr.hbm [resolvable:$true] %s84_s5 }
   0xf   :  { %s2738_s24 = smov 128   ;;  %s2739_s6 = smov 8  }
  0x10   :  { %s2740_s25 = smov [#allocation11]   ;;  %s109_s3 = sshll.u32 %s3874_s9, 4  ;;  %s110_s3 = int_to_ptr.hbm [resolvable:$true] %s109_s3 }
  0x11   :  { %s86_s26 = sshll.u32 %s2740_s25, 4  ;;  %s2741_s4 = smov [#allocation14]   ;;  %s87_s26 = int_to_ptr.vmem [resolvable:$true] %s86_s26 }
  0x12   :  { %92 = dma.hbm_to_vmem [thread:$0]  %s85_s5, 256, %s87_s26, [#allocation12], %s2738_s24, %s2738_s24, %s2739_s6  }
  0x13   :  { %s52_s30 = sshll.u32 %s3899_s29, 4  ;;  %s130_s29 = sshll.u32 %s3876_s11, 4  ;;  %s53_s30 = int_to_ptr.hbm [resolvable:$true] %s52_s30  ;;  %s131_s29 = int_to_ptr.hbm [resolvable:$true] %s130_s29 }
  0x14   :  { %60 = dma.hbm_to_vmem [thread:$0]  %s53_s30, 8192, %s55_s0, [#allocation9], %s2738_s24, %s2738_s24, %s2739_s6  }
  0x15   :  { %s111_s23 = sshll.u32 %s2741_s4, 4  ;;  %s2742_s30 = smov [#allocation17]   ;;  %s112_s23 = int_to_ptr.vmem [resolvable:$true] %s111_s23 }
  0x16   :  { %114 = dma.hbm_to_vmem [thread:$0]  %s110_s3, 128, %s112_s23, [#allocation15]  }
  0x17   :  { %s132_s0 = sshll.u32 %s2742_s30, 4  ;;  %s156_s9 = sshll.u32 %s3878_s13, 4  ;;  %s133_s0 = int_to_ptr.vmem [resolvable:$true] %s132_s0  ;;  %s157_s9 = int_to_ptr.hbm [resolvable:$true] %s156_s9 }
  0x18   :  { %138 = dma.hbm_to_vmem [thread:$0]  %s131_s29, 2048, %s133_s0, [#allocation18], %s2738_s24, %s2738_s24, %s2739_s6  }
  0x19   :  { %s2743_s5 = smov [#allocation20]   ;;  %s3900_s27 = sld [smem:[#allocation30_spill]] }
  0x1a   :  { %s158_s26 = sshll.u32 %s2743_s5, 4  ;;  %s2744_s3 = smov 256   ;;  %s159_s26 = int_to_ptr.vmem [resolvable:$true] %s158_s26 }
  0x1b   :  { %s2745_s28 = smov 16   ;;  %s2746_s4 = smov [#allocation6]  }
  0x1c   :  { %164 = dma.hbm_to_vmem [thread:$0]  %s157_s9, 6144, %s159_s26, [#allocation21], %s2744_s3, %s2744_s3, %s2745_s28  }
  0x1d   :  { %s41_s23 = sshll.u32 %s2746_s4, 4  ;;  %s3901_s1 = sld [smem:[#allocation32_spill]]  ;;  %s42_s23 = int_to_ptr.vmem [resolvable:$true] %s41_s23 }
  0x1e   :  { %s98_s5 = sshll.u32 %s3873_s8, 4  ;;  %s2747_s11 = smov [#allocation10]   ;;  %s99_s5 = int_to_ptr.hbm [resolvable:$true] %s98_s5 }
  0x1f   :  { %s39_s7 = sshll.u32 %s3900_s27, 4  ;;  %s67_s2 = sshll.u32 %s2747_s11, 4  ;;  %s40_s7 = int_to_ptr.hbm [resolvable:$true] %s39_s7  ;;  %s68_s2 = int_to_ptr.vmem [resolvable:$true] %s67_s2 }
  0x20   :  { %47 = dma.hbm_to_vmem [thread:$0]  %s40_s7, 8192, %s42_s23, [#allocation7], %s2738_s24, %s2738_s24, %s2739_s6  }
  0x21   :  { %s2748_s9 = smov [#allocation13]   ;;  %s120_s28 = sshll.u32 %s3875_s10, 4  ;;  %s121_s28 = int_to_ptr.hbm [resolvable:$true] %s120_s28 }
  0x22   :  { %s100_s26 = sshll.u32 %s2748_s9, 4  ;;  %s143_s8 = sshll.u32 %s3877_s12, 4  ;;  %s101_s26 = int_to_ptr.vmem [resolvable:$true] %s100_s26  ;;  %s144_s8 = int_to_ptr.hbm [resolvable:$true] %s143_s8 }
  0x23   :  { %s65_s25 = sshll.u32 %s3901_s1, 4  ;;  %s2749_s23 = smov [#allocation16]   ;;  %s66_s25 = int_to_ptr.hbm [resolvable:$true] %s65_s25 }
  0x24   :  { %73 = dma.hbm_to_vmem [thread:$0]  %s66_s25, 8192, %s68_s2, [#allocation9], %s2738_s24, %s2738_s24, %s2739_s6  }
  0x25   :  { %103 = dma.hbm_to_vmem [thread:$0]  %s99_s5, 128, %s101_s26, [#allocation12]  }
  0x26   :  { %s122_s13 = sshll.u32 %s2749_s23, 4  ;;  %s2750_s30 = smov [#allocation19]   ;;  %s123_s13 = int_to_ptr.vmem [resolvable:$true] %s122_s13 }
  0x27   :  { %125 = dma.hbm_to_vmem [thread:$0]  %s121_s28, 128, %s123_s13, [#allocation15]  }
  0x28   :  { %s145_s1 = sshll.u32 %s2750_s30, 4  ;;  %s170_s0 = sshll.u32 %s3879_s14, 4  ;;  %s146_s1 = int_to_ptr.vmem [resolvable:$true] %s145_s1  ;;  %s171_s0 = int_to_ptr.hbm [resolvable:$true] %s170_s0 }
  0x29   :  { %151 = dma.hbm_to_vmem [thread:$0]  %s144_s8, 2048, %s146_s1, [#allocation18], %s2738_s24, %s2738_s24, %s2739_s6  }
  0x2a   :  { %s2751_s10 = smov [#allocation22]  }
  0x2b   :  { %s172_s5 = sshll.u32 %s2751_s10, 4  ;;  %s173_s5 = int_to_ptr.vmem [resolvable:$true] %s172_s5 }
  0x2c   :  { %175 = dma.hbm_to_vmem [thread:$0]  %s171_s0, 16, %s173_s5, [#allocation21]  }
  0x2d   :  { %2725 = dma.done.wait [#allocation7], 8192  }
  0x2e   :  { %2726 = vsyncadd [#allocation7], 4294959104 }
  0x2f   :  { %2727 = dma.done.wait [#allocation9], 16384  }
  0x30   :  { %2728 = vsyncadd [#allocation9], 4294950912 }
  0x31   :  { %2729 = dma.done.wait [#allocation12], 384  }
  0x32   :  { %2730 = vsyncadd [#allocation12], 4294966912 }
  0x33   :  { %2731 = dma.done.wait [#allocation15], 256  }
  0x34   :  { %2732 = vsyncadd [#allocation15], 4294967040 }
  0x35   :  { %2733 = dma.done.wait [#allocation18], 4096  }
  0x36   :  { %2734 = vsyncadd [#allocation18], 4294963200 }
  0x37   :  { %2735 = dma.done.wait [#allocation21], 6160  }
  0x38   :  { %2736 = vsyncadd [#allocation21], 4294961136  ;;  %v398_v0 = vld [vmem:[#allocation6 + $0x178] sm:$0xff]  ;;  %v397_v1 = vld [vmem:[#allocation6 + $0x170] sm:$0xff]  ;;  %s3902_s24 = sld [smem:[#allocation29_spill]]  ;;  %vm552_vm0 = vcmask 1040384  }
  0x39   :  { %v477_v2 = vld [vmem:[#allocation6 + $0x1f8] sm:$0xff]  ;;  %399 = vmatpush.msra.mxu2 %v398_v0  ;;  %v396_v5 = vld [vmem:[#allocation6 + $0x168] sm:$0xff]  ;;  %v476_v6 = vld [vmem:[#allocation6 + $0x1f0] sm:$0xff]  ;;  %s3903_s27 = sld [smem:[#allocation35_spill]]  ;;  %vm539_vm1 = vcmask 531456   ;;  %vm829_vm2 = vcmask 269312  }
  0x3a   :  { %478 = vmatpush.msra.mxu3 %v477_v2  ;;  %v284_v3 = vld [vmem:[#allocation6 + $0xf8] sm:$0xff]  ;;  %v283_v7 = vld [vmem:[#allocation6 + $0xf0] sm:$0xff]  ;;  %v475_v9 = vld [vmem:[#allocation6 + $0x1e8] sm:$0xff]  ;;  %vm1161_vm6 = vcmask 138240   ;;  %s3904_s29 = sld [smem:[#allocation33_spill]]  ;;  %vm1619_vm10 = vcmask 72704  }
  0x3b   :  { %v258_v4 = vld [vmem:[#allocation6 + $0x78] sm:$0xff]  ;;  %285 = vmatpush.msra.mxu0 %v284_v3  ;;  %v257_v8 = vld [vmem:[#allocation6 + $0x70] sm:$0xff]  ;;  %400 = vmatpush.msra.mxu2 %v397_v1  ;;  %v282_v10 = vld [vmem:[#allocation6 + $0xe8] sm:$0xff]  ;;  %vm1733_vm11 = vcmask 523264   ;;  %vm1717_vm12 = vcmask 1045504   ;;  %vm1725_vm13 = vcmask 521216  }
  0x3c   :  { %329 = vmatpush.msra.mxu1 %v258_v4  ;;  %479 = vmatpush.msra.mxu3 %v476_v6  ;;  %v395_v11 = vld [vmem:[#allocation6 + $0x160] sm:$0xff]  ;;  %v256_v12 = vld [vmem:[#allocation6 + $0x68] sm:$0xff]  ;;  %v394_v16 = vld [vmem:[#allocation6 + $0x158] sm:$0xff]  ;;  %s3905_s23 = sld [smem:[#allocation34_spill]]  ;;  %vm1967_vm14 = vcmask 517120  }
  0x3d   :  { %286 = vmatpush.msra.mxu0 %v283_v7  ;;  %v474_v13 = vld [vmem:[#allocation6 + $0x1e0] sm:$0xff]  ;;  %401 = vmatpush.msra.mxu2 %v396_v5  ;;  %v473_v17 = vld [vmem:[#allocation6 + $0x1d8] sm:$0xff]  ;;  %v393_v20 = vld [vmem:[#allocation6 + $0x150] sm:$0xff] }
  0x3e   :  { %330 = vmatpush.msra.mxu1 %v257_v8  ;;  %480 = vmatpush.msra.mxu3 %v475_v9  ;;  %v281_v14 = vld [vmem:[#allocation6 + $0xe0] sm:$0xff]  ;;  %v280_v18 = vld [vmem:[#allocation6 + $0xd8] sm:$0xff]  ;;  %v472_v21 = vld [vmem:[#allocation6 + $0x1d0] sm:$0xff] }
  0x3f   :  { %v255_v15 = vld [vmem:[#allocation6 + $0x60] sm:$0xff]  ;;  %287 = vmatpush.msra.mxu0 %v282_v10  ;;  %402 = vmatpush.msra.mxu2 %v395_v11  ;;  %v254_v19 = vld [vmem:[#allocation6 + $0x58] sm:$0xff]  ;;  %v279_v22 = vld [vmem:[#allocation6 + $0xd0] sm:$0xff] }
  0x40   :  { %331 = vmatpush.msra.mxu1 %v256_v12  ;;  %481 = vmatpush.msra.mxu3 %v474_v13  ;;  %v253_v23 = vld [vmem:[#allocation6 + $0x50] sm:$0xff]  ;;  %v392_v24 = vld [vmem:[#allocation6 + $0x148] sm:$0xff]  ;;  %v391_v28 = vld [vmem:[#allocation6 + $0x140] sm:$0xff] }
  0x41   :  { %288 = vmatpush.msra.mxu0 %v281_v14  ;;  %403 = vmatpush.msra.mxu2 %v394_v16  ;;  %v471_v25 = vld [vmem:[#allocation6 + $0x1c8] sm:$0xff]  ;;  %v470_v29 = vld [vmem:[#allocation6 + $0x1c0] sm:$0xff]  ;;  %v390_v32 = vld [vmem:[#allocation6 + $0x138] sm:$0xff] }
  0x42   :  { %332 = vmatpush.msra.mxu1 %v255_v15  ;;  %482 = vmatpush.msra.mxu3 %v473_v17  ;;  %v278_v26 = vld [vmem:[#allocation6 + $0xc8] sm:$0xff]  ;;  %v277_v30 = vld [vmem:[#allocation6 + $0xc0] sm:$0xff]  ;;  %v469_v33 = vld [vmem:[#allocation6 + $0x1b8] sm:$0xff] }
  0x43   :  { %289 = vmatpush.msra.mxu0 %v280_v18  ;;  %404 = vmatpush.msra.mxu2 %v393_v20  ;;  %v252_v27 = vld [vmem:[#allocation6 + $0x48] sm:$0xff]  ;;  %v251_v31 = vld [vmem:[#allocation6 + $0x40] sm:$0xff]  ;;  %v276_v34 = vld [vmem:[#allocation6 + $0xb8] sm:$0xff] }
  0x44   :  { %333 = vmatpush.msra.mxu1 %v254_v19  ;;  %483 = vmatpush.msra.mxu3 %v472_v21  ;;  %v250_v35 = vld [vmem:[#allocation6 + $0x38] sm:$0xff]  ;;  %v389_v36 = vld [vmem:[#allocation6 + $0x130] sm:$0xff]  ;;  %v388_v40 = vld [vmem:[#allocation6 + $0x128] sm:$0xff] }
  0x45   :  { %290 = vmatpush.msra.mxu0 %v279_v22  ;;  %405 = vmatpush.msra.mxu2 %v392_v24  ;;  %v468_v37 = vld [vmem:[#allocation6 + $0x1b0] sm:$0xff]  ;;  %v467_v41 = vld [vmem:[#allocation6 + $0x1a8] sm:$0xff]  ;;  %v387_v44 = vld [vmem:[#allocation6 + $0x120] sm:$0xff] }
  0x46   :  { %334 = vmatpush.msra.mxu1 %v253_v23  ;;  %484 = vmatpush.msra.mxu3 %v471_v25  ;;  %v275_v38 = vld [vmem:[#allocation6 + $0xb0] sm:$0xff]  ;;  %v274_v42 = vld [vmem:[#allocation6 + $0xa8] sm:$0xff]  ;;  %v466_v45 = vld [vmem:[#allocation6 + $0x1a0] sm:$0xff] }
  0x47   :  { %291 = vmatpush.msra.mxu0 %v278_v26  ;;  %406 = vmatpush.msra.mxu2 %v391_v28  ;;  %v249_v39 = vld [vmem:[#allocation6 + $0x30] sm:$0xff]  ;;  %v248_v43 = vld [vmem:[#allocation6 + $0x28] sm:$0xff]  ;;  %v273_v46 = vld [vmem:[#allocation6 + $0xa0] sm:$0xff] }
  0x48   :  { %335 = vmatpush.msra.mxu1 %v252_v27  ;;  %485 = vmatpush.msra.mxu3 %v470_v29  ;;  %v247_v47 = vld [vmem:[#allocation6 + $0x20] sm:$0xff]  ;;  %v386_v48 = vld [vmem:[#allocation6 + $0x118] sm:$0xff]  ;;  %v385_v52 = vld [vmem:[#allocation6 + $0x110] sm:$0xff] }
  0x49   :  { %292 = vmatpush.msra.mxu0 %v277_v30  ;;  %407 = vmatpush.msra.mxu2 %v390_v32  ;;  %v465_v49 = vld [vmem:[#allocation6 + $0x198] sm:$0xff]  ;;  %v384_v53 = vld [vmem:[#allocation6 + $0x108] sm:$0xff]  ;;  %v464_v54 = vld [vmem:[#allocation6 + $0x190] sm:$0xff] }
  0x4a   :  { %336 = vmatpush.msra.mxu1 %v251_v31  ;;  %486 = vmatpush.msra.mxu3 %v469_v33  ;;  %v272_v50 = vld [vmem:[#allocation6 + $0x98] sm:$0xff]  ;;  %v271_v55 = vld [vmem:[#allocation6 + $0x90] sm:$0xff]  ;;  %v463_v57 = vld [vmem:[#allocation6 + $0x188] sm:$0xff] }
  0x4b   :  { %293 = vmatpush.msra.mxu0 %v276_v34  ;;  %408 = vmatpush.msra.mxu2 %v389_v36  ;;  %v246_v51 = vld [vmem:[#allocation6 + $0x18] sm:$0xff]  ;;  %v245_v56 = vld [vmem:[#allocation6 + $0x10] sm:$0xff]  ;;  %v383_v58 = vld [vmem:[#allocation6 + $0x100] sm:$0xff] }
  0x4c   :  { %337 = vmatpush.msra.mxu1 %v250_v35  ;;  %487 = vmatpush.msra.mxu3 %v468_v37  ;;  %v270_v59 = vld [vmem:[#allocation6 + $0x88] sm:$0xff]  ;;  %v462_v61 = vld [vmem:[#allocation6 + $0x180] sm:$0xff]  ;;  %v373_v62 = vld [vmem:[%s3902_s24 + $0x2] sm:$0xff] }
  0x4d   :  { %294 = vmatpush.msra.mxu0 %v275_v38  ;;  %409 = vmatpush.msra.mxu2 %v388_v40  ;;  %v244_v60 = vld [vmem:[#allocation6 + $0x8] sm:$0xff]  ;;  %v452_v63 = vld [vmem:[%s3902_s24 + $0x3] sm:$0xff]  ;;  %v269_v0 = vld [vmem:[#allocation6 + $0x80] sm:$0xff] }
  0x4e   :  { %338 = vmatpush.msra.mxu1 %v249_v39  ;;  %488 = vmatpush.msra.mxu3 %v467_v41  ;;  %v243_v1 = vld [vmem:[#allocation6] sm:$0xff]  ;;  %v259_v2 = vld [vmem:[%s3902_s24 + $0x1] sm:$0xff]  ;;  %v262_v14 = vld [vmem:[%s3902_s24 + $0x19] sm:$0xff] }
  0x4f   :  { %295 = vmatpush.msra.mxu0 %v274_v42  ;;  %410 = vmatpush.msra.mxu2 %v387_v44  ;;  %v234_v3 = vld [vmem:[%s3902_s24] sm:$0xff]  ;;  %v374_v4 = vld [vmem:[%s3902_s24 + $0xa] sm:$0xff]  ;;  %v375_v8 = vld [vmem:[%s3902_s24 + $0x12] sm:$0xff] }
  0x50   :  { %339 = vmatpush.msra.mxu1 %v248_v43  ;;  %489 = vmatpush.msra.mxu3 %v466_v45  ;;  %v453_v5 = vld [vmem:[%s3902_s24 + $0xb] sm:$0xff]  ;;  %v454_v9 = vld [vmem:[%s3902_s24 + $0x13] sm:$0xff]  ;;  %v455_v13 = vld [vmem:[%s3902_s24 + $0x1b] sm:$0xff] }
  0x51   :  { %296 = vmatpush.msra.mxu0 %v273_v46  ;;  %411 = vmatpush.msra.mxu2 %v386_v48  ;;  %v260_v6 = vld [vmem:[%s3902_s24 + $0x9] sm:$0xff]  ;;  %v261_v10 = vld [vmem:[%s3902_s24 + $0x11] sm:$0xff]  ;;  %v376_v12 = vld [vmem:[%s3902_s24 + $0x1a] sm:$0xff] }
  0x52   :  { %340 = vmatpush.msra.mxu1 %v247_v47  ;;  %490 = vmatpush.msra.mxu3 %v465_v49  ;;  %v235_v7 = vld [vmem:[%s3902_s24 + $0x8] sm:$0xff]  ;;  %v236_v11 = vld [vmem:[%s3902_s24 + $0x10] sm:$0xff]  ;;  %v237_v15 = vld [vmem:[%s3902_s24 + $0x18] sm:$0xff] }
  0x53   :  { %297 = vmatpush.msra.mxu0 %v272_v50  ;;  %412 = vmatpush.msra.mxu2 %v385_v52  ;;  %v377_v16 = vld [vmem:[%s3902_s24 + $0x22] sm:$0xff]  ;;  %v378_v20 = vld [vmem:[%s3902_s24 + $0x2a] sm:$0xff]  ;;  %v379_v24 = vld [vmem:[%s3902_s24 + $0x32] sm:$0xff] }
  0x54   :  { %341 = vmatpush.msra.mxu1 %v246_v51  ;;  %491 = vmatpush.msra.mxu3 %v464_v54  ;;  %v456_v17 = vld [vmem:[%s3902_s24 + $0x23] sm:$0xff]  ;;  %v457_v21 = vld [vmem:[%s3902_s24 + $0x2b] sm:$0xff]  ;;  %v458_v25 = vld [vmem:[%s3902_s24 + $0x33] sm:$0xff] }
  0x55   :  { %298 = vmatpush.msra.mxu0 %v271_v55  ;;  %413 = vmatpush.msra.mxu2 %v384_v53  ;;  %v263_v18 = vld [vmem:[%s3902_s24 + $0x21] sm:$0xff]  ;;  %v264_v22 = vld [vmem:[%s3902_s24 + $0x29] sm:$0xff]  ;;  %v265_v26 = vld [vmem:[%s3902_s24 + $0x31] sm:$0xff] }
  0x56   :  { %342 = vmatpush.msra.mxu1 %v245_v56  ;;  %492 = vmatpush.msra.mxu3 %v463_v57  ;;  %v238_v19 = vld [vmem:[%s3902_s24 + $0x20] sm:$0xff]  ;;  %v239_v23 = vld [vmem:[%s3902_s24 + $0x28] sm:$0xff]  ;;  %v240_v27 = vld [vmem:[%s3902_s24 + $0x30] sm:$0xff] }
  0x57   :  { %299 = vmatpush.msra.mxu0 %v270_v59  ;;  %414 = vmatpush.msra.mxu2 %v383_v58  ;;  %v380_v28 = vld [vmem:[%s3902_s24 + $0x3a] sm:$0xff]  ;;  %v381_v32 = vld [vmem:[%s3902_s24 + $0x42] sm:$0x1]  ;;  %v460_v33 = vld [vmem:[%s3902_s24 + $0x43] sm:$0x1] }
  0x58   :  { %343 = vmatpush.msra.mxu1 %v244_v60  ;;  %493 = vmatpush.msra.mxu3 %v462_v61  ;;  %v459_v29 = vld [vmem:[%s3902_s24 + $0x3b] sm:$0xff] }
  0x59   :  { %415 = vmatmul.f32.vlgmr.msra.gmra.mxu2 %v373_v62  ;;  %494 = vmatmul.f32.vlgmr.msra.gmra.mxu3 %v452_v63  ;;  %v266_v30 = vld [vmem:[%s3902_s24 + $0x39] sm:$0xff]  ;;  %v267_v34 = vld [vmem:[%s3902_s24 + $0x41] sm:$0x1] }
  0x5a   :  { %300 = vmatpush.msra.mxu0 %v269_v0  ;;  %344 = vmatpush.msra.mxu1 %v243_v1  ;;  %v241_v31 = vld [vmem:[%s3902_s24 + $0x38] sm:$0xff]  ;;  %v242_v35 = vld [vmem:[%s3902_s24 + $0x40] sm:$0x1] }
  0x5b   :  { %301 = vmatmul.f32.vlgmr.msra.gmra.mxu0 %v259_v2  ;;  %345 = vmatmul.f32.vlgmr.msra.gmra.mxu1 %v234_v3 }
  0x61   :  { %418 = vmatmul.f32.gmra.mxu2 %v374_v4  ;;  %497 = vmatmul.f32.gmra.mxu3 %v453_v5 }
  0x63   :  { %304 = vmatmul.f32.gmra.mxu0 %v260_v6  ;;  %348 = vmatmul.f32.gmra.mxu1 %v235_v7 }
  0x69   :  { %421 = vmatmul.f32.gmra.mxu2 %v375_v8  ;;  %500 = vmatmul.f32.gmra.mxu3 %v454_v9 }
  0x6b   :  { %307 = vmatmul.f32.gmra.mxu0 %v261_v10  ;;  %351 = vmatmul.f32.gmra.mxu1 %v236_v11 }
  0x71   :  { %424 = vmatmul.f32.gmra.mxu2 %v376_v12  ;;  %503 = vmatmul.f32.gmra.mxu3 %v455_v13 }
  0x73   :  { %310 = vmatmul.f32.gmra.mxu0 %v262_v14  ;;  %354 = vmatmul.f32.gmra.mxu1 %v237_v15 }
  0x79   :  { %427 = vmatmul.f32.gmra.mxu2 %v377_v16  ;;  %506 = vmatmul.f32.gmra.mxu3 %v456_v17 }
  0x7b   :  { %313 = vmatmul.f32.gmra.mxu0 %v263_v18  ;;  %357 = vmatmul.f32.gmra.mxu1 %v238_v19 }
  0x81   :  { %430 = vmatmul.f32.gmra.mxu2 %v378_v20  ;;  %509 = vmatmul.f32.gmra.mxu3 %v457_v21 }
  0x83   :  { %316 = vmatmul.f32.gmra.mxu0 %v264_v22  ;;  %360 = vmatmul.f32.gmra.mxu1 %v239_v23 }
  0x89   :  { %433 = vmatmul.f32.gmra.mxu2 %v379_v24  ;;  %512 = vmatmul.f32.gmra.mxu3 %v458_v25 }
  0x8b   :  { %319 = vmatmul.f32.gmra.mxu0 %v265_v26  ;;  %363 = vmatmul.f32.gmra.mxu1 %v240_v27 }
  0x91   :  { %436 = vmatmul.f32.gmra.mxu2 %v380_v28  ;;  %515 = vmatmul.f32.gmra.mxu3 %v459_v29 }
  0x93   :  { %322 = vmatmul.f32.gmra.mxu0 %v266_v30  ;;  %366 = vmatmul.f32.gmra.mxu1 %v241_v31  ;;  %v622_v31 = vld [vmem:[#allocation8 + $0x78] sm:$0xff] }
  0x94   :  { %677 = vmatpush.msrb.mxu2 %v622_v31  ;;  %v778_v31 = vld [vmem:[#allocation8 + $0x1a0] sm:$0xff] }
  0x99   :  { %439 = vmatmul.f32.gmra.mxu2 %v381_v32  ;;  %518 = vmatmul.f32.gmra.mxu3 %v460_v33  ;;  %v621_v32 = vld [vmem:[#allocation8 + $0x70] sm:$0xff]  ;;  %v730_v33 = vld [vmem:[#allocation8 + $0x178] sm:$0xff] }
  0x9a   :  { %731 = vmatpush.msrb.mxu3 %v730_v33  ;;  %678 = vmatpush.msrb.mxu2 %v621_v32  ;;  %v718_v32 = vld [vmem:[#allocation8 + $0x118] sm:$0xff]  ;;  %v717_v33 = vld [vmem:[#allocation8 + $0x110] sm:$0xff] }
  0x9b   :  { %325 = vmatmul.f32.gmra.mxu0 %v267_v34  ;;  %369 = vmatmul.f32.gmra.mxu1 %v242_v35 }
  0xd8   :  { %v302_v36 = vpop.f32.mrf.mxu0  ;;  %v346_v37 = vpop.f32.mrf.mxu1 }
  0xd9   :  { %v347_v26 = vadd.f32 %v346_v37, %v302_v36  ;;  %v643_v36 = vld [vmem:[#allocation8 + $0xf0] sm:$0xff] }
  0xdc   :  { %v3027_v38 = vpop.f32.mrf.mxu2  ;;  %v3029_v39 = vpop.f32.mrf.mxu3 }
  0xdd   :  { %v443_v34 = vadd.f32 %v3027_v38, %v347_v26  ;;  %v720_v26 = vld [vmem:[#allocation8 + $0x128] sm:$0xff] }
  0xdf   :  { %v522_v38 = vadd.f32 %v3029_v39, %v443_v34  ;;  %v533_v39 = vld [vmem:[%s3903_s27 + $0x10] sm:$0xff]  ;;  %v777_v34 = vld [vmem:[#allocation8 + $0x198] sm:$0xff] }
  0xe0   :  { %v305_v40 = vpop.f32.mrf.mxu0  ;;  %v349_v41 = vpop.f32.mrf.mxu1 }
  0xe1   :  { %v350_v23 = vadd.f32 %v349_v41, %v305_v40  ;;  %v644_v40 = vld [vmem:[#allocation8 + $0xf8] sm:$0xff]  ;;  %v620_v41 = vld [vmem:[#allocation8 + $0x68] sm:$0xff] }
  0xe2   :  { %645 = vmatpush.msrb.mxu1 %v644_v40  ;;  %679 = vmatpush.msrb.mxu2 %v620_v41  ;;  %v775_v40 = vld [vmem:[#allocation8 + $0x188] sm:$0xff]  ;;  %v715_v41 = vld [vmem:[#allocation8 + $0x100] sm:$0xff] }
  0xe4   :  { %v419_v42 = vpop.f32.mrf.mxu2  ;;  %v3031_v43 = vpop.f32.mrf.mxu3  ;;  %646 = vmatpush.msrb.mxu1 %v643_v36  ;;  %v774_v36 = vld [vmem:[#allocation8 + $0x180] sm:$0xff] }
  0xe5   :  { %v444_v29 = vadd.f32 %v419_v42, %v350_v23  ;;  %v728_v42 = vld [vmem:[#allocation8 + $0x168] sm:$0xff]  ;;  %v721_v23 = vld [vmem:[#allocation8 + $0x130] sm:$0xff] }
  0xe7   :  { %v523_v37 = vadd.f32 %v3031_v43, %v444_v29  ;;  %v532_v43 = vld [vmem:[%s3903_s27 + $0x8] sm:$0xff]  ;;  %v719_v29 = vld [vmem:[#allocation8 + $0x120] sm:$0xff] }
  0xe8   :  { %v308_v44 = vpop.f32.mrf.mxu0  ;;  %v352_v45 = vpop.f32.mrf.mxu1 }
  0xe9   :  { %v353_v20 = vadd.f32 %v352_v45, %v308_v44  ;;  %v729_v44 = vld [vmem:[#allocation8 + $0x170] sm:$0xff]  ;;  %v619_v45 = vld [vmem:[#allocation8 + $0x60] sm:$0xff] }
  0xea   :  { %732 = vmatpush.msrb.mxu3 %v729_v44  ;;  %680 = vmatpush.msrb.mxu2 %v619_v45  ;;  %v776_v44 = vld [vmem:[#allocation8 + $0x190] sm:$0xff] }
  0xec   :  { %v422_v46 = vpop.f32.mrf.mxu2  ;;  %v501_v47 = vpop.f32.mrf.mxu3  ;;  %733 = vmatpush.msrb.mxu3 %v728_v42 }
  0xed   :  { %v445_v27 = vadd.f32 %v422_v46, %v353_v20  ;;  %v531_v46 = vld [vmem:[%s3903_s27] sm:$0xff]  ;;  %v722_v20 = vld [vmem:[#allocation8 + $0x138] sm:$0xff] }
  0xef   :  { %v524_v35 = vadd.f32 %v501_v47, %v445_v27  ;;  %v727_v47 = vld [vmem:[#allocation8 + $0x160] sm:$0xff]  ;;  %v608_v27 = vld [vmem:[#allocation8 + $0x8] sm:$0xff] }
  0xf0   :  { %v311_v48 = vpop.f32.mrf.mxu0  ;;  %v355_v49 = vpop.f32.mrf.mxu1  ;;  %734 = vmatpush.msrb.mxu3 %v727_v47 }
  0xf1   :  { %v356_v17 = vadd.f32 %v355_v49, %v311_v48  ;;  %v618_v48 = vld [vmem:[#allocation8 + $0x58] sm:$0xff]  ;;  %v534_v49 = vld [vmem:[%s3903_s27 + $0x18] sm:$0xff] }
  0xf2   :  { %681 = vmatpush.msrb.mxu2 %v618_v48 }
  0xf4   :  { %v425_v50 = vpop.f32.mrf.mxu2  ;;  %v504_v51 = vpop.f32.mrf.mxu3 }
  0xf5   :  { %v446_v24 = vadd.f32 %v425_v50, %v356_v17  ;;  %v642_v50 = vld [vmem:[#allocation8 + $0xe8] sm:$0xff]  ;;  %v782_v17 = vld [vmem:[#allocation8 + $0x1c0] sm:$0xff] }
  0xf6   :  { %647 = vmatpush.msrb.mxu1 %v642_v50 }
  0xf7   :  { %v525_v30 = vadd.f32 %v504_v51, %v446_v24  ;;  %v641_v51 = vld [vmem:[#allocation8 + $0xe0] sm:$0xff]  ;;  %v609_v24 = vld [vmem:[#allocation8 + $0x10] sm:$0xff] }
  0xf8   :  { %v314_v52 = vpop.f32.mrf.mxu0  ;;  %v358_v53 = vpop.f32.mrf.mxu1  ;;  %648 = vmatpush.msrb.mxu1 %v641_v51 }
  0xf9   :  { %v359_v14 = vadd.f32 %v358_v53, %v314_v52  ;;  %v640_v52 = vld [vmem:[#allocation8 + $0xd8] sm:$0xff]  ;;  %v639_v53 = vld [vmem:[#allocation8 + $0xd0] sm:$0xff] }
  0xfa   :  { %649 = vmatpush.msrb.mxu1 %v640_v52 }
  0xfc   :  { %v428_v54 = vpop.f32.mrf.mxu2  ;;  %v507_v55 = vpop.f32.mrf.mxu3  ;;  %650 = vmatpush.msrb.mxu1 %v639_v53 }
  0xfd   :  { %v447_v21 = vadd.f32 %v428_v54, %v359_v14  ;;  %v638_v54 = vld [vmem:[#allocation8 + $0xc8] sm:$0xff] }
  0xfe   :  { %651 = vmatpush.msrb.mxu1 %v638_v54  ;;  %v630_v14 = vld [vmem:[#allocation8 + $0x88] sm:$0xff] }
  0xff   :  { %v526_v28 = vadd.f32 %v507_v55, %v447_v21  ;;  %v637_v55 = vld [vmem:[#allocation8 + $0xc0] sm:$0xff]  ;;  %v610_v21 = vld [vmem:[#allocation8 + $0x18] sm:$0xff] }
 0x100   :  { %v317_v56 = vpop.f32.mrf.mxu0  ;;  %v361_v57 = vpop.f32.mrf.mxu1  ;;  %652 = vmatpush.msrb.mxu1 %v637_v55 }
 0x101   :  { %v362_v11 = vadd.f32 %v361_v57, %v317_v56  ;;  %v789_v56 = vld [vmem:[#allocation8 + $0x1f8] sm:$0xff] }
 0x102   :  { %v636_v57 = vld [vmem:[#allocation8 + $0xb8] sm:$0xff] }
 0x103   :  { %653 = vmatpush.msrb.mxu1 %v636_v57 }
 0x104   :  { %v431_v58 = vpop.f32.mrf.mxu2  ;;  %v510_v59 = vpop.f32.mrf.mxu3 }
 0x105   :  { %v448_v18 = vadd.f32 %v431_v58, %v362_v11  ;;  %v617_v58 = vld [vmem:[#allocation8 + $0x50] sm:$0xff]  ;;  %v724_v11 = vld [vmem:[#allocation8 + $0x148] sm:$0xff] }
 0x106   :  { %682 = vmatpush.msrb.mxu2 %v617_v58 }
 0x107   :  { %v527_v25 = vadd.f32 %v510_v59, %v448_v18  ;;  %v788_v59 = vld [vmem:[#allocation8 + $0x1f0] sm:$0xff]  ;;  %v2752_v18 = vmov 0.0  }
 0x108   :  { %v320_v60 = vpop.f32.mrf.mxu0  ;;  %v364_v61 = vpop.f32.mrf.mxu1  ;;  %593 = vst [vmem:[#allocation2] sm:$0xff] %v2752_v18 }
 0x109   :  { %v365_v8 = vadd.f32 %v364_v61, %v320_v60  ;;  %v635_v60 = vld [vmem:[#allocation8 + $0xb0] sm:$0xff]  ;;  %v616_v61 = vld [vmem:[#allocation8 + $0x48] sm:$0xff]  ;;  %594 = vst [vmem:[#allocation2 + $0x8] sm:$0xff] %v2752_v18 }
 0x10a   :  { %654 = vmatpush.msrb.mxu1 %v635_v60  ;;  %683 = vmatpush.msrb.mxu2 %v616_v61  ;;  %595 = vst [vmem:[#allocation2 + $0x10] sm:$0xff] %v2752_v18 }
 0x10b   :  { %596 = vst [vmem:[#allocation2 + $0x18] sm:$0xff] %v2752_v18 }
 0x10c   :  { %v434_v62 = vpop.f32.mrf.mxu2  ;;  %v513_v63 = vpop.f32.mrf.mxu3  ;;  %597 = vst [vmem:[#allocation2 + $0x20] sm:$0xf] %v2752_v18 }
 0x10d   :  { %v449_v15 = vadd.f32 %v434_v62, %v365_v8  ;;  %v787_v62 = vld [vmem:[#allocation8 + $0x1e8] sm:$0xff]  ;;  %v613_v8 = vld [vmem:[#allocation8 + $0x30] sm:$0xff]  ;;  %966 = vst [vmem:[#allocation3] sm:$0xff] %v2752_v18 }
 0x10e   :  { %967 = vst [vmem:[#allocation3 + $0x8] sm:$0xff] %v2752_v18 }
 0x10f   :  { %v528_v22 = vadd.f32 %v513_v63, %v449_v15  ;;  %v634_v63 = vld [vmem:[#allocation8 + $0xa8] sm:$0xff]  ;;  %v723_v15 = vld [vmem:[#allocation8 + $0x140] sm:$0xff]  ;;  %968 = vst [vmem:[#allocation3 + $0x10] sm:$0xf] %v2752_v18 }
 0x110   :  { %v323_v0 = vpop.f32.mrf.mxu0  ;;  %v367_v1 = vpop.f32.mrf.mxu1  ;;  %655 = vmatpush.msrb.mxu1 %v634_v63  ;;  %1283 = vst [vmem:[#allocation4] sm:$0xff] %v2752_v18 }
 0x111   :  { %v368_v6 = vadd.f32 %v367_v1, %v323_v0  ;;  %v615_v0 = vld [vmem:[#allocation8 + $0x40] sm:$0xff]  ;;  %1284 = vst [vmem:[#allocation4 + $0x8] sm:$0xf] %v2752_v18 }
 0x112   :  { %v786_v1 = vld [vmem:[#allocation8 + $0x1e0] sm:$0xff]  ;;  %684 = vmatpush.msrb.mxu2 %v615_v0  ;;  %1964 = vst [vmem:[#allocation5] sm:$0xff] %v2752_v18 }
 0x113   :  { %1966 = vst [vmem:[#allocation5 + $0x10] sm:$0x3] %v2752_v18 }
 0x114   :  { %v437_v2 = vpop.f32.mrf.mxu2  ;;  %v516_v3 = vpop.f32.mrf.mxu3 }
 0x115   :  { %v450_v12 = vadd.f32 %v437_v2, %v368_v6  ;;  %v633_v2 = vld [vmem:[#allocation8 + $0xa0] sm:$0xff]  ;;  %v632_v6 = vld [vmem:[#allocation8 + $0x98] sm:$0xff] }
 0x116   :  { %656 = vmatpush.msrb.mxu1 %v633_v2 }
 0x117   :  { %v529_v19 = vadd.f32 %v516_v3, %v450_v12  ;;  %v726_v3 = vld [vmem:[#allocation8 + $0x158] sm:$0xff]  ;;  %v612_v12 = vld [vmem:[#allocation8 + $0x28] sm:$0xff] }
 0x118   :  { %v326_v4 = vpop.f32.mrf.mxu0  ;;  %v370_v5 = vpop.f32.mrf.mxu1  ;;  %735 = vmatpush.msrb.mxu3 %v726_v3  ;;  %657 = vmatpush.msrb.mxu1 %v632_v6 }
 0x119   :  { %v371_v7 = vadd.f32 %v370_v5, %v326_v4  ;;  %v614_v4 = vld [vmem:[#allocation8 + $0x38] sm:$0xff] }
 0x11a   :  { %v785_v5 = vld [vmem:[#allocation8 + $0x1d8] sm:$0xff]  ;;  %685 = vmatpush.msrb.mxu2 %v614_v4 }
 0x11c   :  { %v440_v9 = vpop.f32.mrf.mxu2  ;;  %v519_v10 = vpop.f32.mrf.mxu3  ;;  %686 = vmatpush.msrb.mxu2 %v613_v8 }
 0x11d   :  { %v451_v13 = vadd.f32 %v440_v9, %v371_v7  ;;  %v725_v7 = vld [vmem:[#allocation8 + $0x150] sm:$0xff] }
 0x11e   :  { %v784_v9 = vld [vmem:[#allocation8 + $0x1d0] sm:$0xff]  ;;  %736 = vmatpush.msrb.mxu3 %v725_v7  ;;  %687 = vmatpush.msrb.mxu2 %v612_v12 }
 0x11f   :  { %v530_v16 = vadd.f32 %v519_v10, %v451_v13  ;;  %v631_v10 = vld [vmem:[#allocation8 + $0x90] sm:$0xff]  ;;  %v783_v13 = vld [vmem:[#allocation8 + $0x1c8] sm:$0xff] }
 0x120   :  { %658 = vmatpush.msrb.mxu1 %v631_v10  ;;  %737 = vmatpush.msrb.mxu3 %v724_v11  ;;  %v772_v7 = vld [vmem:[#allocation2 + $0x23] sm:$0x1] }
 0x121   :  { %2264 = vmatpush.msk.msrb.mxu0 %vm552_vm0, %v530_v16  ;;  %v611_v16 = vld [vmem:[#allocation8 + $0x20] sm:$0xff] }
 0x122   :  { %659 = vmatpush.msrb.mxu1 %v630_v14  ;;  %738 = vmatpush.msrb.mxu3 %v723_v15 }
 0x123   :  { %564 = vmatpush.msrb.mxu0 %v529_v19  ;;  %688 = vmatpush.msrb.mxu2 %v611_v16  ;;  %v629_v19 = vld [vmem:[#allocation8 + $0x80] sm:$0xff] }
 0x124   :  { %660 = vmatpush.msrb.mxu1 %v629_v19  ;;  %739 = vmatpush.msrb.mxu3 %v722_v20 }
 0x125   :  { %565 = vmatpush.msrb.mxu0 %v528_v22  ;;  %v781_v22 = vld [vmem:[#allocation8 + $0x1b8] sm:$0xff]  ;;  %689 = vmatpush.msrb.mxu2 %v610_v21 }
 0x126   :  { %740 = vmatpush.msrb.mxu3 %v721_v23  ;;  %v877_v23 = vld [vmem:[#allocation17 + $0x78] sm:$0xff] }
 0x127   :  { %566 = vmatpush.msrb.mxu0 %v527_v25  ;;  %v780_v25 = vld [vmem:[#allocation8 + $0x1b0] sm:$0xff]  ;;  %690 = vmatpush.msrb.mxu2 %v609_v24  ;;  %v876_v24 = vld [vmem:[#allocation17 + $0x70] sm:$0xff] }
 0x128   :  { %741 = vmatpush.msrb.mxu3 %v720_v26 }
 0x129   :  { %567 = vmatpush.msrb.mxu0 %v526_v28  ;;  %v779_v28 = vld [vmem:[#allocation8 + $0x1a8] sm:$0xff]  ;;  %691 = vmatpush.msrb.mxu2 %v608_v27  ;;  %v875_v27 = vld [vmem:[#allocation17 + $0x68] sm:$0xff] }
 0x12a   :  { %742 = vmatpush.msrb.mxu3 %v719_v29 }
 0x12b   :  { %568 = vmatpush.msrb.mxu0 %v525_v30  ;;  %v607_v30 = vld [vmem:[#allocation8] sm:$0xff] }
 0x12c   :  { %692 = vmatpush.msrb.mxu2 %v607_v30  ;;  %743 = vmatpush.msrb.mxu3 %v718_v32 }
 0x12d   :  { %569 = vmatpush.msrb.mxu0 %v524_v35  ;;  %v716_v35 = vld [vmem:[#allocation8 + $0x108] sm:$0xff] }
 0x12e   :  { %744 = vmatpush.msrb.mxu3 %v717_v33  ;;  %885 = vmatpush.msra.mxu2 %v877_v23 }
 0x12f   :  { %570 = vmatpush.msrb.mxu0 %v523_v37  ;;  %v2446_v37 = vld [vmem:[#allocation22] ss:$0 sm:$0xff] }
 0x130   :  { %745 = vmatpush.msrb.mxu3 %v716_v35  ;;  %886 = vmatpush.msra.mxu2 %v876_v24 }
 0x131   :  { %571 = vmatpush.msrb.mxu0 %v522_v38 }
 0x132   :  { %2265 = vmatmul.msk.f32.vlgmr.msrb.gmra.mxu0 %vm539_vm1, %v531_v46  ;;  %746 = vmatpush.msrb.mxu3 %v715_v41 }
 0x133   :  { %790 = vmatpush.msra.mxu0 %v789_v56  ;;  %887 = vmatpush.msra.mxu2 %v875_v27 }
 0x134   :  { %917 = vmatpush.msra.mxu3 %v877_v23  ;;  %v1006_v23 = vld [vmem:[#allocation10 + $0xe0] sm:$0xff] }
 0x135   :  { %791 = vmatpush.msra.mxu0 %v788_v59 }
 0x136   :  { %918 = vmatpush.msra.mxu3 %v876_v24  ;;  %v989_v24 = vld [vmem:[#allocation10 + $0x78] sm:$0xff] }
 0x137   :  { %792 = vmatpush.msra.mxu0 %v787_v62 }
 0x138   :  { %919 = vmatpush.msra.mxu3 %v875_v27  ;;  %v1005_v27 = vld [vmem:[#allocation10 + $0xd8] sm:$0xff] }
 0x139   :  { %793 = vmatpush.msra.mxu0 %v786_v1 }
 0x13a   :  { %2266 = vmatmul.msk.f32.gmra.mxu0 %vm539_vm1, %v532_v43 }
 0x13b   :  { %794 = vmatpush.msra.mxu0 %v785_v5 }
 0x13d   :  { %795 = vmatpush.msra.mxu0 %v784_v9 }
 0x13f   :  { %796 = vmatpush.msra.mxu0 %v783_v13 }
 0x141   :  { %797 = vmatpush.msra.mxu0 %v782_v17 }
 0x142   :  { %2267 = vmatmul.msk.f32.gmra.mxu0 %vm539_vm1, %v533_v39 }
 0x143   :  { %798 = vmatpush.msra.mxu0 %v781_v22 }
 0x145   :  { %799 = vmatpush.msra.mxu0 %v780_v25 }
 0x147   :  { %800 = vmatpush.msra.mxu0 %v779_v28  ;;  %v874_v28 = vld [vmem:[#allocation17 + $0x60] sm:$0xff] }
 0x148   :  { %888 = vmatpush.msra.mxu2 %v874_v28  ;;  %920 = vmatpush.msra.mxu3 %v874_v28  ;;  %v988_v28 = vld [vmem:[#allocation10 + $0x70] sm:$0xff] }
 0x149   :  { %801 = vmatpush.msra.mxu0 %v778_v31 }
 0x14a   :  { %2268 = vmatmul.msk.f32.gmra.mxu0 %vm539_vm1, %v534_v49 }
 0x14b   :  { %802 = vmatpush.msra.mxu0 %v777_v34 }
 0x14d   :  { %803 = vmatpush.msra.mxu0 %v776_v44 }
 0x14f   :  { %804 = vmatpush.msra.mxu0 %v775_v40 }
 0x151   :  { %805 = vmatpush.msra.mxu0 %v774_v36 }
 0x1af   :  { %v573_v42 = vpop.f32.mrf.mxu0 }
 0x1b0   :  { %v574_v45 = vadd.f32 %v2446_v37, %v573_v42 }
 0x1b2   :  { %v585_v38 = vmul.f32 0.2, %v574_v45 }
 0x1b4   :  { %v589_v46 = vmax.f32 %v574_v45, %v585_v38 }
 0x1b6   :  { %598 = vst [vmem:[#allocation2 + $0x1] sm:$0xff] %v589_v46  ;;  %661 = vmatmul.f32.vlgmr.msrb.gmra.mxu1 %v589_v46 }
 0x1b7   :  { %v576_v47 = vpop.f32.mrf.mxu0 }
 0x1b8   :  { %v577_v48 = vadd.f32 %v2446_v37, %v576_v47 }
 0x1ba   :  { %v586_v43 = vmul.f32 0.2, %v577_v48 }
 0x1bc   :  { %v590_v39 = vmax.f32 %v577_v48, %v586_v43 }
 0x1bd   :  { %v602_v49 = vld [vmem:[#allocation2] sm:$0xff] }
 0x1be   :  { %599 = vst [vmem:[#allocation2 + $0x9] sm:$0xff] %v590_v39  ;;  %693 = vmatmul.f32.vlgmr.msrb.gmra.mxu2 %v602_v49  ;;  %664 = vmatmul.f32.gmra.mxu1 %v590_v39  ;;  %v827_v39 = vld [vmem:[#allocation11] sm:$0xff]  ;;  %v828_v49 = vld [vmem:[#allocation11 + $0x8] sm:$0xff] }
 0x1bf   :  { %v579_v50 = vpop.f32.mrf.mxu0 }
 0x1c0   :  { %v580_v51 = vadd.f32 %v2446_v37, %v579_v50  ;;  %v873_v50 = vld [vmem:[#allocation17 + $0x58] sm:$0xff] }
 0x1c1   :  { %889 = vmatpush.msra.mxu2 %v873_v50  ;;  %921 = vmatpush.msra.mxu3 %v873_v50  ;;  %v1124_v50 = vld [vmem:[#allocation10 + $0x1c8] sm:$0xff] }
 0x1c2   :  { %v587_v52 = vmul.f32 0.2, %v580_v51 }
 0x1c4   :  { %v591_v53 = vmax.f32 %v580_v51, %v587_v52  ;;  %v872_v51 = vld [vmem:[#allocation17 + $0x50] sm:$0xff]  ;;  %v871_v52 = vld [vmem:[#allocation17 + $0x48] sm:$0xff] }
 0x1c5   :  { %v709_v54 = vld [vmem:[#allocation2 + $0x2] sm:$0xff]  ;;  %v710_v61 = vld [vmem:[#allocation2 + $0xa] sm:$0xff]  ;;  %890 = vmatpush.msra.mxu2 %v872_v51  ;;  %922 = vmatpush.msra.mxu3 %v872_v51  ;;  %v999_v51 = vld [vmem:[#allocation10 + $0xa8] sm:$0xff] }
 0x1c6   :  { %v603_v55 = vld [vmem:[#allocation2 + $0x8] sm:$0xff]  ;;  %600 = vst [vmem:[#allocation2 + $0x13] sm:$0xff] %v591_v53  ;;  %747 = vmatmul.f32.vlgmr.msrb.gmra.mxu3 %v709_v54  ;;  %v869_v54 = vld [vmem:[#allocation17 + $0x38] sm:$0xff] }
 0x1c7   :  { %696 = vmatmul.f32.gmra.mxu2 %v603_v55  ;;  %v768_v56 = vld [vmem:[#allocation2 + $0x3] sm:$0xff]  ;;  %v582_v57 = vpop.f32.mrf.mxu0  ;;  %v769_v0 = vld [vmem:[#allocation2 + $0xb] sm:$0xff]  ;;  %923 = vmatpush.msra.mxu3 %v871_v52 }
 0x1c8   :  { %806 = vmatmul.f32.vlgmr.msra.gmra.mxu0 %v768_v56  ;;  %v583_v58 = vadd.f32 %v2446_v37, %v582_v57  ;;  %891 = vmatpush.msra.mxu2 %v871_v52  ;;  %v868_v55 = vld [vmem:[#allocation17 + $0x30] sm:$0xff]  ;;  %v867_v56 = vld [vmem:[#allocation17 + $0x28] sm:$0xff]  ;;  %v866_v57 = vld [vmem:[#allocation17 + $0x20] sm:$0xff] }
 0x1c9   :  { %v982_v52 = vld [vmem:[#allocation10 + $0x40] sm:$0xff] }
 0x1ca   :  { %v588_v59 = vmul.f32 0.2, %v583_v58 }
 0x1cc   :  { %v592_v60 = vmax.f32 %v583_v58, %v588_v59  ;;  %v865_v58 = vld [vmem:[#allocation17 + $0x18] sm:$0xff]  ;;  %v864_v59 = vld [vmem:[#allocation17 + $0x10] sm:$0xff] }
 0x1cd   :  { %v604_v62 = vld [vmem:[#allocation2 + $0x10] sm:$0xff] }
 0x1ce   :  { %v625_v63 = vld [vmem:[#allocation2 + $0x11] sm:$0xff]  ;;  %601 = vst [vmem:[#allocation2 + $0x1b] sm:$0xff] %v592_v60  ;;  %750 = vmatmul.f32.gmra.mxu3 %v710_v61 }
 0x1cf   :  { %699 = vmatmul.f32.gmra.mxu2 %v604_v62  ;;  %667 = vmatmul.f32.gmra.mxu1 %v625_v63  ;;  %v711_v1 = vld [vmem:[#allocation2 + $0x12] sm:$0xff] }
 0x1d0   :  { %809 = vmatmul.f32.gmra.mxu0 %v769_v0  ;;  %v862_v61 = vld [vmem:[#allocation17] sm:$0xff] }
 0x1d5   :  { %v605_v2 = vld [vmem:[#allocation2 + $0x18] sm:$0xff]  ;;  %v606_v5 = vld [vmem:[#allocation2 + $0x20] sm:$0x1]  ;;  %v627_v6 = vld [vmem:[#allocation2 + $0x21] sm:$0x1] }
 0x1d6   :  { %v626_v3 = vld [vmem:[#allocation2 + $0x19] sm:$0xff]  ;;  %753 = vmatmul.f32.gmra.mxu3 %v711_v1  ;;  %v713_v8 = vld [vmem:[#allocation2 + $0x22] sm:$0x1] }
 0x1d7   :  { %702 = vmatmul.f32.gmra.mxu2 %v605_v2  ;;  %670 = vmatmul.f32.gmra.mxu1 %v626_v3  ;;  %v712_v4 = vld [vmem:[#allocation2 + $0x1a] sm:$0xff] }
 0x1d8   :  { %812 = vmatmul.f32.gmra.mxu0 %v591_v53  ;;  %v870_v53 = vld [vmem:[#allocation17 + $0x40] sm:$0xff] }
 0x1d9   :  { %892 = vmatpush.msra.mxu2 %v870_v53  ;;  %924 = vmatpush.msra.mxu3 %v870_v53  ;;  %v1074_v53 = vld [vmem:[#allocation10 + $0x140] sm:$0xff] }
 0x1db   :  { %893 = vmatpush.msra.mxu2 %v869_v54  ;;  %925 = vmatpush.msra.mxu3 %v869_v54  ;;  %v1123_v54 = vld [vmem:[#allocation10 + $0x1c0] sm:$0xff] }
 0x1dd   :  { %894 = vmatpush.msra.mxu2 %v868_v55  ;;  %926 = vmatpush.msra.mxu3 %v868_v55  ;;  %v998_v55 = vld [vmem:[#allocation10 + $0xa0] sm:$0xff] }
 0x1de   :  { %756 = vmatmul.f32.gmra.mxu3 %v712_v4 }
 0x1df   :  { %705 = vmatmul.f32.gmra.mxu2 %v606_v5  ;;  %673 = vmatmul.f32.gmra.mxu1 %v627_v6 }
 0x1e0   :  { %815 = vmatmul.f32.gmra.mxu0 %v592_v60  ;;  %895 = vmatpush.msra.mxu2 %v867_v56  ;;  %v863_v60 = vld [vmem:[#allocation17 + $0x8] sm:$0xff] }
 0x1e1   :  { %927 = vmatpush.msra.mxu3 %v867_v56  ;;  %v981_v56 = vld [vmem:[#allocation10 + $0x38] sm:$0xff] }
 0x1e2   :  { %896 = vmatpush.msra.mxu2 %v866_v57 }
 0x1e3   :  { %928 = vmatpush.msra.mxu3 %v866_v57  ;;  %v1073_v57 = vld [vmem:[#allocation10 + $0x138] sm:$0xff] }
 0x1e4   :  { %897 = vmatpush.msra.mxu2 %v865_v58 }
 0x1e5   :  { %929 = vmatpush.msra.mxu3 %v865_v58  ;;  %v1122_v58 = vld [vmem:[#allocation10 + $0x1b8] sm:$0xff] }
 0x1e6   :  { %759 = vmatmul.f32.gmra.mxu3 %v713_v8  ;;  %898 = vmatpush.msra.mxu2 %v864_v59 }
 0x1e7   :  { %930 = vmatpush.msra.mxu3 %v864_v59  ;;  %v997_v59 = vld [vmem:[#allocation10 + $0x98] sm:$0xff] }
 0x1e8   :  { %818 = vmatmul.f32.gmra.mxu0 %v772_v7  ;;  %899 = vmatpush.msra.mxu2 %v863_v60 }
 0x1e9   :  { %931 = vmatpush.msra.mxu3 %v863_v60  ;;  %v980_v60 = vld [vmem:[#allocation10 + $0x30] sm:$0xff] }
 0x1ea   :  { %900 = vmatpush.msra.mxu2 %v862_v61 }
 0x1eb   :  { %932 = vmatpush.msra.mxu3 %v862_v61  ;;  %v1072_v61 = vld [vmem:[#allocation10 + $0x130] sm:$0xff] }
 0x233   :  { %v662_v9 = vpop.f32.mrf.mxu1 }
 0x23b   :  { %v665_v14 = vpop.f32.mrf.mxu1 }
 0x241   :  { %v694_v10 = vpop.f32.mrf.mxu2 }
 0x242   :  { %v695_v42 = vadd.f32 %v694_v10, %v662_v9 }
 0x245   :  { %v807_v11 = vpop.f32.mrf.mxu0 }
 0x249   :  { %v748_v12 = vpop.f32.mrf.mxu3 }
 0x24a   :  { %v697_v13 = vpop.f32.mrf.mxu2  ;;  %v763_v46 = vadd.f32 %v748_v12, %v695_v42  ;;  %v1077_v42 = vld [vmem:[#allocation10 + $0x158] sm:$0xff] }
 0x24b   :  { %v698_v41 = vadd.f32 %v697_v13, %v665_v14 }
 0x24c   :  { %v668_v18 = vpop.f32.mrf.mxu1  ;;  %v822_v43 = vadd.f32 %v807_v11, %v763_v46  ;;  %v984_v46 = vld [vmem:[#allocation10 + $0x50] sm:$0xff] }
 0x24d   :  { %v810_v15 = vpop.f32.mrf.mxu0 }
 0x251   :  { %v751_v16 = vpop.f32.mrf.mxu3 }
 0x252   :  { %v700_v17 = vpop.f32.mrf.mxu2  ;;  %v764_v45 = vadd.f32 %v751_v16, %v698_v41  ;;  %v1127_v41 = vld [vmem:[#allocation10 + $0x1e0] sm:$0xff] }
 0x253   :  { %v701_v35 = vadd.f32 %v700_v17, %v668_v18 }
 0x254   :  { %v671_v22 = vpop.f32.mrf.mxu1  ;;  %v823_v48 = vadd.f32 %v810_v15, %v764_v45  ;;  %v1126_v45 = vld [vmem:[#allocation10 + $0x1d8] sm:$0xff] }
 0x255   :  { %v813_v19 = vpop.f32.mrf.mxu0 }
 0x259   :  { %v754_v20 = vpop.f32.mrf.mxu3 }
 0x25a   :  { %v703_v21 = vpop.f32.mrf.mxu2  ;;  %v765_v36 = vadd.f32 %v754_v20, %v701_v35  ;;  %v1009_v20 = vld [vmem:[#allocation10 + $0xf8] sm:$0xff]  ;;  %v1003_v35 = vld [vmem:[#allocation10 + $0xc8] sm:$0xff] }
 0x25b   :  { %v704_v31 = vadd.f32 %v703_v21, %v671_v22  ;;  %1010 = vmatpush.msrb.mxu0 %v1009_v20  ;;  %v1008_v21 = vld [vmem:[#allocation10 + $0xf0] sm:$0xff]  ;;  %v1007_v22 = vld [vmem:[#allocation10 + $0xe8] sm:$0xff] }
 0x25c   :  { %v674_v30 = vpop.f32.mrf.mxu1  ;;  %v824_v47 = vadd.f32 %v813_v19, %v765_v36  ;;  %v1002_v36 = vld [vmem:[#allocation10 + $0xc0] sm:$0xff]  ;;  %v1116_v20 = vld [vmem:[#allocation10 + $0x188] sm:$0xff] }
 0x25d   :  { %v816_v26 = vpop.f32.mrf.mxu0  ;;  %1011 = vmatpush.msrb.mxu0 %v1008_v21  ;;  %v974_v21 = vld [vmem:[#allocation10] sm:$0xff] }
 0x25f   :  { %1012 = vmatpush.msrb.mxu0 %v1007_v22  ;;  %v1066_v22 = vld [vmem:[#allocation10 + $0x100] sm:$0xff] }
 0x261   :  { %v757_v25 = vpop.f32.mrf.mxu3  ;;  %1013 = vmatpush.msrb.mxu0 %v1006_v23  ;;  %v1115_v23 = vld [vmem:[#allocation10 + $0x180] sm:$0xff] }
 0x262   :  { %v706_v29 = vpop.f32.mrf.mxu2  ;;  %v766_v44 = vadd.f32 %v757_v25, %v704_v31  ;;  %v1081_v25 = vld [vmem:[#allocation10 + $0x178] sm:$0xff]  ;;  %v1004_v31 = vld [vmem:[#allocation10 + $0xd0] sm:$0xff] }
 0x263   :  { %v707_v32 = vadd.f32 %v706_v29, %v674_v30  ;;  %1082 = vmatpush.msrb.mxu2 %v1081_v25  ;;  %v1080_v29 = vld [vmem:[#allocation10 + $0x170] sm:$0xff]  ;;  %1014 = vmatpush.msrb.mxu0 %v1005_v27 }
 0x264   :  { %v825_v38 = vadd.f32 %v816_v26, %v766_v44  ;;  %v1130_v26 = vld [vmem:[#allocation10 + $0x1f8] sm:$0xff]  ;;  %v1129_v30 = vld [vmem:[#allocation10 + $0x1f0] sm:$0xff]  ;;  %v986_v44 = vld [vmem:[#allocation10 + $0x60] sm:$0xff] }
 0x265   :  { %v819_v34 = vpop.f32.mrf.mxu0  ;;  %1131 = vmatpush.msrb.mxu3 %v1130_v26  ;;  %1083 = vmatpush.msrb.mxu2 %v1080_v29 }
 0x266   :  { %1015 = vmatpush.msrb.mxu0 %v1004_v31 }
 0x267   :  { %1132 = vmatpush.msrb.mxu3 %v1129_v30 }
 0x268   :  { %1016 = vmatpush.msrb.mxu0 %v1003_v35  ;;  %v2448_v35 = vld [vmem:[%s3881_s16] ss:$0 sm:$0xff] }
 0x269   :  { %v760_v33 = vpop.f32.mrf.mxu3 }
 0x26a   :  { %v767_v40 = vadd.f32 %v760_v33, %v707_v32  ;;  %v987_v32 = vld [vmem:[#allocation10 + $0x68] sm:$0xff]  ;;  %1017 = vmatpush.msrb.mxu0 %v1002_v36 }
 0x26b   :  { %v1079_v33 = vld [vmem:[#allocation10 + $0x168] sm:$0xff] }
 0x26c   :  { %v826_v37 = vadd.f32 %v819_v34, %v767_v40  ;;  %v1128_v34 = vld [vmem:[#allocation10 + $0x1e8] sm:$0xff]  ;;  %1084 = vmatpush.msrb.mxu2 %v1079_v33  ;;  %v1078_v40 = vld [vmem:[#allocation10 + $0x160] sm:$0xff] }
 0x26d   :  { %1133 = vmatpush.msrb.mxu3 %v1128_v34 }
 0x26e   :  { %2269 = vmatpush.msk.msra.mxu1 %vm552_vm0, %v826_v37  ;;  %1085 = vmatpush.msrb.mxu2 %v1078_v40  ;;  %v985_v37 = vld [vmem:[#allocation10 + $0x58] sm:$0xff] }
 0x26f   :  { %1134 = vmatpush.msrb.mxu3 %v1127_v41 }
 0x270   :  { %851 = vmatpush.msra.mxu1 %v825_v38  ;;  %1086 = vmatpush.msrb.mxu2 %v1077_v42  ;;  %v1001_v38 = vld [vmem:[#allocation10 + $0xb8] sm:$0xff] }
 0x271   :  { %1135 = vmatpush.msrb.mxu3 %v1126_v45  ;;  %1018 = vmatpush.msrb.mxu0 %v1001_v38 }
 0x272   :  { %852 = vmatpush.msra.mxu1 %v824_v47  ;;  %v1076_v47 = vld [vmem:[#allocation10 + $0x150] sm:$0xff] }
 0x273   :  { %1087 = vmatpush.msrb.mxu2 %v1076_v47 }
 0x274   :  { %853 = vmatpush.msra.mxu1 %v823_v48  ;;  %v1125_v48 = vld [vmem:[#allocation10 + $0x1d0] sm:$0xff] }
 0x275   :  { %1136 = vmatpush.msrb.mxu3 %v1125_v48 }
 0x276   :  { %854 = vmatpush.msra.mxu1 %v822_v43  ;;  %v1000_v43 = vld [vmem:[#allocation10 + $0xb0] sm:$0xff] }
 0x277   :  { %2270 = vmatmul.msk.f32.vlgmr.msra.gmra.mxu1 %vm829_vm2, %v827_v39  ;;  %v983_v39 = vld [vmem:[#allocation10 + $0x48] sm:$0xff]  ;;  %1019 = vmatpush.msrb.mxu0 %v1000_v43 }
 0x278   :  { %1036 = vmatpush.msrb.mxu1 %v989_v24  ;;  %1137 = vmatpush.msrb.mxu3 %v1124_v50 }
 0x279   :  { %1020 = vmatpush.msrb.mxu0 %v999_v51 }
 0x27a   :  { %1037 = vmatpush.msrb.mxu1 %v988_v28  ;;  %1138 = vmatpush.msrb.mxu3 %v1123_v54  ;;  %v1203_v54 = vld [vmem:[#allocation19 + $0x78] sm:$0xff] }
 0x27b   :  { %1021 = vmatpush.msrb.mxu0 %v998_v55  ;;  %v1202_v55 = vld [vmem:[#allocation19 + $0x70] sm:$0xff] }
 0x27c   :  { %1038 = vmatpush.msrb.mxu1 %v987_v32  ;;  %1139 = vmatpush.msrb.mxu3 %v1122_v58  ;;  %v2447_v32 = vld [vmem:[%s3880_s15] ss:$0 sm:$0xff] }
 0x27d   :  { %1022 = vmatpush.msrb.mxu0 %v997_v59  ;;  %v1199_v59 = vld [vmem:[#allocation19 + $0x58] sm:$0xff] }
 0x27e   :  { %1039 = vmatpush.msrb.mxu1 %v986_v44 }
 0x27f   :  { %2271 = vmatmul.msk.f32.gmra.mxu1 %vm829_vm2, %v828_v49  ;;  %v1075_v49 = vld [vmem:[#allocation10 + $0x148] sm:$0xff] }
 0x280   :  { %1040 = vmatpush.msrb.mxu1 %v985_v37  ;;  %1088 = vmatpush.msrb.mxu2 %v1075_v49  ;;  %v1113_v49 = vld [vmem:[#allocation3 + $0x13] sm:$0x1] }
 0x282   :  { %1041 = vmatpush.msrb.mxu1 %v984_v46  ;;  %1089 = vmatpush.msrb.mxu2 %v1074_v53 }
 0x284   :  { %1042 = vmatpush.msrb.mxu1 %v983_v39  ;;  %1090 = vmatpush.msrb.mxu2 %v1073_v57  ;;  %v1200_v57 = vld [vmem:[#allocation19 + $0x60] sm:$0xff] }
 0x286   :  { %1043 = vmatpush.msrb.mxu1 %v982_v52  ;;  %1091 = vmatpush.msrb.mxu2 %v1072_v61 }
 0x288   :  { %1044 = vmatpush.msrb.mxu1 %v981_v56  ;;  %v1201_v56 = vld [vmem:[#allocation19 + $0x68] sm:$0xff] }
 0x28a   :  { %1045 = vmatpush.msrb.mxu1 %v980_v60 }
 0x2f4   :  { %v856_v62 = vpop.f32.mrf.mxu1 }
 0x2fc   :  { %v859_v63 = vpop.f32.mrf.mxu1 }
 0x2fd   :  { %v878_v0 = vadd.f32 %v859_v63, %v856_v62 }
 0x2ff   :  { %v879_v1 = vrot.slane %v878_v0, 4 }
 0x301   :  { %v880_v2 = vadd.f32 %v879_v1, %v878_v0  ;;  %v979_v0 = vld [vmem:[#allocation10 + $0x28] sm:$0xff] }
 0x302   :  { %v1071_v1 = vld [vmem:[#allocation10 + $0x128] sm:$0xff]  ;;  %1046 = vmatpush.msrb.mxu1 %v979_v0  ;;  %v1197_v0 = vld [vmem:[#allocation19 + $0x48] sm:$0xff] }
 0x303   :  { %v881_v3 = vrot.slane %v880_v2, 2  ;;  %1092 = vmatpush.msrb.mxu2 %v1071_v1  ;;  %v1196_v1 = vld [vmem:[#allocation19 + $0x40] sm:$0xff] }
 0x305   :  { %v882_v4 = vadd.f32 %v881_v3, %v880_v2  ;;  %v1120_v2 = vld [vmem:[#allocation10 + $0x1a8] sm:$0xff] }
 0x306   :  { %v995_v3 = vld [vmem:[#allocation10 + $0x88] sm:$0xff] }
 0x307   :  { %v883_v5 = vrot.slane %v882_v4, 1 }
 0x309   :  { %v884_v6 = vadd.f32 %v883_v5, %v882_v4  ;;  %v978_v5 = vld [vmem:[#allocation10 + $0x20] sm:$0xff] }
 0x30a   :  { %1047 = vmatpush.msrb.mxu1 %v978_v5 }
 0x30b   :  { %901 = vmatmul.f32.vlgmr.msra.gmra.mxu2 %v884_v6  ;;  %v1070_v6 = vld [vmem:[#allocation10 + $0x120] sm:$0xff] }
 0x30c   :  { %1093 = vmatpush.msrb.mxu2 %v1070_v6 }
 0x38e   :  { %v902_v7 = vpop.f32.mrf.mxu2 }
 0x38f   :  { %v905_v8 = vperm.slane %v902_v7, 0  ;;  %v1119_v7 = vld [vmem:[#allocation10 + $0x1a0] sm:$0xff] }
 0x391   :  { %v3050_v9 = vsub.f32 %v856_v62, %v905_v8  ;;  %v3052_v10 = vsub.f32 %v859_v63, %v905_v8  ;;  %v1121_v62 = vld [vmem:[#allocation10 + $0x1b0] sm:$0xff] }
 0x392   :  { %v996_v63 = vld [vmem:[#allocation10 + $0x90] sm:$0xff]  ;;  %1140 = vmatpush.msrb.mxu3 %v1121_v62  ;;  %v1198_v62 = vld [vmem:[#allocation19 + $0x50] sm:$0xff] }
 0x393   :  { %v908_v11 = vmul.f32 %v3050_v9, %v3050_v9  ;;  %v909_v12 = vmul.f32 %v3052_v10, %v3052_v10  ;;  %1023 = vmatpush.msrb.mxu0 %v996_v63 }
 0x394   :  { %1141 = vmatpush.msrb.mxu3 %v1120_v2 }
 0x395   :  { %v910_v13 = vadd.f32 %v909_v12, %v908_v11  ;;  %1024 = vmatpush.msrb.mxu0 %v995_v3  ;;  %v994_v11 = vld [vmem:[#allocation10 + $0x80] sm:$0xff]  ;;  %v977_v12 = vld [vmem:[#allocation10 + $0x18] sm:$0xff] }
 0x396   :  { %1142 = vmatpush.msrb.mxu3 %v1119_v7  ;;  %1048 = vmatpush.msrb.mxu1 %v977_v12  ;;  %v1195_v3 = vld [vmem:[#allocation19 + $0x38] sm:$0xff] }
 0x397   :  { %v911_v14 = vrot.slane %v910_v13, 4  ;;  %1025 = vmatpush.msrb.mxu0 %v994_v11 }
 0x399   :  { %v912_v15 = vadd.f32 %v911_v14, %v910_v13  ;;  %v1069_v13 = vld [vmem:[#allocation10 + $0x118] sm:$0xff] }
 0x39a   :  { %v1118_v14 = vld [vmem:[#allocation10 + $0x198] sm:$0xff]  ;;  %1094 = vmatpush.msrb.mxu2 %v1069_v13 }
 0x39b   :  { %v913_v16 = vrot.slane %v912_v15, 2  ;;  %1143 = vmatpush.msrb.mxu3 %v1118_v14 }
 0x39d   :  { %v914_v17 = vadd.f32 %v913_v16, %v912_v15  ;;  %v976_v15 = vld [vmem:[#allocation10 + $0x10] sm:$0xff] }
 0x39e   :  { %v1068_v16 = vld [vmem:[#allocation10 + $0x110] sm:$0xff]  ;;  %1049 = vmatpush.msrb.mxu1 %v976_v15 }
 0x39f   :  { %v915_v18 = vrot.slane %v914_v17, 1  ;;  %1095 = vmatpush.msrb.mxu2 %v1068_v16 }
 0x3a1   :  { %v916_v19 = vadd.f32 %v915_v18, %v914_v17  ;;  %v1117_v17 = vld [vmem:[#allocation10 + $0x190] sm:$0xff]  ;;  %v975_v18 = vld [vmem:[#allocation10 + $0x8] sm:$0xff] }
 0x3a2   :  { %1144 = vmatpush.msrb.mxu3 %v1117_v17  ;;  %1050 = vmatpush.msrb.mxu1 %v975_v18 }
 0x3a3   :  { %933 = vmatmul.f32.vlgmr.msra.gmra.mxu3 %v916_v19  ;;  %v1067_v19 = vld [vmem:[#allocation10 + $0x108] sm:$0xff] }
 0x3a4   :  { %1096 = vmatpush.msrb.mxu2 %v1067_v19  ;;  %1145 = vmatpush.msrb.mxu3 %v1116_v20  ;;  %v1160_v20 = vld [vmem:[#allocation13] sm:$0xff] }
 0x3a5   :  { %1051 = vmatpush.msrb.mxu1 %v974_v21  ;;  %v1194_v21 = vld [vmem:[#allocation19 + $0x30] sm:$0xff] }
 0x3a6   :  { %1097 = vmatpush.msrb.mxu2 %v1066_v22  ;;  %1146 = vmatpush.msrb.mxu3 %v1115_v23  ;;  %v1193_v22 = vld [vmem:[#allocation19 + $0x28] sm:$0xff]  ;;  %v1192_v23 = vld [vmem:[#allocation19 + $0x20] sm:$0xff] }
 0x3a7   :  { %1210 = vmatpush.msra.mxu1 %v1203_v54 }
 0x3a8   :  { %1239 = vmatpush.msra.mxu2 %v1203_v54 }
 0x3a9   :  { %1211 = vmatpush.msra.mxu1 %v1202_v55 }
 0x3aa   :  { %1240 = vmatpush.msra.mxu2 %v1202_v55  ;;  %v2298_v55 = vld [vmem:[%s3904_s29 + $0x1c0] sm:$0xff] }
 0x3ab   :  { %1212 = vmatpush.msra.mxu1 %v1201_v56 }
 0x3ac   :  { %1241 = vmatpush.msra.mxu2 %v1201_v56  ;;  %v2299_v56 = vld [vmem:[%s3904_s29 + $0x1c8] sm:$0xff] }
 0x3ad   :  { %1213 = vmatpush.msra.mxu1 %v1200_v57 }
 0x3ae   :  { %1242 = vmatpush.msra.mxu2 %v1200_v57  ;;  %v1313_v57 = vld [vmem:[%s3904_s29 + $0xc0] sm:$0xff] }
 0x3af   :  { %1214 = vmatpush.msra.mxu1 %v1199_v59 }
 0x3b0   :  { %1243 = vmatpush.msra.mxu2 %v1199_v59  ;;  %v2296_v59 = vld [vmem:[%s3904_s29 + $0x1b0] sm:$0xff] }
 0x3b1   :  { %1215 = vmatpush.msra.mxu1 %v1198_v62 }
 0x3b2   :  { %1244 = vmatpush.msra.mxu2 %v1198_v62  ;;  %v1312_v62 = vld [vmem:[%s3904_s29 + $0xb8] sm:$0xff] }
 0x3b3   :  { %1216 = vmatpush.msra.mxu1 %v1197_v0 }
 0x3b4   :  { %1245 = vmatpush.msra.mxu2 %v1197_v0  ;;  %v2295_v0 = vld [vmem:[%s3904_s29 + $0x1a8] sm:$0xff] }
 0x3b5   :  { %1217 = vmatpush.msra.mxu1 %v1196_v1 }
 0x3b6   :  { %1246 = vmatpush.msra.mxu2 %v1196_v1  ;;  %v1309_v1 = vld [vmem:[%s3904_s29 + $0xa0] sm:$0xff] }
 0x3b7   :  { %1218 = vmatpush.msra.mxu1 %v1195_v3 }
 0x3b8   :  { %1247 = vmatpush.msra.mxu2 %v1195_v3  ;;  %v2292_v3 = vld [vmem:[%s3904_s29 + $0x190] sm:$0xff] }
 0x3b9   :  { %1219 = vmatpush.msra.mxu1 %v1194_v21 }
 0x3ba   :  { %1248 = vmatpush.msra.mxu2 %v1194_v21  ;;  %v2284_v21 = vld [vmem:[%s3904_s29 + $0x150] sm:$0xff] }
 0x3bb   :  { %1220 = vmatpush.msra.mxu1 %v1193_v22 }
 0x3bc   :  { %1249 = vmatpush.msra.mxu2 %v1193_v22  ;;  %v2285_v22 = vld [vmem:[%s3904_s29 + $0x158] sm:$0xff] }
 0x3bd   :  { %1221 = vmatpush.msra.mxu1 %v1192_v23 }
 0x3be   :  { %1250 = vmatpush.msra.mxu2 %v1192_v23  ;;  %v1299_v23 = vld [vmem:[%s3904_s29 + $0x50] sm:$0xff] }
 0x426   :  { %v934_v4 = vpop.f32.mrf.mxu3 }
 0x427   :  { %v935_v8 = vadd.f32 1e-05, %v934_v4 }
 0x429   :  { %2452 = vrsqrt.f32 %v935_v8  ;;  %vm943_vm4 = vweird.f32 %v935_v8 }
 0x42f   :  { %v2453_v24 = vpop.eup %2452 }
 0x430   :  { %v938_v25 = vmul.f32 %v2453_v24, %v935_v8  ;;  %vm944_vm3 = vweird.f32 %v2453_v24 }
 0x431   :  { %vm945_vm5 = vmor %vm943_vm4, %vm944_vm3 }
 0x432   :  { %v939_v26 = vmul.f32 %v2453_v24, %v938_v25  ;;  %v1190_v25 = vld [vmem:[#allocation19 + $0x10] sm:$0xff] }
 0x434   :  { %v940_v27 = vmul.f32 0.5, %v939_v26  ;;  %v1189_v26 = vld [vmem:[#allocation19 + $0x8] sm:$0xff] }
 0x436   :  { %v941_v28 = vsub.f32 1.5, %v940_v27  ;;  %v1188_v27 = vld [vmem:[#allocation19] sm:$0xff] }
 0x438   :  { %v942_v29 = vmul.f32 %v2453_v24, %v941_v28 }
 0x43a   :  { %v946_v30 = vsel %vm945_vm5, %v2453_v24, %v942_v29  ;;  %v1191_v24 = vld [vmem:[#allocation19 + $0x18] sm:$0xff]  ;;  %vm1976_vm5 = vcmask 519169  }
 0x43b   :  { %v947_v31 = vperm.slane %v946_v30, 0  ;;  %1222 = vmatpush.msra.mxu1 %v1191_v24  ;;  %1251 = vmatpush.msra.mxu2 %v1191_v24  ;;  %v1300_v24 = vld [vmem:[%s3904_s29 + $0x58] sm:$0xff] }
 0x43d   :  { %v948_v33 = vmul.f32 %v947_v31, %v3050_v9  ;;  %v949_v34 = vmul.f32 %v947_v31, %v3052_v10  ;;  %1223 = vmatpush.msra.mxu1 %v1190_v25  ;;  %1252 = vmatpush.msra.mxu2 %v1190_v25  ;;  %v2282_v25 = vld [vmem:[%s3904_s29 + $0x140] sm:$0xff] }
 0x43f   :  { %v954_v44 = vmul.f32 %v2447_v32, %v948_v33  ;;  %v955_v40 = vmul.f32 %v2447_v32, %v949_v34  ;;  %1224 = vmatpush.msra.mxu1 %v1189_v26  ;;  %1253 = vmatpush.msra.mxu2 %v1189_v26  ;;  %v2283_v26 = vld [vmem:[%s3904_s29 + $0x148] sm:$0xff] }
 0x441   :  { %v960_v41 = vadd.f32 %v2448_v35, %v954_v44  ;;  %v961_v36 = vadd.f32 %v2448_v35, %v955_v40  ;;  %1225 = vmatpush.msra.mxu1 %v1188_v27  ;;  %1254 = vmatpush.msra.mxu2 %v1188_v27  ;;  %v2304_v35 = vld [vmem:[%s3904_s29 + $0x1f0] sm:$0xff]  ;;  %v2305_v44 = vld [vmem:[%s3904_s29 + $0x1f8] sm:$0xff]  ;;  %v1297_v27 = vld [vmem:[%s3904_s29 + $0x40] sm:$0xff] }
 0x442   :  { %v1319_v40 = vld [vmem:[%s3904_s29 + $0xf0] sm:$0xff]  ;;  %1356 = vmatpush.msra.mxu3 %v2304_v35  ;;  %v1293_v35 = vld [vmem:[%s3904_s29 + $0x20] sm:$0xff] }
 0x443   :  { %v962_v37 = vmul.f32 0.2, %v960_v41  ;;  %v963_v42 = vmul.f32 0.2, %v961_v36 }
 0x445   :  { %v964_v45 = vmax.f32 %v960_v41, %v962_v37  ;;  %v965_v38 = vmax.f32 %v961_v36, %v963_v42  ;;  %v1320_v41 = vld [vmem:[%s3904_s29 + $0xf8] sm:$0xff]  ;;  %v2302_v36 = vld [vmem:[%s3904_s29 + $0x1e0] sm:$0xff]  ;;  %v2303_v37 = vld [vmem:[%s3904_s29 + $0x1e8] sm:$0xff] }
 0x446   :  { %v1317_v42 = vld [vmem:[%s3904_s29 + $0xe0] sm:$0xff]  ;;  %1357 = vmatpush.msra.mxu3 %v2302_v36  ;;  %v1291_v36 = vld [vmem:[%s3904_s29 + $0x10] sm:$0xff] }
 0x447   :  { %969 = vst [vmem:[#allocation3 + $0x1] sm:$0xff] %v964_v45  ;;  %1026 = vmatmul.f32.vlgmr.msrb.gmra.mxu0 %v964_v45  ;;  %v1318_v45 = vld [vmem:[%s3904_s29 + $0xe8] sm:$0xff] }
 0x448   :  { %970 = vst [vmem:[#allocation3 + $0xb] sm:$0xff] %v965_v38 }
 0x44e   :  { %v971_v46 = vld [vmem:[#allocation3] sm:$0xff] }
 0x44f   :  { %v1062_v47 = vld [vmem:[#allocation3 + $0x2] sm:$0xff]  ;;  %1052 = vmatmul.f32.vlgmr.msrb.gmra.mxu1 %v971_v46  ;;  %v1063_v43 = vld [vmem:[#allocation3 + $0xa] sm:$0xff]  ;;  %v1064_v51 = vld [vmem:[#allocation3 + $0x12] sm:$0x1] }
 0x450   :  { %v1111_v9 = vld [vmem:[#allocation3 + $0x3] sm:$0xff]  ;;  %1098 = vmatmul.f32.vlgmr.msrb.gmra.mxu2 %v1062_v47  ;;  %v992_v39 = vld [vmem:[#allocation3 + $0x11] sm:$0x1]  ;;  %v973_v50 = vld [vmem:[#allocation3 + $0x10] sm:$0x1]  ;;  %1402 = vmatpush.msrb.mxu1 %v1319_v40 }
 0x451   :  { %v991_v10 = vld [vmem:[#allocation3 + $0x9] sm:$0xff]  ;;  %1147 = vmatmul.f32.vlgmr.msrb.gmra.mxu3 %v1111_v9  ;;  %1425 = vmatpush.msrb.mxu2 %v1320_v41 }
 0x452   :  { %1029 = vmatmul.f32.gmra.mxu0 %v991_v10  ;;  %v972_v48 = vld [vmem:[#allocation3 + $0x8] sm:$0xff]  ;;  %v2301_v46 = vld [vmem:[%s3904_s29 + $0x1d8] sm:$0xff]  ;;  %1403 = vmatpush.msrb.mxu1 %v1317_v42  ;;  %v2274_v42 = vld [vmem:[%s3904_s29 + $0x100] sm:$0xff] }
 0x453   :  { %v1315_v47 = vld [vmem:[%s3904_s29 + $0xd0] sm:$0xff]  ;;  %v1316_v9 = vld [vmem:[%s3904_s29 + $0xd8] sm:$0xff]  ;;  %1426 = vmatpush.msrb.mxu2 %v1318_v45  ;;  %v2275_v45 = vld [vmem:[%s3904_s29 + $0x108] sm:$0xff] }
 0x454   :  { %1404 = vmatpush.msrb.mxu1 %v1315_v47  ;;  %v2276_v40 = vld [vmem:[%s3904_s29 + $0x110] sm:$0xff]  ;;  %v2277_v41 = vld [vmem:[%s3904_s29 + $0x118] sm:$0xff] }
 0x455   :  { %1427 = vmatpush.msrb.mxu2 %v1316_v9  ;;  %v2336_v47 = vld [vmem:[%s3904_s29 + $0x2f0] sm:$0xff]  ;;  %v2337_v9 = vld [vmem:[%s3904_s29 + $0x2f8] sm:$0xff] }
 0x456   :  { %1405 = vmatpush.msrb.mxu1 %v1313_v57 }
 0x457   :  { %1055 = vmatmul.f32.gmra.mxu1 %v972_v48 }
 0x458   :  { %1101 = vmatmul.f32.gmra.mxu2 %v1063_v43 }
 0x459   :  { %1150 = vmatmul.f32.gmra.mxu3 %v965_v38  ;;  %v2300_v38 = vld [vmem:[%s3904_s29 + $0x1d0] sm:$0xff] }
 0x45a   :  { %1032 = vmatmul.f32.gmra.mxu0 %v992_v39  ;;  %1358 = vmatpush.msra.mxu3 %v2300_v38  ;;  %v1289_v38 = vld [vmem:[%s3904_s29] sm:$0xff] }
 0x45c   :  { %1359 = vmatpush.msra.mxu3 %v2298_v55 }
 0x45e   :  { %1360 = vmatpush.msra.mxu3 %v2296_v59  ;;  %v2331_v59 = vld [vmem:[%s3904_s29 + $0x2c8] sm:$0xff] }
 0x45f   :  { %1058 = vmatmul.f32.gmra.mxu1 %v973_v50 }
 0x460   :  { %1104 = vmatmul.f32.gmra.mxu2 %v1064_v51 }
 0x461   :  { %1153 = vmatmul.f32.gmra.mxu3 %v1113_v49 }
 0x4c4   :  { %v1027_v52 = vpop.f32.mrf.mxu0 }
 0x4cc   :  { %v1053_v53 = vpop.f32.mrf.mxu1 }
 0x4cd   :  { %v1054_v12 = vadd.f32 %v1053_v53, %v1027_v52 }
 0x4cf   :  { %v1030_v63 = vpop.f32.mrf.mxu0 }
 0x4d3   :  { %v1099_v58 = vpop.f32.mrf.mxu2 }
 0x4d4   :  { %v1148_v60 = vpop.f32.mrf.mxu3  ;;  %v1056_v61 = vpop.f32.mrf.mxu1  ;;  %v1108_v16 = vadd.f32 %v1099_v58, %v1054_v12  ;;  %v1314_v58 = vld [vmem:[%s3904_s29 + $0xc8] sm:$0xff] }
 0x4d5   :  { %v1057_v7 = vadd.f32 %v1056_v61, %v1030_v63  ;;  %1428 = vmatpush.msrb.mxu2 %v1314_v58  ;;  %v1311_v61 = vld [vmem:[%s3904_s29 + $0xb0] sm:$0xff]  ;;  %v2294_v63 = vld [vmem:[%s3904_s29 + $0x1a0] sm:$0xff]  ;;  %v1306_v12 = vld [vmem:[%s3904_s29 + $0x88] sm:$0xff] }
 0x4d6   :  { %v1157_v19 = vadd.f32 %v1148_v60, %v1108_v16  ;;  %v2297_v60 = vld [vmem:[%s3904_s29 + $0x1b8] sm:$0xff]  ;;  %1406 = vmatpush.msrb.mxu1 %v1311_v61  ;;  %1361 = vmatpush.msra.mxu3 %v2294_v63  ;;  %v2330_v58 = vld [vmem:[%s3904_s29 + $0x2c0] sm:$0xff]  ;;  %v2363_v61 = vld [vmem:[%s3904_s29 + $0x3c8] sm:$0xff] }
 0x4d7   :  { %v1033_v6 = vpop.f32.mrf.mxu0  ;;  %1429 = vmatpush.msrb.mxu2 %v1312_v62  ;;  %v1304_v16 = vld [vmem:[%s3904_s29 + $0x78] sm:$0xff]  ;;  %v2328_v62 = vld [vmem:[%s3904_s29 + $0x2b0] sm:$0xff] }
 0x4d8   :  { %1407 = vmatpush.msrb.mxu1 %v1309_v1  ;;  %1362 = vmatpush.msra.mxu3 %v2292_v3  ;;  %v2329_v63 = vld [vmem:[%s3904_s29 + $0x2b8] sm:$0xff]  ;;  %v2327_v3 = vld [vmem:[%s3904_s29 + $0x2a8] sm:$0xff] }
 0x4d9   :  { %v2361_v1 = vld [vmem:[%s3904_s29 + $0x3b8] sm:$0xff] }
 0x4db   :  { %v1102_v2 = vpop.f32.mrf.mxu2 }
 0x4dc   :  { %v1151_v4 = vpop.f32.mrf.mxu3  ;;  %v1059_v5 = vpop.f32.mrf.mxu1  ;;  %v1109_v13 = vadd.f32 %v1102_v2, %v1057_v7  ;;  %v1310_v2 = vld [vmem:[%s3904_s29 + $0xa8] sm:$0xff]  ;;  %v2290_v7 = vld [vmem:[%s3904_s29 + $0x180] sm:$0xff] }
 0x4dd   :  { %v1060_v8 = vadd.f32 %v1059_v5, %v1033_v6  ;;  %1430 = vmatpush.msrb.mxu2 %v1310_v2  ;;  %v1307_v5 = vld [vmem:[%s3904_s29 + $0x90] sm:$0xff]  ;;  %v1308_v6 = vld [vmem:[%s3904_s29 + $0x98] sm:$0xff]  ;;  %1363 = vmatpush.msra.mxu3 %v2290_v7  ;;  %v2326_v2 = vld [vmem:[%s3904_s29 + $0x2a0] sm:$0xff] }
 0x4de   :  { %v1158_v18 = vadd.f32 %v1151_v4, %v1109_v13  ;;  %v2293_v4 = vld [vmem:[%s3904_s29 + $0x198] sm:$0xff]  ;;  %1408 = vmatpush.msrb.mxu1 %v1307_v5  ;;  %v2288_v13 = vld [vmem:[%s3904_s29 + $0x170] sm:$0xff]  ;;  %v2359_v5 = vld [vmem:[%s3904_s29 + $0x3a8] sm:$0xff] }
 0x4df   :  { %1431 = vmatpush.msrb.mxu2 %v1308_v6  ;;  %1364 = vmatpush.msra.mxu3 %v2288_v13  ;;  %v2324_v6 = vld [vmem:[%s3904_s29 + $0x290] sm:$0xff]  ;;  %v2325_v7 = vld [vmem:[%s3904_s29 + $0x298] sm:$0xff]  ;;  %v2323_v13 = vld [vmem:[%s3904_s29 + $0x288] sm:$0xff] }
 0x4e1   :  { %1432 = vmatpush.msrb.mxu2 %v1306_v12  ;;  %v2322_v12 = vld [vmem:[%s3904_s29 + $0x280] sm:$0xff] }
 0x4e3   :  { %v1105_v11 = vpop.f32.mrf.mxu2  ;;  %1433 = vmatpush.msrb.mxu2 %v1304_v16  ;;  %v2355_v16 = vld [vmem:[%s3904_s29 + $0x388] sm:$0xff] }
 0x4e4   :  { %v1110_v14 = vadd.f32 %v1105_v11, %v1060_v8  ;;  %v1154_v15 = vpop.f32.mrf.mxu3  ;;  %v2291_v8 = vld [vmem:[%s3904_s29 + $0x188] sm:$0xff]  ;;  %v1305_v11 = vld [vmem:[%s3904_s29 + $0x80] sm:$0xff] }
 0x4e5   :  { %1409 = vmatpush.msrb.mxu1 %v1305_v11  ;;  %v2357_v11 = vld [vmem:[%s3904_s29 + $0x398] sm:$0xff] }
 0x4e6   :  { %v1159_v17 = vadd.f32 %v1154_v15, %v1110_v14  ;;  %v2289_v14 = vld [vmem:[%s3904_s29 + $0x178] sm:$0xff]  ;;  %v1303_v15 = vld [vmem:[%s3904_s29 + $0x70] sm:$0xff] }
 0x4e7   :  { %1410 = vmatpush.msrb.mxu1 %v1303_v15  ;;  %v2354_v15 = vld [vmem:[%s3904_s29 + $0x380] sm:$0xff] }
 0x4e8   :  { %2272 = vmatpush.msk.msra.mxu0 %vm552_vm0, %v1159_v17  ;;  %v2286_v17 = vld [vmem:[%s3904_s29 + $0x160] sm:$0xff] }
 0x4e9   :  { %1365 = vmatpush.msra.mxu3 %v2286_v17 }
 0x4ea   :  { %1182 = vmatpush.msra.mxu0 %v1158_v18  ;;  %v2287_v18 = vld [vmem:[%s3904_s29 + $0x168] sm:$0xff] }
 0x4eb   :  { %1366 = vmatpush.msra.mxu3 %v2284_v21  ;;  %v2352_v21 = vld [vmem:[%s3904_s29 + $0x370] sm:$0xff] }
 0x4ec   :  { %1183 = vmatpush.msra.mxu0 %v1157_v19  ;;  %v1301_v19 = vld [vmem:[%s3904_s29 + $0x60] sm:$0xff] }
 0x4ed   :  { %2273 = vmatmul.msk.f32.vlgmr.msra.gmra.mxu0 %vm1161_vm6, %v1160_v20  ;;  %v1302_v20 = vld [vmem:[%s3904_s29 + $0x68] sm:$0xff]  ;;  %1411 = vmatpush.msrb.mxu1 %v1301_v19  ;;  %v2321_v19 = vld [vmem:[%s3904_s29 + $0x278] sm:$0xff]  ;;  %vm1983_vm6 = vcmask 523270  }
 0x4ee   :  { %1379 = vmatpush.msrb.mxu0 %v2305_v44  ;;  %1434 = vmatpush.msrb.mxu2 %v1302_v20  ;;  %v1294_v44 = vld [vmem:[%s3904_s29 + $0x28] sm:$0xff] }
 0x4ef   :  { %1412 = vmatpush.msrb.mxu1 %v1299_v23  ;;  %1367 = vmatpush.msra.mxu3 %v2282_v25  ;;  %v2318_v23 = vld [vmem:[%s3904_s29 + $0x260] sm:$0xff] }
 0x4f0   :  { %1380 = vmatpush.msrb.mxu0 %v2303_v37  ;;  %1435 = vmatpush.msrb.mxu2 %v1300_v24  ;;  %v1292_v37 = vld [vmem:[%s3904_s29 + $0x18] sm:$0xff]  ;;  %v2319_v24 = vld [vmem:[%s3904_s29 + $0x268] sm:$0xff]  ;;  %v2350_v25 = vld [vmem:[%s3904_s29 + $0x360] sm:$0xff] }
 0x4f1   :  { %1413 = vmatpush.msrb.mxu1 %v1297_v27 }
 0x4f2   :  { %1381 = vmatpush.msrb.mxu0 %v2301_v46  ;;  %v1290_v46 = vld [vmem:[%s3904_s29 + $0x8] sm:$0xff] }
 0x4f4   :  { %1382 = vmatpush.msrb.mxu0 %v2299_v56  ;;  %v2365_v56 = vld [vmem:[%s3904_s29 + $0x3d8] sm:$0xff] }
 0x4f6   :  { %1383 = vmatpush.msrb.mxu0 %v2297_v60  ;;  %v2362_v60 = vld [vmem:[%s3904_s29 + $0x3c0] sm:$0xff] }
 0x4f8   :  { %1384 = vmatpush.msrb.mxu0 %v2295_v0  ;;  %v2360_v0 = vld [vmem:[%s3904_s29 + $0x3b0] sm:$0xff] }
 0x4fa   :  { %1385 = vmatpush.msrb.mxu0 %v2293_v4  ;;  %v2358_v4 = vld [vmem:[%s3904_s29 + $0x3a0] sm:$0xff] }
 0x4fc   :  { %1386 = vmatpush.msrb.mxu0 %v2291_v8  ;;  %v2356_v8 = vld [vmem:[%s3904_s29 + $0x390] sm:$0xff] }
 0x4fe   :  { %1387 = vmatpush.msrb.mxu0 %v2289_v14 }
 0x500   :  { %1388 = vmatpush.msrb.mxu0 %v2287_v18  ;;  %v2320_v18 = vld [vmem:[%s3904_s29 + $0x270] sm:$0xff] }
 0x502   :  { %1389 = vmatpush.msrb.mxu0 %v2285_v22  ;;  %v2353_v22 = vld [vmem:[%s3904_s29 + $0x378] sm:$0xff] }
 0x504   :  { %1390 = vmatpush.msrb.mxu0 %v2283_v26  ;;  %v2351_v26 = vld [vmem:[%s3904_s29 + $0x368] sm:$0xff] }
 0x56a   :  { %v1185_v28 = vpop.f32.mrf.mxu0 }
 0x56b   :  { %v1204_v29 = vrot.slane %v1185_v28, 4 }
 0x56d   :  { %v1205_v30 = vadd.f32 %v1204_v29, %v1185_v28  ;;  %v2280_v29 = vld [vmem:[%s3904_s29 + $0x130] sm:$0xff] }
 0x56e   :  { %1368 = vmatpush.msra.mxu3 %v2280_v29  ;;  %v2317_v29 = vld [vmem:[%s3904_s29 + $0x258] sm:$0xff] }
 0x56f   :  { %v1206_v31 = vrot.slane %v1205_v30, 2 }
 0x571   :  { %v1207_v32 = vadd.f32 %v1206_v31, %v1205_v30  ;;  %v2281_v30 = vld [vmem:[%s3904_s29 + $0x138] sm:$0xff]  ;;  %v1295_v31 = vld [vmem:[%s3904_s29 + $0x30] sm:$0xff] }
 0x572   :  { %1391 = vmatpush.msrb.mxu0 %v2281_v30  ;;  %1414 = vmatpush.msrb.mxu1 %v1295_v31  ;;  %v2348_v30 = vld [vmem:[%s3904_s29 + $0x350] sm:$0xff]  ;;  %v2349_v31 = vld [vmem:[%s3904_s29 + $0x358] sm:$0xff] }
 0x573   :  { %v1208_v33 = vrot.slane %v1207_v32, 1 }
 0x574   :  { %1415 = vmatpush.msrb.mxu1 %v1293_v35  ;;  %v2346_v35 = vld [vmem:[%s3904_s29 + $0x340] sm:$0xff] }
 0x575   :  { %v1209_v34 = vadd.f32 %v1208_v33, %v1207_v32  ;;  %v1296_v32 = vld [vmem:[%s3904_s29 + $0x38] sm:$0xff]  ;;  %v2278_v33 = vld [vmem:[%s3904_s29 + $0x120] sm:$0xff] }
 0x576   :  { %1369 = vmatpush.msra.mxu3 %v2278_v33  ;;  %1416 = vmatpush.msrb.mxu1 %v1291_v36  ;;  %v2314_v33 = vld [vmem:[%s3904_s29 + $0x240] sm:$0xff]  ;;  %v2313_v36 = vld [vmem:[%s3904_s29 + $0x238] sm:$0xff] }
 0x577   :  { %1226 = vmatmul.f32.vlgmr.msra.gmra.mxu1 %v1209_v34  ;;  %v2279_v34 = vld [vmem:[%s3904_s29 + $0x128] sm:$0xff] }
 0x578   :  { %1392 = vmatpush.msrb.mxu0 %v2279_v34  ;;  %1370 = vmatpush.msra.mxu3 %v2276_v40  ;;  %v2315_v34 = vld [vmem:[%s3904_s29 + $0x248] sm:$0xff] }
 0x579   :  { %1417 = vmatpush.msrb.mxu1 %v1289_v38  ;;  %v2310_v38 = vld [vmem:[%s3904_s29 + $0x220] sm:$0xff] }
 0x57a   :  { %1393 = vmatpush.msrb.mxu0 %v2277_v41  ;;  %1371 = vmatpush.msra.mxu3 %v2274_v42  ;;  %v2312_v41 = vld [vmem:[%s3904_s29 + $0x230] sm:$0xff] }
 0x57c   :  { %1394 = vmatpush.msrb.mxu0 %v2275_v45  ;;  %1483 = vmatpush.msrb.mxu3 %v2336_v47  ;;  %v2345_v45 = vld [vmem:[%s3904_s29 + $0x338] sm:$0xff] }
 0x57e   :  { %1506 = vmatpush.msra.mxu0 %v2337_v9  ;;  %v2449_v9 = vld [vmem:[%s3882_s17] ss:$0 sm:$0xff] }
 0x5f4   :  { %v1227_v10 = vpop.f32.mrf.mxu1 }
 0x5f5   :  { %v1230_v48 = vperm.slane %v1227_v10, 0  ;;  %v2368_v10 = vld [vmem:[%s3904_s29 + $0x3f0] sm:$0xff] }
 0x5f6   :  { %1568 = vmatpush.msra.mxu1 %v2368_v10  ;;  %v2342_v10 = vld [vmem:[%s3904_s29 + $0x320] sm:$0xff] }
 0x5f7   :  { %v3103_v43 = vsub.f32 %v1185_v28, %v1230_v48  ;;  %v1298_v28 = vld [vmem:[%s3904_s29 + $0x48] sm:$0xff]  ;;  %v2369_v48 = vld [vmem:[%s3904_s29 + $0x3f8] sm:$0xff] }
 0x5f8   :  { %1436 = vmatpush.msrb.mxu2 %v1298_v28  ;;  %v2316_v28 = vld [vmem:[%s3904_s29 + $0x250] sm:$0xff] }
 0x5f9   :  { %v1232_v39 = vmul.f32 %v3103_v43, %v3103_v43 }
 0x5fa   :  { %1437 = vmatpush.msrb.mxu2 %v1296_v32 }
 0x5fb   :  { %v1233_v49 = vrot.slane %v1232_v39, 4 }
 0x5fc   :  { %1438 = vmatpush.msrb.mxu2 %v1294_v44  ;;  %v2347_v44 = vld [vmem:[%s3904_s29 + $0x348] sm:$0xff] }
 0x5fd   :  { %v1234_v50 = vadd.f32 %v1233_v49, %v1232_v39  ;;  %v2334_v39 = vld [vmem:[%s3904_s29 + $0x2e0] sm:$0xff]  ;;  %v2335_v49 = vld [vmem:[%s3904_s29 + $0x2e8] sm:$0xff] }
 0x5fe   :  { %1439 = vmatpush.msrb.mxu2 %v1292_v37  ;;  %1484 = vmatpush.msrb.mxu3 %v2334_v39  ;;  %v2344_v37 = vld [vmem:[%s3904_s29 + $0x330] sm:$0xff] }
 0x5ff   :  { %v1235_v51 = vrot.slane %v1234_v50, 2  ;;  %1507 = vmatpush.msra.mxu0 %v2335_v49  ;;  %v2308_v39 = vld [vmem:[%s3904_s29 + $0x210] sm:$0xff]  ;;  %v2309_v49 = vld [vmem:[%s3904_s29 + $0x218] sm:$0xff] }
 0x600   :  { %1440 = vmatpush.msrb.mxu2 %v1290_v46  ;;  %v2311_v46 = vld [vmem:[%s3904_s29 + $0x228] sm:$0xff] }
 0x601   :  { %v1236_v52 = vadd.f32 %v1235_v51, %v1234_v50  ;;  %v2366_v50 = vld [vmem:[%s3904_s29 + $0x3e0] sm:$0xff]  ;;  %v2367_v51 = vld [vmem:[%s3904_s29 + $0x3e8] sm:$0xff] }
 0x602   :  { %1569 = vmatpush.msra.mxu1 %v2366_v50 }
 0x603   :  { %v1237_v53 = vrot.slane %v1236_v52, 1 }
 0x605   :  { %v1238_v54 = vadd.f32 %v1237_v53, %v1236_v52  ;;  %v2332_v52 = vld [vmem:[%s3904_s29 + $0x2d0] sm:$0xff]  ;;  %v2333_v53 = vld [vmem:[%s3904_s29 + $0x2d8] sm:$0xff] }
 0x606   :  { %1485 = vmatpush.msrb.mxu3 %v2332_v52  ;;  %1508 = vmatpush.msra.mxu0 %v2333_v53  ;;  %v2340_v52 = vld [vmem:[%s3904_s29 + $0x310] sm:$0xff]  ;;  %v2341_v53 = vld [vmem:[%s3904_s29 + $0x318] sm:$0xff] }
 0x607   :  { %1255 = vmatmul.f32.vlgmr.msra.gmra.mxu2 %v1238_v54  ;;  %v2364_v54 = vld [vmem:[%s3904_s29 + $0x3d0] sm:$0xff] }
 0x608   :  { %1591 = vmatpush.msra.mxu2 %v2369_v48  ;;  %1570 = vmatpush.msra.mxu1 %v2364_v54  ;;  %v2343_v48 = vld [vmem:[%s3904_s29 + $0x328] sm:$0xff] }
 0x609   :  { %1486 = vmatpush.msrb.mxu3 %v2330_v58  ;;  %1509 = vmatpush.msra.mxu0 %v2331_v59  ;;  %v2307_v54 = vld [vmem:[%s3904_s29 + $0x208] sm:$0xff] }
 0x60a   :  { %1592 = vmatpush.msra.mxu2 %v2367_v51  ;;  %1571 = vmatpush.msra.mxu1 %v2362_v60  ;;  %v2450_v51 = vld [vmem:[%s3883_s18] ss:$0 sm:$0xff] }
 0x60b   :  { %1487 = vmatpush.msrb.mxu3 %v2328_v62  ;;  %1510 = vmatpush.msra.mxu0 %v2329_v63 }
 0x60c   :  { %1593 = vmatpush.msra.mxu2 %v2365_v56  ;;  %1572 = vmatpush.msra.mxu1 %v2360_v0  ;;  %v2338_v56 = vld [vmem:[%s3904_s29 + $0x300] sm:$0xff] }
 0x60d   :  { %1488 = vmatpush.msrb.mxu3 %v2326_v2  ;;  %1511 = vmatpush.msra.mxu0 %v2327_v3  ;;  %v1534_v3 = vld [vmem:[#allocation4 + $0xb] sm:$0x1] }
 0x60e   :  { %1594 = vmatpush.msra.mxu2 %v2363_v61  ;;  %1573 = vmatpush.msra.mxu1 %v2358_v4 }
 0x60f   :  { %1489 = vmatpush.msrb.mxu3 %v2324_v6  ;;  %1512 = vmatpush.msra.mxu0 %v2325_v7 }
 0x610   :  { %1595 = vmatpush.msra.mxu2 %v2361_v1  ;;  %1574 = vmatpush.msra.mxu1 %v2356_v8 }
 0x611   :  { %1490 = vmatpush.msrb.mxu3 %v2322_v12  ;;  %1513 = vmatpush.msra.mxu0 %v2323_v13 }
 0x612   :  { %1596 = vmatpush.msra.mxu2 %v2359_v5  ;;  %1575 = vmatpush.msra.mxu1 %v2354_v15  ;;  %v3470_v15 = vld [vmem:[#allocation20 + $0xf8] sm:$0xff] }
 0x613   :  { %1491 = vmatpush.msrb.mxu3 %v2320_v18  ;;  %1514 = vmatpush.msra.mxu0 %v2321_v19  ;;  %v3476_v18 = vld [vmem:[#allocation20 + $0xe8] sm:$0xff] }
 0x614   :  { %1597 = vmatpush.msra.mxu2 %v2357_v11  ;;  %1576 = vmatpush.msra.mxu1 %v2352_v21 }
 0x615   :  { %1492 = vmatpush.msrb.mxu3 %v2318_v23  ;;  %1515 = vmatpush.msra.mxu0 %v2319_v24 }
 0x616   :  { %1598 = vmatpush.msra.mxu2 %v2355_v16  ;;  %1577 = vmatpush.msra.mxu1 %v2350_v25  ;;  %v3472_v16 = vld [vmem:[#allocation20 + $0xe0] sm:$0xff] }
 0x617   :  { %1493 = vmatpush.msrb.mxu3 %v2316_v28  ;;  %1516 = vmatpush.msra.mxu0 %v2317_v29 }
 0x618   :  { %1599 = vmatpush.msra.mxu2 %v2353_v22  ;;  %1578 = vmatpush.msra.mxu1 %v2348_v30 }
 0x619   :  { %1494 = vmatpush.msrb.mxu3 %v2314_v33  ;;  %1517 = vmatpush.msra.mxu0 %v2315_v34 }
 0x61a   :  { %1600 = vmatpush.msra.mxu2 %v2351_v26  ;;  %1579 = vmatpush.msra.mxu1 %v2346_v35 }
 0x61b   :  { %1495 = vmatpush.msrb.mxu3 %v2312_v41  ;;  %1518 = vmatpush.msra.mxu0 %v2313_v36 }
 0x61c   :  { %1601 = vmatpush.msra.mxu2 %v2349_v31  ;;  %1580 = vmatpush.msra.mxu1 %v2344_v37  ;;  %v3482_v37 = vld [vmem:[#allocation20 + $0xd0] sm:$0xff] }
 0x61d   :  { %1496 = vmatpush.msrb.mxu3 %v2310_v38  ;;  %1519 = vmatpush.msra.mxu0 %v2311_v46  ;;  %v3490_v38 = vld [vmem:[#allocation20 + $0xc8] sm:$0xff]  ;;  %v3494_v46 = vld [vmem:[#allocation20 + $0xb0] sm:$0xff] }
 0x61e   :  { %1602 = vmatpush.msra.mxu2 %v2347_v44  ;;  %1581 = vmatpush.msra.mxu1 %v2342_v10  ;;  %v1618_v44 = vld [vmem:[#allocation14] sm:$0x3f]  ;;  %v3502_v10 = vld [vmem:[#allocation20 + $0xa8] sm:$0xff] }
 0x61f   :  { %1497 = vmatpush.msrb.mxu3 %v2308_v39  ;;  %1520 = vmatpush.msra.mxu0 %v2309_v49  ;;  %v3508_v39 = vld [vmem:[#allocation20 + $0x98] sm:$0xff]  ;;  %v3512_v49 = vld [vmem:[#allocation20 + $0x80] sm:$0xff] }
 0x620   :  { %1603 = vmatpush.msra.mxu2 %v2345_v45  ;;  %1582 = vmatpush.msra.mxu1 %v2340_v52  ;;  %v3488_v45 = vld [vmem:[#allocation20 + $0xc0] sm:$0xff]  ;;  %v3520_v52 = vld [vmem:[#allocation20 + $0x78] sm:$0xff] }
 0x621   :  { %1521 = vmatpush.msra.mxu0 %v2307_v54  ;;  %v3530_v54 = vld [vmem:[#allocation20 + $0x50] sm:$0xff] }
 0x622   :  { %1604 = vmatpush.msra.mxu2 %v2343_v48  ;;  %1583 = vmatpush.msra.mxu1 %v2338_v56  ;;  %v3506_v48 = vld [vmem:[#allocation20 + $0x90] sm:$0xff]  ;;  %v3536_v56 = vld [vmem:[#allocation20 + $0x40] sm:$0xff] }
 0x624   :  { %1605 = vmatpush.msra.mxu2 %v2341_v53  ;;  %v3524_v53 = vld [vmem:[#allocation20 + $0x60] sm:$0xff] }
 0x68a   :  { %v1256_v55 = vpop.f32.mrf.mxu2 }
 0x68b   :  { %v3299_v57 = vadd.f32 1e-05, %v1256_v55 }
 0x68d   :  { %2454 = vrsqrt.f32 %v3299_v57  ;;  %vm1265_vm8 = vweird.f32 %v3299_v57 }
 0x693   :  { %v2455_v14 = vpop.eup %2454 }
 0x694   :  { %v1260_v17 = vmul.f32 %v2455_v14, %v3299_v57  ;;  %vm1266_vm7 = vweird.f32 %v2455_v14  ;;  %v2339_v57 = vld [vmem:[%s3904_s29 + $0x308] sm:$0xff] }
 0x695   :  { %vm1267_vm9 = vmor %vm1265_vm8, %vm1266_vm7  ;;  %1606 = vmatpush.msra.mxu2 %v2339_v57  ;;  %v3538_v57 = vld [vmem:[#allocation20 + $0x48] sm:$0xff]  ;;  %vm1986_vm7 = vcmask 516096   ;;  %vm2047_vm8 = vcmask 1046528  }
 0x696   :  { %v1261_v20 = vmul.f32 %v2455_v14, %v1260_v17 }
 0x698   :  { %v1262_v27 = vmul.f32 0.5, %v1261_v20 }
 0x69a   :  { %v1263_v32 = vsub.f32 1.5, %v1262_v27 }
 0x69c   :  { %v1264_v40 = vmul.f32 %v2455_v14, %v1263_v32 }
 0x69e   :  { %v1268_v42 = vsel %vm1267_vm9, %v2455_v14, %v1264_v40  ;;  %v3468_v14 = vld [vmem:[#allocation20 + $0xf0] sm:$0xff]  ;;  %vm2228_vm9 = vcmask 64512  }
 0x69f   :  { %v1269_v47 = vperm.slane %v1268_v42, 0  ;;  %v3484_v42 = vld [vmem:[#allocation20 + $0xd8] sm:$0xff] }
 0x6a1   :  { %v1270_v50 = vmul.f32 %v1269_v47, %v3103_v43  ;;  %v2306_v43 = vld [vmem:[%s3904_s29 + $0x200] sm:$0xff]  ;;  %v3496_v47 = vld [vmem:[#allocation20 + $0xb8] sm:$0xff] }
 0x6a2   :  { %1498 = vmatpush.msrb.mxu3 %v2306_v43  ;;  %v3526_v43 = vld [vmem:[#allocation20 + $0x68] sm:$0xff] }
 0x6a3   :  { %v1275_v55 = vmul.f32 %v2449_v9, %v1270_v50  ;;  %v3500_v9 = vld [vmem:[#allocation20 + $0xa0] sm:$0xff]  ;;  %v3514_v50 = vld [vmem:[#allocation20 + $0x88] sm:$0xff] }
 0x6a5   :  { %v1280_v58 = vadd.f32 %v2450_v51, %v1275_v55  ;;  %v3518_v51 = vld [vmem:[#allocation20 + $0x70] sm:$0xff]  ;;  %v3532_v55 = vld [vmem:[#allocation20 + $0x58] sm:$0xff] }
 0x6a7   :  { %v1281_v59 = vmul.f32 0.2, %v1280_v58 }
 0x6a9   :  { %v1282_v60 = vmax.f32 %v1280_v58, %v1281_v59  ;;  %v1715_v58 = vld [vmem:[#allocation20 + $0x170] sm:$0xff]  ;;  %v1716_v59 = vld [vmem:[#allocation20 + $0x178] sm:$0xff] }
 0x6ab   :  { %1285 = vst [vmem:[#allocation4 + $0x1] sm:$0xf] %v1282_v60 }
 0x6ac   :  { %1286 = vst [vmem:[#allocation4 + $0x3] sm:$0xf0] %v1282_v60  ;;  %v3542_v60 = vld [vmem:[#allocation20 + $0x30] sm:$0xff] }
 0x6b3   :  { %v1321_v61 = vld [vmem:[#allocation4 + $0x1] sm:$0xff]  ;;  %v1322_v63 = vld [vmem:[#allocation4 + $0x9] sm:$0x1]  ;;  %v1449_v4 = vld [vmem:[#allocation4 + $0xa] sm:$0x1] }
 0x6b4   :  { %v1287_v62 = vld [vmem:[#allocation4] sm:$0xff]  ;;  %1372 = vmatmul.f32.vlgmr.msra.gmra.mxu3 %v1321_v61  ;;  %1395 = vmatmul.f32.vlgmr.msrb.gmra.mxu0 %v1321_v61  ;;  %v1288_v0 = vld [vmem:[#allocation4 + $0x8] sm:$0x1]  ;;  %v3544_v61 = vld [vmem:[#allocation20 + $0x38] sm:$0xff] }
 0x6b5   :  { %1418 = vmatmul.f32.vlgmr.msrb.gmra.mxu1 %v1287_v62  ;;  %1441 = vmatmul.f32.vlgmr.msrb.gmra.mxu2 %v1287_v62  ;;  %v1448_v1 = vld [vmem:[#allocation4 + $0x2] sm:$0xff]  ;;  %v1713_v62 = vld [vmem:[#allocation20 + $0x160] sm:$0xff] }
 0x6b6   :  { %v1533_v2 = vld [vmem:[#allocation4 + $0x3] sm:$0xff]  ;;  %1737 = vmatpush.msrb.mxu0 %v3468_v14  ;;  %1777 = vmatpush.msrb.mxu1 %v3470_v15 }
 0x6b7   :  { %1805 = vmatpush.msrb.mxu2 %v1716_v59 }
 0x6b8   :  { %1738 = vmatpush.msrb.mxu0 %v3472_v16  ;;  %1778 = vmatpush.msrb.mxu1 %v3476_v18 }
 0x6ba   :  { %1739 = vmatpush.msrb.mxu0 %v3482_v37  ;;  %1779 = vmatpush.msrb.mxu1 %v3484_v42 }
 0x6bc   :  { %1375 = vmatmul.f32.gmra.mxu3 %v1322_v63  ;;  %1398 = vmatmul.f32.gmra.mxu0 %v1322_v63  ;;  %v1714_v63 = vld [vmem:[#allocation20 + $0x168] sm:$0xff] }
 0x6bd   :  { %1421 = vmatmul.f32.gmra.mxu1 %v1288_v0  ;;  %1444 = vmatmul.f32.gmra.mxu2 %v1288_v0  ;;  %v3548_v0 = vld [vmem:[#allocation20 + $0x20] sm:$0xff] }
 0x6be   :  { %1740 = vmatpush.msrb.mxu0 %v3488_v45  ;;  %1780 = vmatpush.msrb.mxu1 %v3490_v38 }
 0x6bf   :  { %1806 = vmatpush.msrb.mxu2 %v1714_v63 }
 0x6c0   :  { %1741 = vmatpush.msrb.mxu0 %v3494_v46  ;;  %1781 = vmatpush.msrb.mxu1 %v3496_v47 }
 0x6c2   :  { %1742 = vmatpush.msrb.mxu0 %v3500_v9  ;;  %1782 = vmatpush.msrb.mxu1 %v3502_v10 }
 0x6c4   :  { %1499 = vmatmul.f32.vlgmr.msrb.gmra.mxu3 %v1448_v1  ;;  %1522 = vmatmul.f32.vlgmr.msra.gmra.mxu0 %v1448_v1  ;;  %v3550_v1 = vld [vmem:[#allocation20 + $0x28] sm:$0xff] }
 0x6c5   :  { %1584 = vmatmul.f32.vlgmr.msra.gmra.mxu1 %v1533_v2  ;;  %1607 = vmatmul.f32.vlgmr.msra.gmra.mxu2 %v1533_v2  ;;  %v1711_v2 = vld [vmem:[#allocation20 + $0x150] sm:$0xff] }
 0x6c6   :  { %1743 = vmatpush.msrb.mxu0 %v3506_v48  ;;  %1783 = vmatpush.msrb.mxu1 %v3508_v39 }
 0x6c8   :  { %1744 = vmatpush.msrb.mxu0 %v3512_v49  ;;  %1784 = vmatpush.msrb.mxu1 %v3514_v50 }
 0x6ca   :  { %1745 = vmatpush.msrb.mxu0 %v3518_v51  ;;  %1785 = vmatpush.msrb.mxu1 %v3520_v52 }
 0x6cc   :  { %1502 = vmatmul.f32.gmra.mxu3 %v1449_v4  ;;  %1525 = vmatmul.f32.gmra.mxu0 %v1449_v4  ;;  %v3554_v4 = vld [vmem:[#allocation20 + $0x10] sm:$0xff] }
 0x6cd   :  { %1610 = vmatmul.f32.gmra.mxu2 %v1534_v3  ;;  %1587 = vmatmul.f32.gmra.mxu1 %v1534_v3  ;;  %v1712_v3 = vld [vmem:[#allocation20 + $0x158] sm:$0xff] }
 0x6ce   :  { %1746 = vmatpush.msrb.mxu0 %v3524_v53  ;;  %1786 = vmatpush.msrb.mxu1 %v3526_v43 }
 0x6cf   :  { %1807 = vmatpush.msrb.mxu2 %v1712_v3 }
 0x6d0   :  { %1747 = vmatpush.msrb.mxu0 %v3530_v54  ;;  %1787 = vmatpush.msrb.mxu1 %v3532_v55 }
 0x6d2   :  { %1748 = vmatpush.msrb.mxu0 %v3536_v56  ;;  %1788 = vmatpush.msrb.mxu1 %v3538_v57 }
 0x6d4   :  { %1749 = vmatpush.msrb.mxu0 %v3542_v60  ;;  %1789 = vmatpush.msrb.mxu1 %v3544_v61 }
 0x6d6   :  { %1750 = vmatpush.msrb.mxu0 %v3548_v0  ;;  %1790 = vmatpush.msrb.mxu1 %v3550_v1 }
 0x6d8   :  { %1751 = vmatpush.msrb.mxu0 %v3554_v4 }
 0x731   :  { %v1396_v5 = vpop.f32.mrf.mxu0 }
 0x732   :  { %v1419_v6 = vpop.f32.mrf.mxu1 }
 0x737   :  { %v1373_v7 = vpop.f32.mrf.mxu3 }
 0x738   :  { %v1442_v8 = vpop.f32.mrf.mxu2  ;;  %v1420_v23 = vadd.f32 %v1419_v6, %v1373_v7  ;;  %v1709_v6 = vld [vmem:[#allocation20 + $0x140] sm:$0xff]  ;;  %v1710_v7 = vld [vmem:[#allocation20 + $0x148] sm:$0xff] }
 0x739   :  { %v1399_v11 = vpop.f32.mrf.mxu0  ;;  %v1443_v33 = vadd.f32 %v1442_v8, %v1396_v5  ;;  %v3556_v5 = vld [vmem:[#allocation20 + $0x18] sm:$0xff]  ;;  %v3560_v8 = vld [vmem:[#allocation20] sm:$0xff]  ;;  %1808 = vmatpush.msrb.mxu2 %v1710_v7 }
 0x73a   :  { %v1422_v12 = vpop.f32.mrf.mxu1  ;;  %1791 = vmatpush.msrb.mxu1 %v3556_v5  ;;  %1752 = vmatpush.msrb.mxu0 %v3560_v8 }
 0x73c   :  { %1880 = vmatpush.msra.mxu0 %v3470_v15 }
 0x73e   :  { %1881 = vmatpush.msra.mxu0 %v3476_v18 }
 0x73f   :  { %v1376_v13 = vpop.f32.mrf.mxu3 }
 0x740   :  { %v1445_v17 = vpop.f32.mrf.mxu2  ;;  %v1423_v24 = vadd.f32 %v1422_v12, %v1376_v13  ;;  %v1707_v12 = vld [vmem:[#allocation20 + $0x130] sm:$0xff]  ;;  %v1708_v13 = vld [vmem:[#allocation20 + $0x138] sm:$0xff]  ;;  %1882 = vmatpush.msra.mxu0 %v3484_v42 }
 0x741   :  { %v1523_v19 = vpop.f32.mrf.mxu0  ;;  %v1446_v30 = vadd.f32 %v1445_v17, %v1399_v11  ;;  %v3562_v11 = vld [vmem:[#allocation20 + $0x8] sm:$0xff]  ;;  %1809 = vmatpush.msrb.mxu2 %v1708_v13  ;;  %v1705_v17 = vld [vmem:[#allocation20 + $0x120] sm:$0xff] }
 0x742   :  { %v1585_v20 = vpop.f32.mrf.mxu1  ;;  %v1530_v40 = vadd.f32 %v1523_v19, %v1443_v33  ;;  %1792 = vmatpush.msrb.mxu1 %v3562_v11  ;;  %v1706_v19 = vld [vmem:[#allocation20 + $0x128] sm:$0xff]  ;;  %1883 = vmatpush.msra.mxu0 %v3490_v38 }
 0x743   :  { %1810 = vmatpush.msrb.mxu2 %v1706_v19 }
 0x744   :  { %1908 = vmatpush.msra.mxu1 %v1716_v59  ;;  %1884 = vmatpush.msra.mxu0 %v3496_v47 }
 0x746   :  { %1909 = vmatpush.msra.mxu1 %v1714_v63  ;;  %1885 = vmatpush.msra.mxu0 %v3502_v10  ;;  %v2399_v63 = vld [vmem:[%s3905_s23 + $0x168] sm:$0xff] }
 0x747   :  { %v1500_v21 = vpop.f32.mrf.mxu3 }
 0x748   :  { %v1608_v22 = vpop.f32.mrf.mxu2  ;;  %v1529_v27 = vadd.f32 %v1500_v21, %v1420_v23  ;;  %v1704_v21 = vld [vmem:[#allocation20 + $0x118] sm:$0xff]  ;;  %v1702_v23 = vld [vmem:[#allocation20 + $0x108] sm:$0xff]  ;;  %1910 = vmatpush.msra.mxu1 %v1712_v3  ;;  %1886 = vmatpush.msra.mxu0 %v3508_v39  ;;  %v2397_v3 = vld [vmem:[%s3905_s23 + $0x158] sm:$0xff] }
 0x749   :  { %v1526_v29 = vpop.f32.mrf.mxu0  ;;  %v1615_v36 = vadd.f32 %v1608_v22, %v1530_v40  ;;  %v1701_v22 = vld [vmem:[#allocation20 + $0x100] sm:$0xff]  ;;  %1811 = vmatpush.msrb.mxu2 %v1704_v21 }
 0x74a   :  { %v1588_v26 = vpop.f32.mrf.mxu1  ;;  %v1614_v34 = vadd.f32 %v1585_v20, %v1529_v27  ;;  %v1532_v35 = vadd.f32 %v1526_v29, %v1446_v30  ;;  %v1703_v20 = vld [vmem:[#allocation20 + $0x110] sm:$0xff]  ;;  %1911 = vmatpush.msra.mxu1 %v1710_v7  ;;  %1887 = vmatpush.msra.mxu0 %v3514_v50  ;;  %v2390_v7 = vld [vmem:[%s3905_s23 + $0x120] sm:$0xff] }
 0x74b   :  { %1812 = vmatpush.msrb.mxu2 %v1702_v23 }
 0x74c   :  { %1912 = vmatpush.msra.mxu1 %v1708_v13  ;;  %1888 = vmatpush.msra.mxu0 %v3520_v52  ;;  %v2394_v13 = vld [vmem:[%s3905_s23 + $0x140] sm:$0xff] }
 0x74d   :  { %1868 = vmatpush.msra.mxu2 %v1715_v58 }
 0x74e   :  { %1913 = vmatpush.msra.mxu1 %v1706_v19  ;;  %1889 = vmatpush.msra.mxu0 %v3526_v43  ;;  %v2419_v19 = vld [vmem:[%s3905_s23 + $0x1f8] sm:$0xff] }
 0x74f   :  { %v1503_v25 = vpop.f32.mrf.mxu3  ;;  %1869 = vmatpush.msra.mxu2 %v1713_v62 }
 0x750   :  { %v1531_v28 = vadd.f32 %v1503_v25, %v1423_v24  ;;  %v1611_v32 = vpop.f32.mrf.mxu2  ;;  %v3568_v24 = vld [vmem:[#allocation5] sm:$0xff]  ;;  %1914 = vmatpush.msra.mxu1 %v1704_v21  ;;  %1890 = vmatpush.msra.mxu0 %v3532_v55  ;;  %v2002_v21 = vld [vmem:[%s3905_s23 + $0x60] sm:$0xff] }
 0x751   :  { %v1617_v41 = vadd.f32 %v1611_v32, %v1532_v35  ;;  %1965 = vst.msk [vmem:[#allocation5 + $0x8] sm:$0xff] %vm1733_vm11, %v3568_v24  ;;  %1870 = vmatpush.msra.mxu2 %v1711_v2 }
 0x752   :  { %v1616_v31 = vadd.f32 %v1588_v26, %v1531_v28  ;;  %1915 = vmatpush.msra.mxu1 %v1702_v23  ;;  %1891 = vmatpush.msra.mxu0 %v3538_v57  ;;  %v2387_v23 = vld [vmem:[%s3905_s23 + $0x108] sm:$0xff]  ;;  %1968 = vst.msk [vmem:[#allocation5 + $0x18] sm:$0x3] %vm1967_vm14, %v3568_v24  ;;  %v1998_v24 = vld [vmem:[%s3905_s23 + $0x40] sm:$0xff] }
 0x753   :  { %1871 = vmatpush.msra.mxu2 %v1709_v6 }
 0x754   :  { %2370 = vmatpush.msk.msra.mxu3 %vm552_vm0, %v1616_v31  ;;  %1892 = vmatpush.msra.mxu0 %v3544_v61  ;;  %v2401_v61 = vld [vmem:[%s3905_s23 + $0x178] sm:$0xff] }
 0x755   :  { %1872 = vmatpush.msra.mxu2 %v1707_v12 }
 0x756   :  { %1644 = vmatpush.msra.mxu3 %v1614_v34  ;;  %1893 = vmatpush.msra.mxu0 %v3550_v1  ;;  %v2398_v1 = vld [vmem:[%s3905_s23 + $0x160] sm:$0xff] }
 0x757   :  { %2371 = vmatmul.msk.f32.vlgmr.msra.gmra.mxu3 %vm1619_vm10, %v1618_v44  ;;  %1873 = vmatpush.msra.mxu2 %v1705_v17 }
 0x758   :  { %2372 = vmatpush.msk.msrb.mxu3 %vm552_vm0, %v1617_v41  ;;  %1894 = vmatpush.msra.mxu0 %v3556_v5  ;;  %v2396_v5 = vld [vmem:[%s3905_s23 + $0x150] sm:$0xff] }
 0x759   :  { %1874 = vmatpush.msra.mxu2 %v1703_v20 }
 0x75a   :  { %1664 = vmatpush.msrb.mxu3 %v1615_v36  ;;  %1895 = vmatpush.msra.mxu0 %v3562_v11  ;;  %v2004_v11 = vld [vmem:[%s3905_s23 + $0x70] sm:$0xff] }
 0x75b   :  { %1875 = vmatpush.msra.mxu2 %v1701_v22 }
 0x75c   :  { %1765 = vmatpush.msra.mxu3 %v1715_v58 }
 0x75e   :  { %1766 = vmatpush.msra.mxu3 %v1713_v62  ;;  %v2400_v62 = vld [vmem:[%s3905_s23 + $0x170] sm:$0xff] }
 0x75f   :  { %2373 = vmatmul.msk.f32.vlgmr.msrb.gmra.mxu3 %vm1619_vm10, %v1618_v44  ;;  %vm2252_vm10 = vcmask 21504  }
 0x760   :  { %1767 = vmatpush.msra.mxu3 %v1711_v2  ;;  %v2392_v2 = vld [vmem:[%s3905_s23 + $0x130] sm:$0xff] }
 0x762   :  { %1768 = vmatpush.msra.mxu3 %v1709_v6  ;;  %v2005_v6 = vld [vmem:[%s3905_s23 + $0x78] sm:$0xff] }
 0x764   :  { %1769 = vmatpush.msra.mxu3 %v1707_v12  ;;  %v2389_v12 = vld [vmem:[%s3905_s23 + $0x118] sm:$0xff] }
 0x766   :  { %1770 = vmatpush.msra.mxu3 %v1705_v17  ;;  %v2003_v17 = vld [vmem:[%s3905_s23 + $0x68] sm:$0xff] }
 0x768   :  { %1771 = vmatpush.msra.mxu3 %v1703_v20  ;;  %v2388_v20 = vld [vmem:[%s3905_s23 + $0x110] sm:$0xff] }
 0x76a   :  { %1772 = vmatpush.msra.mxu3 %v1701_v22  ;;  %v2418_v22 = vld [vmem:[%s3905_s23 + $0x1f0] sm:$0xff] }
 0x76c   :  { %1840 = vmatpush.msrb.mxu3 %v3468_v14 }
 0x76e   :  { %1841 = vmatpush.msrb.mxu3 %v3472_v16 }
 0x770   :  { %1842 = vmatpush.msrb.mxu3 %v3482_v37 }
 0x772   :  { %1843 = vmatpush.msrb.mxu3 %v3488_v45 }
 0x774   :  { %1844 = vmatpush.msrb.mxu3 %v3494_v46 }
 0x776   :  { %1845 = vmatpush.msrb.mxu3 %v3500_v9 }
 0x778   :  { %1846 = vmatpush.msrb.mxu3 %v3506_v48 }
 0x77a   :  { %1847 = vmatpush.msrb.mxu3 %v3512_v49 }
 0x77c   :  { %1848 = vmatpush.msrb.mxu3 %v3518_v51 }
 0x77e   :  { %1849 = vmatpush.msrb.mxu3 %v3524_v53 }
 0x780   :  { %1850 = vmatpush.msrb.mxu3 %v3530_v54 }
 0x782   :  { %1851 = vmatpush.msrb.mxu3 %v3536_v56 }
 0x784   :  { %1852 = vmatpush.msrb.mxu3 %v3542_v60 }
 0x786   :  { %1853 = vmatpush.msrb.mxu3 %v3548_v0  ;;  %v2393_v0 = vld [vmem:[%s3905_s23 + $0x138] sm:$0xff] }
 0x788   :  { %1854 = vmatpush.msrb.mxu3 %v3554_v4  ;;  %v2391_v4 = vld [vmem:[%s3905_s23 + $0x128] sm:$0xff] }
 0x78a   :  { %1855 = vmatpush.msrb.mxu3 %v3560_v8  ;;  %v2395_v8 = vld [vmem:[%s3905_s23 + $0x148] sm:$0xff] }
 0x7da   :  { %v1646_v14 = vpop.f32.mrf.mxu3 }
 0x7db   :  { %v1718_v15 = vsel %vm1717_vm12, %v1646_v14, 0.0 }
 0x7dc   :  { %v1719_v16 = vrot.slane %v1718_v15, 4 }
 0x7de   :  { %v1720_v18 = vadd.f32 %v1719_v16, %v1718_v15  ;;  %v2417_v15 = vld [vmem:[%s3905_s23 + $0x1e8] sm:$0xff]  ;;  %v2386_v16 = vld [vmem:[%s3905_s23 + $0x100] sm:$0xff] }
 0x7e0   :  { %v1721_v25 = vrot.slane %v1720_v18, 2 }
 0x7e2   :  { %v1722_v26 = vadd.f32 %v1721_v25, %v1720_v18  ;;  %v1666_v27 = vpop.f32.mrf.mxu3  ;;  %v2000_v18 = vld [vmem:[%s3905_s23 + $0x50] sm:$0xff]  ;;  %v2013_v25 = vld [vmem:[%s3905_s23 + $0xb8] sm:$0xff] }
 0x7e3   :  { %v1726_v28 = vsel %vm1725_vm13, %v1666_v27, 0.0 }
 0x7e4   :  { %v1723_v29 = vrot.slane %v1722_v26, 1  ;;  %v1727_v30 = vrot.slane %v1726_v28, 4 }
 0x7e6   :  { %v1724_v31 = vadd.f32 %v1723_v29, %v1722_v26  ;;  %v1728_v32 = vadd.f32 %v1727_v30, %v1726_v28  ;;  %v2385_v29 = vld [vmem:[%s3905_s23 + $0xf8] sm:$0xff]  ;;  %v1999_v30 = vld [vmem:[%s3905_s23 + $0x48] sm:$0xff] }
 0x7e8   :  { %v1729_v33 = vrot.slane %v1728_v32, 2  ;;  %1753 = vmatmul.f32.vlgmr.msrb.gmra.mxu0 %v1724_v31  ;;  %1793 = vmatmul.f32.vlgmr.msrb.gmra.mxu1 %v1724_v31 }
 0x7e9   :  { %2100 = vmatpush.msrb.mxu1 %v2005_v6  ;;  %2128 = vmatpush.msrb.mxu0 %v2013_v25  ;;  %v1952_v25 = vld [vmem:[%s3885_s20] sm:$0x3] }
 0x7ea   :  { %v1730_v34 = vadd.f32 %v1729_v33, %v1728_v32  ;;  %v2012_v32 = vld [vmem:[%s3905_s23 + $0xb0] sm:$0xff]  ;;  %v2415_v33 = vld [vmem:[%s3905_s23 + $0x1d8] sm:$0xff] }
 0x7eb   :  { %2101 = vmatpush.msrb.mxu1 %v2004_v11  ;;  %2129 = vmatpush.msrb.mxu0 %v2012_v32  ;;  %v1955_v32 = vperm.slane %v1952_v25, 1 }
 0x7ec   :  { %v1731_v35 = vrot.slane %v1730_v34, 1 }
 0x7ed   :  { %2102 = vmatpush.msrb.mxu1 %v2003_v17 }
 0x7ee   :  { %v1732_v44 = vadd.f32 %v1731_v35, %v1730_v34  ;;  %v2384_v35 = vld [vmem:[%s3905_s23 + $0xf0] sm:$0xff] }
 0x7ef   :  { %2103 = vmatpush.msrb.mxu1 %v2002_v21  ;;  %v2425_v21 = vld [vmem:[%s3905_s23 + $0x228] sm:$0xff] }
 0x7f0   :  { %2374 = vmatmul.msk.f32.vlgmr.msra.gmra.mxu3 %vm1733_vm11, %v1732_v44  ;;  %2375 = vmatmul.msk.f32.vlgmr.msrb.gmra.mxu2 %vm1733_vm11, %v1732_v44  ;;  %v2011_v44 = vld [vmem:[%s3905_s23 + $0xa8] sm:$0xff] }
 0x7f1   :  { %2085 = vmatpush.msra.mxu3 %v2401_v61  ;;  %2057 = vmatpush.msrb.mxu2 %v2393_v0  ;;  %v1993_v61 = vld [vmem:[%s3905_s23 + $0x18] sm:$0xff]  ;;  %v2409_v0 = vld [vmem:[%s3905_s23 + $0x1a8] sm:$0xff] }
 0x7f2   :  { %2130 = vmatpush.msrb.mxu0 %v2011_v44 }
 0x7f3   :  { %2086 = vmatpush.msra.mxu3 %v2400_v62  ;;  %2058 = vmatpush.msrb.mxu2 %v2392_v2  ;;  %v2006_v62 = vld [vmem:[%s3905_s23 + $0x80] sm:$0xff]  ;;  %v1992_v2 = vld [vmem:[%s3905_s23 + $0x10] sm:$0xff] }
 0x7f5   :  { %2087 = vmatpush.msra.mxu3 %v2399_v63  ;;  %2059 = vmatpush.msrb.mxu2 %v2391_v4  ;;  %v2427_v4 = vld [vmem:[%s3905_s23 + $0x238] sm:$0xff] }
 0x7f7   :  { %2088 = vmatpush.msra.mxu3 %v2398_v1  ;;  %2060 = vmatpush.msrb.mxu2 %v2390_v7  ;;  %v2378_v1 = vld [vmem:[%s3905_s23 + $0xc0] sm:$0xff] }
 0x7f9   :  { %2089 = vmatpush.msra.mxu3 %v2397_v3  ;;  %2061 = vmatpush.msrb.mxu2 %v2389_v12  ;;  %v2408_v3 = vld [vmem:[%s3905_s23 + $0x1a0] sm:$0xff]  ;;  %v2407_v12 = vld [vmem:[%s3905_s23 + $0x198] sm:$0xff] }
 0x7fb   :  { %2090 = vmatpush.msra.mxu3 %v2396_v5  ;;  %2062 = vmatpush.msrb.mxu2 %v2388_v20  ;;  %v2406_v20 = vld [vmem:[%s3905_s23 + $0x190] sm:$0xff] }
 0x7fd   :  { %2091 = vmatpush.msra.mxu3 %v2395_v8  ;;  %2063 = vmatpush.msrb.mxu2 %v2387_v23  ;;  %v1991_v8 = vld [vmem:[%s3905_s23 + $0x8] sm:$0xff]  ;;  %v1944_v23 = vld [vmem:[%s3884_s19] sm:$0x3] }
 0x7ff   :  { %2092 = vmatpush.msra.mxu3 %v2394_v13  ;;  %2064 = vmatpush.msrb.mxu2 %v2386_v16  ;;  %v2426_v13 = vld [vmem:[%s3905_s23 + $0x230] sm:$0xff]  ;;  %v2405_v16 = vld [vmem:[%s3905_s23 + $0x188] sm:$0xff] }
 0x801   :  { %2065 = vmatpush.msrb.mxu2 %v2385_v29  ;;  %v2404_v29 = vld [vmem:[%s3905_s23 + $0x180] sm:$0xff] }
 0x803   :  { %2066 = vmatpush.msrb.mxu2 %v2384_v35  ;;  %v2421_v35 = vld [vmem:[%s3905_s23 + $0x208] sm:$0xff] }
 0x865   :  { %v1754_v40 = vpop.f32.mrf.mxu0  ;;  %v1794_v41 = vpop.f32.mrf.mxu1 }
 0x873   :  { %v1774_v36 = vpop.f32.mrf.mxu3  ;;  %v1814_v37 = vpop.f32.mrf.mxu2 }
 0x874   :  { %v1775_v42 = vadd.f32 %v1774_v36, %v1754_v40  ;;  %v1815_v45 = vadd.f32 %v1814_v37, %v1794_v41  ;;  %v2414_v40 = vld [vmem:[%s3905_s23 + $0x1d0] sm:$0xff]  ;;  %v2383_v36 = vld [vmem:[%s3905_s23 + $0xe8] sm:$0xff]  ;;  %v1997_v37 = vld [vmem:[%s3905_s23 + $0x38] sm:$0xff] }
 0x875   :  { %2067 = vmatpush.msrb.mxu2 %v2383_v36 }
 0x876   :  { %v1817_v38 = vperm.slane %v1775_v42, 0  ;;  %v1818_v46 = vperm.slane %v1815_v45, 0  ;;  %v2010_v42 = vld [vmem:[%s3905_s23 + $0xa0] sm:$0xff] }
 0x877   :  { %2131 = vmatpush.msrb.mxu0 %v2010_v42  ;;  %v1954_v42 = vperm.slane %v1952_v25, 0 }
 0x878   :  { %v3606_v47 = vsub.f32 %v1646_v14, %v1817_v38  ;;  %v3608_v9 = vsub.f32 %v1666_v27, %v1818_v46  ;;  %v2001_v14 = vld [vmem:[%s3905_s23 + $0x58] sm:$0xff]  ;;  %v2416_v27 = vld [vmem:[%s3905_s23 + $0x1e0] sm:$0xff]  ;;  %v2413_v38 = vld [vmem:[%s3905_s23 + $0x1c8] sm:$0xff] }
 0x879   :  { %2104 = vmatpush.msrb.mxu1 %v2001_v14  ;;  %v2424_v14 = vld [vmem:[%s3905_s23 + $0x220] sm:$0xff] }
 0x87a   :  { %v1821_v10 = vmul.f32 %v3606_v47, %v3606_v47  ;;  %v1822_v48 = vmul.f32 %v3608_v9, %v3608_v9 }
 0x87b   :  { %2105 = vmatpush.msrb.mxu1 %v2000_v18 }
 0x87c   :  { %v1823_v39 = vsel %vm1717_vm12, %v1821_v10, 0.0  ;;  %v1830_v49 = vsel %vm1725_vm13, %v1822_v48, 0.0  ;;  %v2382_v10 = vld [vmem:[%s3905_s23 + $0xe0] sm:$0xff]  ;;  %v1996_v48 = vld [vmem:[%s3905_s23 + $0x30] sm:$0xff] }
 0x87d   :  { %v1824_v50 = vrot.slane %v1823_v39, 4  ;;  %v1831_v51 = vrot.slane %v1830_v49, 4  ;;  %2106 = vmatpush.msrb.mxu1 %v1999_v30  ;;  %2068 = vmatpush.msrb.mxu2 %v2382_v10  ;;  %v2423_v30 = vld [vmem:[%s3905_s23 + $0x218] sm:$0xff] }
 0x87f   :  { %v1825_v52 = vadd.f32 %v1824_v50, %v1823_v39  ;;  %v1832_v53 = vadd.f32 %v1831_v51, %v1830_v49  ;;  %2107 = vmatpush.msrb.mxu1 %v1998_v24  ;;  %v2009_v39 = vld [vmem:[%s3905_s23 + $0x98] sm:$0xff]  ;;  %v2412_v50 = vld [vmem:[%s3905_s23 + $0x1c0] sm:$0xff] }
 0x880   :  { %2132 = vmatpush.msrb.mxu0 %v2009_v39  ;;  %v2381_v51 = vld [vmem:[%s3905_s23 + $0xd8] sm:$0xff] }
 0x881   :  { %v1826_v43 = vrot.slane %v1825_v52, 2  ;;  %v1833_v54 = vrot.slane %v1832_v53, 2  ;;  %2108 = vmatpush.msrb.mxu1 %v1997_v37  ;;  %2069 = vmatpush.msrb.mxu2 %v2381_v51 }
 0x883   :  { %v1827_v55 = vadd.f32 %v1826_v43, %v1825_v52  ;;  %v1834_v56 = vadd.f32 %v1833_v54, %v1832_v53  ;;  %2109 = vmatpush.msrb.mxu1 %v1996_v48  ;;  %v1995_v52 = vld [vmem:[%s3905_s23 + $0x28] sm:$0xff]  ;;  %v2008_v53 = vld [vmem:[%s3905_s23 + $0x90] sm:$0xff]  ;;  %v2411_v43 = vld [vmem:[%s3905_s23 + $0x1b8] sm:$0xff] }
 0x884   :  { %2133 = vmatpush.msrb.mxu0 %v2008_v53 }
 0x885   :  { %v1828_v57 = vrot.slane %v1827_v55, 1  ;;  %v1835_v58 = vrot.slane %v1834_v56, 1  ;;  %2110 = vmatpush.msrb.mxu1 %v1995_v52 }
 0x887   :  { %v1836_v59 = vadd.f32 %v1835_v58, %v1834_v56  ;;  %v1829_v60 = vadd.f32 %v1828_v57, %v1827_v55  ;;  %v2380_v55 = vld [vmem:[%s3905_s23 + $0xd0] sm:$0xff]  ;;  %v1994_v56 = vld [vmem:[%s3905_s23 + $0x20] sm:$0xff]  ;;  %v2007_v57 = vld [vmem:[%s3905_s23 + $0x88] sm:$0xff] }
 0x888   :  { %2070 = vmatpush.msrb.mxu2 %v2380_v55  ;;  %2111 = vmatpush.msrb.mxu1 %v1994_v56 }
 0x889   :  { %1856 = vmatmul.f32.vlgmr.msrb.gmra.mxu3 %v1829_v60  ;;  %2376 = vmatmul.msk.f32.vlgmr.msra.gmra.mxu2 %vm1733_vm11, %v1836_v59 }
 0x88a   :  { %1896 = vmatmul.f32.vlgmr.msra.gmra.mxu0 %v1829_v60  ;;  %2377 = vmatmul.msk.f32.vlgmr.msra.gmra.mxu1 %vm1733_vm11, %v1836_v59  ;;  %v2410_v59 = vld [vmem:[%s3905_s23 + $0x1b0] sm:$0xff]  ;;  %v2379_v60 = vld [vmem:[%s3905_s23 + $0xc8] sm:$0xff] }
 0x88b   :  { %2182 = vmatpush.msrb.mxu3 %v2419_v19  ;;  %2134 = vmatpush.msrb.mxu0 %v2007_v57  ;;  %v1990_v19 = vld [vmem:[%s3905_s23] sm:$0xff] }
 0x88c   :  { %2071 = vmatpush.msrb.mxu2 %v2379_v60  ;;  %2112 = vmatpush.msrb.mxu1 %v1993_v61 }
 0x88d   :  { %2183 = vmatpush.msrb.mxu3 %v2418_v22  ;;  %2135 = vmatpush.msrb.mxu0 %v2006_v62 }
 0x88e   :  { %2072 = vmatpush.msrb.mxu2 %v2378_v1  ;;  %2113 = vmatpush.msrb.mxu1 %v1992_v2 }
 0x88f   :  { %2184 = vmatpush.msrb.mxu3 %v2417_v15 }
 0x890   :  { %2210 = vmatpush.msra.mxu2 %v2427_v4  ;;  %2114 = vmatpush.msrb.mxu1 %v1991_v8 }
 0x891   :  { %2185 = vmatpush.msrb.mxu3 %v2416_v27  ;;  %v1947_v27 = vperm.slane %v1944_v23, 1 }
 0x892   :  { %2211 = vmatpush.msra.mxu2 %v2426_v13  ;;  %2115 = vmatpush.msrb.mxu1 %v1990_v19 }
 0x893   :  { %2186 = vmatpush.msrb.mxu3 %v2415_v33 }
 0x894   :  { %2212 = vmatpush.msra.mxu2 %v2425_v21 }
 0x895   :  { %2187 = vmatpush.msrb.mxu3 %v2414_v40 }
 0x896   :  { %2213 = vmatpush.msra.mxu2 %v2424_v14 }
 0x897   :  { %2188 = vmatpush.msrb.mxu3 %v2413_v38 }
 0x898   :  { %2214 = vmatpush.msra.mxu2 %v2423_v30 }
 0x899   :  { %2189 = vmatpush.msrb.mxu3 %v2412_v50 }
 0x89b   :  { %2190 = vmatpush.msrb.mxu3 %v2411_v43 }
 0x89d   :  { %2191 = vmatpush.msrb.mxu3 %v2410_v59 }
 0x89f   :  { %2192 = vmatpush.msrb.mxu3 %v2409_v0 }
 0x8a1   :  { %2193 = vmatpush.msrb.mxu3 %v2408_v3 }
 0x8a3   :  { %2194 = vmatpush.msrb.mxu3 %v2407_v12 }
 0x8a5   :  { %2195 = vmatpush.msrb.mxu3 %v2406_v20 }
 0x8a7   :  { %2196 = vmatpush.msrb.mxu3 %v2405_v16  ;;  %v2223_v16 = vld [vmem:[#allocation16] sm:$0x3f] }
 0x8a9   :  { %2197 = vmatpush.msrb.mxu3 %v2404_v29 }
 0x907   :  { %v1897_v26 = vpop.f32.mrf.mxu0  ;;  %v1917_v31 = vpop.f32.mrf.mxu1 }
 0x908   :  { %v1898_v28 = vadd.f32 1e-05, %v1897_v26 }
 0x90a   :  { %v3712_v34 = vadd.f32 %v1917_v31, %v1898_v28 }
 0x90c   :  { %2456 = vrsqrt.f32 %v3712_v34  ;;  %v1857_v41 = vpop.f32.mrf.mxu3  ;;  %v1877_v46 = vpop.f32.mrf.mxu2  ;;  %vm1936_vm0 = vweird.f32 %v3712_v34 }
 0x90d   :  { %v1858_v45 = vadd.f32 1e-05, %v1857_v41  ;;  %v2420_v41 = vld [vmem:[%s3905_s23 + $0x200] sm:$0xff] }
 0x90f   :  { %v3748_v49 = vadd.f32 %v1877_v46, %v1858_v45 }
 0x911   :  { %2458 = vrsqrt.f32 %v3748_v49  ;;  %vm1926_vm3 = vweird.f32 %v3748_v49 }
 0x912   :  { %v2457_v54 = vpop.eup %2456 }
 0x913   :  { %v1931_v58 = vmul.f32 %v2457_v54, %v3712_v34  ;;  %vm1937_vm15 = vweird.f32 %v2457_v54  ;;  %v2422_v34 = vld [vmem:[%s3905_s23 + $0x210] sm:$0xff] }
 0x914   :  { %vm1938_vm1 = vmor %vm1936_vm0, %vm1937_vm15  ;;  %2215 = vmatpush.msra.mxu2 %v2422_v34 }
 0x915   :  { %v1932_v63 = vmul.f32 %v2457_v54, %v1931_v58 }
 0x916   :  { %2216 = vmatpush.msra.mxu2 %v2421_v35 }
 0x917   :  { %v2459_v5 = vpop.eup %2458  ;;  %v1933_v6 = vmul.f32 0.5, %v1932_v63 }
 0x918   :  { %v1921_v7 = vmul.f32 %v2459_v5, %v3748_v49  ;;  %vm1927_vm2 = vweird.f32 %v2459_v5  ;;  %2217 = vmatpush.msra.mxu2 %v2420_v41 }
 0x919   :  { %v1934_v11 = vsub.f32 1.5, %v1933_v6  ;;  %vm1928_vm4 = vmor %vm1926_vm3, %vm1927_vm2 }
 0x91a   :  { %v1922_v17 = vmul.f32 %v2459_v5, %v1921_v7 }
 0x91b   :  { %v1935_v22 = vmul.f32 %v2457_v54, %v1934_v11 }
 0x91c   :  { %v1923_v15 = vmul.f32 0.5, %v1922_v17 }
 0x91d   :  { %v1939_v18 = vsel %vm1938_vm1, %v2457_v54, %v1935_v22 }
 0x91e   :  { %v1941_v26 = vperm.slane %v1939_v18, 0  ;;  %v1924_v28 = vsub.f32 1.5, %v1923_v15  ;;  %v2451_v18 = vld [vmem:[%s3886_s21] ss:$0 sm:$0xff] }
 0x920   :  { %v1943_v31 = vmul.f32 %v1941_v26, %v3608_v9  ;;  %v1925_v33 = vmul.f32 %v2459_v5, %v1924_v28  ;;  %v1946_v9 = vperm.slane %v1944_v23, 0 }
 0x922   :  { %v1951_v24 = vmul.f32 %v1947_v27, %v1943_v31  ;;  %v1929_v44 = vsel %vm1928_vm4, %v2459_v5, %v1925_v33 }
 0x923   :  { %v1940_v40 = vperm.slane %v1929_v44, 0 }
 0x924   :  { %v1959_v36 = vadd.f32 %v1955_v32, %v1951_v24 }
 0x925   :  { %v1942_v37 = vmul.f32 %v1940_v40, %v3606_v47 }
 0x926   :  { %v1961_v45 = vmul.f32 0.2, %v1959_v36 }
 0x927   :  { %v1950_v38 = vmul.f32 %v1946_v9, %v1942_v37 }
 0x928   :  { %v1963_v46 = vmax.f32 %v1959_v36, %v1961_v45 }
 0x929   :  { %v1958_v10 = vadd.f32 %v1954_v42, %v1950_v38 }
 0x92a   :  { %v1972_v48 = vrot.slane %v1963_v46, 7  ;;  %v1979_v39 = vrot.slane %v1963_v46, 5 }
 0x92b   :  { %v1960_v49 = vmul.f32 0.2, %v1958_v10 }
 0x92c   :  { %1977 = vst.msk [vmem:[#allocation5 + $0x8] sm:$0xe] %vm1976_vm5, %v1972_v48 }
 0x92d   :  { %1984 = vst.msk [vmem:[#allocation5 + $0x8] sm:$0xc0] %vm1983_vm6, %v1979_v39  ;;  %v1962_v50 = vmax.f32 %v1958_v10, %v1960_v49 }
 0x92e   :  { %1987 = vst.msk [vmem:[#allocation5 + $0x18] sm:$0x1] %vm1986_vm7, %v1979_v39 }
 0x92f   :  { %v1971_v51 = vrot.slane %v1962_v50, 7  ;;  %v1978_v52 = vrot.slane %v1962_v50, 5 }
 0x931   :  { %1975 = vst [vmem:[#allocation5] sm:$0xe] %v1971_v51 }
 0x932   :  { %1982 = vst [vmem:[#allocation5] sm:$0xc0] %v1978_v52 }
 0x933   :  { %1985 = vst [vmem:[#allocation5 + $0x10] sm:$0x1] %v1978_v52 }
 0x934   :  { %v1989_v47 = vld [vmem:[#allocation5 + $0x8] sm:$0xff] }
 0x935   :  { %v2015_v53 = vld [vmem:[#allocation5 + $0x8] sm:$0xfe]  ;;  %2403 = vmatmul.msk.f32.vlgmr.msrb.gmra.mxu0 %vm1733_vm11, %v1989_v47  ;;  %v2017_v43 = vld [vmem:[#allocation5 + $0x18] sm:$0x1] }
 0x936   :  { %v2051_v54 = vrot.slane %v2015_v53, 1  ;;  %v2052_v55 = vrot.slane %v2017_v43, 1  ;;  %v2141_v3 = vld [vmem:[#allocation5 + $0x8] sm:$0xfc]  ;;  %v2143_v4 = vld [vmem:[#allocation5 + $0x18] sm:$0x3] }
 0x937   :  { %v2176_v6 = vrot.slane %v2141_v3, 2  ;;  %v2177_v7 = vrot.slane %v2143_v4, 2 }
 0x938   :  { %v2053_v56 = vsel %vm2047_vm8, %v2051_v54, %v2052_v55 }
 0x939   :  { %2402 = vmatmul.msk.f32.vlgmr.msra.gmra.mxu3 %vm1733_vm11, %v2053_v56  ;;  %v1988_v57 = vld [vmem:[#allocation5] sm:$0xff]  ;;  %v2178_v8 = vsel %vm1717_vm12, %v2176_v6, %v2177_v7 }
 0x93a   :  { %v2014_v58 = vld [vmem:[#allocation5] sm:$0xfe]  ;;  %2116 = vmatmul.f32.vlgmr.msrb.gmra.mxu1 %v1988_v57  ;;  %v2016_v60 = vld [vmem:[#allocation5 + $0x10] sm:$0x1] }
 0x93b   :  { %v2140_v59 = vld [vmem:[#allocation5] sm:$0xfc]  ;;  %v2048_v61 = vrot.slane %v2014_v58, 1  ;;  %v2142_v62 = vld [vmem:[#allocation5 + $0x10] sm:$0x3]  ;;  %v2049_v63 = vrot.slane %v2016_v60, 1 }
 0x93c   :  { %v2173_v0 = vrot.slane %v2140_v59, 2  ;;  %v2174_v1 = vrot.slane %v2142_v62, 2 }
 0x93d   :  { %v2050_v2 = vsel %vm2047_vm8, %v2048_v61, %v2049_v63 }
 0x93e   :  { %2073 = vmatmul.f32.vlgmr.msrb.gmra.mxu2 %v2050_v2  ;;  %v2175_v5 = vsel %vm1717_vm12, %v2173_v0, %v2174_v1 }
 0x941   :  { %2198 = vmatmul.f32.vlgmr.msrb.gmra.mxu3 %v2175_v5 }
 0x946   :  { %2428 = vmatmul.msk.f32.vlgmr.msra.gmra.mxu2 %vm1733_vm11, %v2178_v8 }
 0x9b2   :  { %v2137_v20 = vpop.f32.mrf.mxu0 }
 0x9b7   :  { %v2117_v17 = vpop.f32.mrf.mxu1 }
 0x9bc   :  { %v2094_v11 = vpop.f32.mrf.mxu3 }
 0x9c1   :  { %v2074_v12 = vpop.f32.mrf.mxu2 }
 0x9c2   :  { %v2095_v13 = vadd.f32 %v2094_v11, %v2074_v12 }
 0x9c4   :  { %v2118_v19 = vadd.f32 %v2117_v17, %v2095_v13  ;;  %v2199_v21 = vpop.f32.mrf.mxu3 }
 0x9c6   :  { %v2138_v23 = vadd.f32 %v2137_v20, %v2118_v19 }
 0x9c9   :  { %v2219_v22 = vpop.f32.mrf.mxu2 }
 0x9ca   :  { %v2220_v14 = vadd.f32 %v2219_v22, %v2199_v21 }
 0x9cc   :  { %v2222_v15 = vadd.f32 %v2220_v14, %v2138_v23 }
 0x9ce   :  { %2247 = vmatpush.msra.mxu0 %v2222_v15 }
 0x9cf   :  { %2429 = vmatmul.msk.f32.vlgmr.msra.gmra.mxu0 %vm2228_vm9, %v2223_v16 }
 0xa4c   :  { %v2249_v25 = vpop.f32.mrf.mxu0 }
 0xa4d   :  { %v2250_v26 = vadd.f32 %v2451_v18, %v2249_v25 }
 0xa4f   :  { %2253 = vst.msk [vmem:[%s3887_s22] sm:$0x3f] %vm2252_vm10, %v2250_v26 }
 0xa50   :  { %2258 = vsyncpa [#allocation7], 1 }
 0xa51   :  { %2259 = vsyncpa [#allocation9], 1 }
 0xa52   :  { %2260 = vsyncpa [#allocation12], 1 }
 0xa53   :  { %2261 = vsyncpa [#allocation15], 1 }
 0xa54   :  { %2262 = vsyncpa [#allocation18], 1 }
 0xa55   :  { %2263 = vsyncpa [#allocation21], 1 }

</bundles_post_ra>
